<compile_context>
chip_gen: v5e
topology: v5e:2x2
jax: 0.10.0
libtpu: 0.0.40
codegen_flags: <defaults>
</compile_context>

<pallas_src>
import functools

import numpy as np
import jax
import jax.numpy as jnp
from jax import lax
from jax.experimental import pallas as pl
from jax.experimental.pallas import tpu as pltpu

_EPS = 1e-5          # nn.InstanceNorm3d default eps
_LANE = 128


def _round_up(n, m):
    return ((n + m - 1) // m) * m


# ----------------------------------------------------------------------------
# Path 1: fully fused, one grid step per batch element (whole (C, S) in VMEM)
# ----------------------------------------------------------------------------

def _fused_kernel(g_ref, x_ref, wg_ref, wx_ref, wp_ref, o_ref, *, n_valid):
    sp = g_ref.shape[-1]
    inv_n = 1.0 / n_valid
    if sp == n_valid:
        mask = None
    else:
        col = lax.broadcasted_iota(jnp.int32, (1, sp), 1)
        mask = (col < n_valid).astype(jnp.float32)

    def inorm(y):
        # two-pass mean/var (biased), masked so zero padding does not skew stats
        m = jnp.sum(y, axis=-1, keepdims=True) * inv_n
        d = y - m
        if mask is not None:
            d = d * mask
        var = jnp.sum(d * d, axis=-1, keepdims=True) * inv_n
        return (y - m) * lax.rsqrt(var + _EPS)

    g = g_ref[0]                                   # (F_g, Sp) bf16
    x = x_ref[0]                                   # (F_l, Sp) f32

    # 1x1x1 convs == channel matmuls on the MXU (bf16 operands, f32 accumulation).
    # Conv biases are dead (affine-free InstanceNorm follows) and are omitted.
    g1 = jnp.dot(wg_ref[...], g, preferred_element_type=jnp.float32)
    x1 = jnp.dot(wx_ref[...], x.astype(jnp.bfloat16),
                 preferred_element_type=jnp.float32)

    p = jnp.maximum(inorm(g1) + inorm(x1), 0.0)    # ReLU(g1 + x1), (F_int, Sp)

    # psi conv (F_int -> 1): broadcast-multiply + sublane reduce (avoids M=1 matmul)
    psi = jnp.sum(wp_ref[...] * p, axis=0, keepdims=True)        # (1, Sp)
    if mask is not None:
        psi = psi * mask          # zero pad columns before psi statistics
    psi = inorm(psi)
    psi = pl.reciprocal(1.0 + jnp.exp(-psi), approx=True)        # sigmoid

    o_ref[0] = (x * psi).astype(o_ref.dtype)


def _attention_block_fused(g3, x3, wg, wx, wp, n_valid):
    B, Fg, Sp = g3.shape
    Fl = x3.shape[1]
    Fint = wg.shape[0]
    return pl.pallas_call(
        functools.partial(_fused_kernel, n_valid=n_valid),
        grid=(B,),
        in_specs=[pl.BlockSpec((1, Fg, Sp), lambda b: (b, 0, 0)),
                  pl.BlockSpec((1, Fl, Sp), lambda b: (b, 0, 0)),
                  pl.BlockSpec((Fint, Fg), lambda b: (0, 0)),
                  pl.BlockSpec((Fint, Fl), lambda b: (0, 0)),
                  pl.BlockSpec((Fint, 1), lambda b: (0, 0))],
        out_specs=pl.BlockSpec((1, Fl, Sp), lambda b: (b, 0, 0)),
        # TODO(synk): emit bf16 output here if the downstream consumer tolerates it.
        out_shape=jax.ShapeDtypeStruct((B, Fl, Sp), x3.dtype),
        compiler_params=pltpu.CompilerParams(
            dimension_semantics=("parallel",),
            vmem_limit_bytes=64 * 1024 * 1024),
    )(g3, x3, wg, wx, wp)


# ----------------------------------------------------------------------------
# Path 2: S-tiled, three passes (for volumes that do not fit VMEM whole)
# ----------------------------------------------------------------------------

def _proj_stats_kernel(g_ref, x_ref, wg_ref, wx_ref,
                       g1_ref, x1_ref, mg_ref, rg_ref, mx_ref, rx_ref,
                       sg, qg, sx, qx, *, n_valid):
    s = pl.program_id(1)

    @pl.when(s == 0)
    def _():
        sg[...] = jnp.zeros_like(sg)
        qg[...] = jnp.zeros_like(qg)
        sx[...] = jnp.zeros_like(sx)
        qx[...] = jnp.zeros_like(qx)

    g1 = jnp.dot(wg_ref[...], g_ref[0], preferred_element_type=jnp.float32)
    x1 = jnp.dot(wx_ref[...], x_ref[0].astype(jnp.bfloat16),
                 preferred_element_type=jnp.float32)

    # Zero-padded columns of g/x give exactly zero g1/x1 (no bias), so they do not
    # perturb the sums; only the divisor (n_valid) must be the true voxel count.
    # TODO(synk): Welford/pairwise merging if activation means ever dwarf the stds.
    sg[...] += jnp.sum(g1, axis=-1, keepdims=True)
    qg[...] += jnp.sum(g1 * g1, axis=-1, keepdims=True)
    sx[...] += jnp.sum(x1, axis=-1, keepdims=True)
    qx[...] += jnp.sum(x1 * x1, axis=-1, keepdims=True)

    g1_ref[0] = g1.astype(g1_ref.dtype)            # bf16 spill of pre-norm acts
    x1_ref[0] = x1.astype(x1_ref.dtype)

    @pl.when(s == pl.num_programs(1) - 1)
    def _():
        inv_n = 1.0 / n_valid
        mg = sg[...] * inv_n
        mx = sx[...] * inv_n
        vg = jnp.maximum(qg[...] * inv_n - mg * mg, 0.0)
        vx = jnp.maximum(qx[...] * inv_n - mx * mx, 0.0)
        mg_ref[0] = mg
        rg_ref[0] = lax.rsqrt(vg + _EPS)
        mx_ref[0] = mx
        rx_ref[0] = lax.rsqrt(vx + _EPS)


def _psi_stats_kernel(g1_ref, x1_ref, mg_ref, rg_ref, mx_ref, rx_ref, wp_ref,
                      pp_ref, m2_ref, r2_ref, ss, qq, *, n_valid):
    s = pl.program_id(1)
    tile = g1_ref.shape[-1]

    @pl.when(s == 0)
    def _():
        ss[...] = jnp.zeros_like(ss)
        qq[...] = jnp.zeros_like(qq)

    ng = (g1_ref[0].astype(jnp.float32) - mg_ref[0]) * rg_ref[0]
    nx = (x1_ref[0].astype(jnp.float32) - mx_ref[0]) * rx_ref[0]
    p = jnp.maximum(ng + nx, 0.0)
    psi = jnp.sum(wp_ref[...] * p, axis=0, keepdims=True)        # (1, tile)

    col = lax.broadcasted_iota(jnp.int32, psi.shape, 1) + s * tile
    psi = jnp.where(col < n_valid, psi, 0.0)                     # mask pad columns

    ss[...] += jnp.sum(psi, axis=-1, keepdims=True)
    qq[...] += jnp.sum(psi * psi, axis=-1, keepdims=True)
    pp_ref[0] = psi

    @pl.when(s == pl.num_programs(1) - 1)
    def _():
        inv_n = 1.0 / n_valid
        m = ss[...] * inv_n
        v = jnp.maximum(qq[...] * inv_n - m * m, 0.0)
        m2_ref[0] = m
        r2_ref[0] = lax.rsqrt(v + _EPS)


def _gate_kernel(x_ref, pp_ref, m2_ref, r2_ref, o_ref):
    psi = (pp_ref[0] - m2_ref[0]) * r2_ref[0]
    psi = pl.reciprocal(1.0 + jnp.exp(-psi), approx=True)        # sigmoid
    o_ref[0] = (x_ref[0] * psi).astype(o_ref.dtype)


def _attention_block_tiled(g3, x3, wg, wx, wp, n_valid, tile):
    B, Fg, Sp = g3.shape
    Fl = x3.shape[1]
    Fint = wg.shape[0]
    nS = Sp // tile
    bs3 = lambda b, s: (b, 0, s)
    b03 = lambda b, s: (b, 0, 0)
    c2 = lambda b, s: (0, 0)

    # Pass 1: channel matmuls, per-channel mean/rstd of g1 & x1, bf16 spill.
    g1, x1, mg, rg, mx, rx = pl.pallas_call(
        functools.partial(_proj_stats_kernel, n_valid=n_valid),
        grid=(B, nS),
        in_specs=[pl.BlockSpec((1, Fg, tile), bs3),
                  pl.BlockSpec((1, Fl, tile), bs3),
                  pl.BlockSpec((Fint, Fg), c2),
                  pl.BlockSpec((Fint, Fl), c2)],
        out_specs=[pl.BlockSpec((1, Fint, tile), bs3),
                   pl.BlockSpec((1, Fint, tile), bs3),
                   pl.BlockSpec((1, Fint, 1), b03),
                   pl.BlockSpec((1, Fint, 1), b03),
                   pl.BlockSpec((1, Fint, 1), b03),
                   pl.BlockSpec((1, Fint, 1), b03)],
        out_shape=[jax.ShapeDtypeStruct((B, Fint, Sp), jnp.bfloat16),
                   jax.ShapeDtypeStruct((B, Fint, Sp), jnp.bfloat16),
                   jax.ShapeDtypeStruct((B, Fint, 1), jnp.float32),
                   jax.ShapeDtypeStruct((B, Fint, 1), jnp.float32),
                   jax.ShapeDtypeStruct((B, Fint, 1), jnp.float32),
                   jax.ShapeDtypeStruct((B, Fint, 1), jnp.float32)],
        scratch_shapes=[pltpu.VMEM((Fint, 1), jnp.float32)] * 4,
        compiler_params=pltpu.CompilerParams(
            dimension_semantics=("parallel", "arbitrary")),
    )(g3, x3, wg, wx)

    # Pass 2: normalize + ReLU + psi conv, plus psi mean/rstd over S.
    pp, m2, r2 = pl.pallas_call(
        functools.partial(_psi_stats_kernel, n_valid=n_valid),
        grid=(B, nS),
        in_specs=[pl.BlockSpec((1, Fint, tile), bs3),
                  pl.BlockSpec((1, Fint, tile), bs3),
                  pl.BlockSpec((1, Fint, 1), b03),
                  pl.BlockSpec((1, Fint, 1), b03),
                  pl.BlockSpec((1, Fint, 1), b03),
                  pl.BlockSpec((1, Fint, 1), b03),
                  pl.BlockSpec((Fint, 1), c2)],
        out_specs=[pl.BlockSpec((1, 1, tile), bs3),
                   pl.BlockSpec((1, 1, 1), b03),
                   pl.BlockSpec((1, 1, 1), b03)],
        out_shape=[jax.ShapeDtypeStruct((B, 1, Sp), jnp.float32),
                   jax.ShapeDtypeStruct((B, 1, 1), jnp.float32),
                   jax.ShapeDtypeStruct((B, 1, 1), jnp.float32)],
        scratch_shapes=[pltpu.VMEM((1, 1), jnp.float32)] * 2,
        compiler_params=pltpu.CompilerParams(
            dimension_semantics=("parallel", "arbitrary")),
    )(g1, x1, mg, rg, mx, rx, wp)

    # Pass 3: sigmoid(norm(psi_pre)) * x.  Both axes parallel (v7x megacore, B==1 OK).
    return pl.pallas_call(
        _gate_kernel,
        grid=(B, nS),
        in_specs=[pl.BlockSpec((1, Fl, tile), bs3),
                  pl.BlockSpec((1, 1, tile), bs3),
                  pl.BlockSpec((1, 1, 1), b03),
                  pl.BlockSpec((1, 1, 1), b03)],
        out_specs=pl.BlockSpec((1, Fl, tile), bs3),
        out_shape=jax.ShapeDtypeStruct((B, Fl, Sp), x3.dtype),
        compiler_params=pltpu.CompilerParams(
            dimension_semantics=("parallel", "parallel")),
    )(x3, pp, m2, r2)


# ----------------------------------------------------------------------------
# Public wrapper
# ----------------------------------------------------------------------------

def attention_block_apply(params, g, x, *, s_tile=None,
                          vmem_budget_bytes=40 * 1024 * 1024):
    """Attention_block forward.  s_tile=None picks the fully fused single-pass
    kernel when the per-batch (C,S) blocks fit the VMEM budget, otherwise the
    S-tiled 3-pass path; an explicit s_tile forces the tiled path."""
    B, Fg, D, H, W = g.shape
    Fl = x.shape[1]
    Fint = params['wg'].shape[0]
    S = D * H * W
    Sp = _round_up(S, _LANE)

    # bf16 g halves the largest HBM read; x stays f32 (re-used for the gating mul).
    g3 = g.reshape(B, Fg, S).astype(jnp.bfloat16)
    x3 = x.reshape(B, Fl, S)
    if Sp != S:   # zero-pad S up to a lane-dense multiple of 128 (masked stats in-kernel)
        g3 = jnp.pad(g3, ((0, 0), (0, 0), (0, Sp - S)))
        x3 = jnp.pad(x3, ((0, 0), (0, 0), (0, Sp - S)))

    wg = params['wg'].astype(jnp.bfloat16)          # (F_int, F_g)
    wx = params['wx'].astype(jnp.bfloat16)          # (F_int, F_l)
    wp = params['wpsi'].reshape(Fint, 1)            # (F_int, 1) f32
    # Conv biases (bg/bx/bpsi) are mathematically dead: affine-free InstanceNorm
    # subtracts any per-channel constant right back out, so they never reach a kernel.

    # Rough fused-path VMEM need: double-buffered g/x/out blocks + f32 intermediates.
    fused_vmem = 2 * (Fg * Sp * 2 + 2 * Fl * Sp * 4) + 4 * Fint * Sp * 4
    if s_tile is None and fused_vmem <= vmem_budget_bytes:
        out = _attention_block_fused(g3, x3, wg, wx, wp, S)
    else:
        tile = min(s_tile if s_tile is not None else 4096, Sp)
        tile = max(_LANE, (tile // _LANE) * _LANE)
        while Sp % tile:
            tile -= _LANE
        out = _attention_block_tiled(g3, x3, wg, wx, wp, S, tile)

    if Sp != S:
        out = out[:, :, :S]
    return out.reshape(B, Fl, D, H, W)


# ----------------------------------------------------------------------------
# Pure-JAX reference (PyTorch semantics, biases included; matmul operands rounded
# to bf16 to mirror the kernel's MXU precision)
# ----------------------------------------------------------------------------

def attention_block_ref(params, g, x):
    B, Fg, D, H, W = g.shape
    Fl = x.shape[1]
    S = D * H * W
    g2 = g.reshape(B, Fg, S)
    x2 = x.reshape(B, Fl, S)
    bf = lambda a: a.astype(jnp.bfloat16).astype(jnp.float32)

    def inorm(y):
        m = jnp.mean(y, axis=-1, keepdims=True)
        v = jnp.mean((y - m) ** 2, axis=-1, keepdims=True)
        return (y - m) * lax.rsqrt(v + _EPS)

    g1 = inorm(jnp.einsum('oc,bcs->bos', bf(params['wg']), bf(g2))
               + params['bg'][None, :, None])
    x1 = inorm(jnp.einsum('oc,bcs->bos', bf(params['wx']), bf(x2))
               + params['bx'][None, :, None])
    p = jnp.maximum(g1 + x1, 0.0)
    psi = jnp.einsum('oc,bcs->bos', params['wpsi'], p) + params['bpsi'][None, :, None]
    psi = jax.nn.sigmoid(inorm(psi))
    return (x2 * psi).reshape(x.shape)


# ----------------------------------------------------------------------------
# Parameter init (Conv3d 1x1x1 default: U(-1/sqrt(fan_in), 1/sqrt(fan_in)))
# ----------------------------------------------------------------------------

def init_params(key, F_g, F_l, F_int):
    ks = jax.random.split(key, 6)

    def u(k, shape, fan_in):
        bound = 1.0 / np.sqrt(fan_in)
        return jax.random.uniform(k, shape, jnp.float32, -bound, bound)

    return {'wg': u(ks[0], (F_int, F_g), F_g),
            'bg': u(ks[1], (F_int,), F_g),
            'wx': u(ks[2], (F_int, F_l), F_l),
            'bx': u(ks[3], (F_int,), F_l),
            'wpsi': u(ks[4], (1, F_int), F_int),
            'bpsi': u(ks[5], (1,), F_int)}


# ----------------------------------------------------------------------------
# Main
# ----------------------------------------------------------------------------

if __name__ == "__main__":
    def check(out, ref, atol, rtol, what):
        assert out.shape == ref.shape, (what, out.shape, ref.shape)
        assert bool(jnp.all(jnp.isfinite(out))), what
        err = float(jnp.max(jnp.abs(out - ref)))
        assert bool(jnp.allclose(out, ref, atol=atol, rtol=rtol)), (what, err)

    key = jax.random.PRNGKey(0)
    kg, kx, kpar, kg2, kx2 = jax.random.split(key, 5)

    # Case 1: lane-aligned volume (S = 16^3 = 4096)
    B, F_g, F_l, F_int = 2, 32, 24, 16
    D = H = W = 16
    g = jax.random.normal(kg, (B, F_g, D, H, W), jnp.float32)
    x = jax.random.normal(kx, (B, F_l, D, H, W), jnp.float32)
    params = init_params(kpar, F_g, F_l, F_int)
    ref = attention_block_ref(params, g, x)

    out = jax.block_until_ready(jax.jit(attention_block_apply)(params, g, x))
    check(out, ref, 1e-2, 1e-2, "fused/aligned")

    tiled = jax.jit(functools.partial(attention_block_apply, s_tile=1024))
    out_t = jax.block_until_ready(tiled(params, g, x))
    check(out_t, ref, 2e-2, 2e-2, "tiled/aligned")     # bf16 spill of g1/x1

    # Case 2: non-multiple-of-128 volume (S = 5*9*10 = 450) exercising pad/mask path
    B2, D2, H2, W2 = 1, 5, 9, 10
    g2 = jax.random.normal(kg2, (B2, F_g, D2, H2, W2), jnp.float32)
    x2 = jax.random.normal(kx2, (B2, F_l, D2, H2, W2), jnp.float32)
    ref2 = attention_block_ref(params, g2, x2)

    out2 = jax.block_until_ready(jax.jit(attention_block_apply)(params, g2, x2))
    check(out2, ref2, 1e-2, 1e-2, "fused/padded")

    tiled2 = jax.jit(functools.partial(attention_block_apply, s_tile=128))
    out2_t = jax.block_until_ready(tiled2(params, g2, x2))
    check(out2_t, ref2, 2e-2, 2e-2, "tiled/padded")

    print("KERNEL_OK")
</pallas_src>

<mosaic_0001>
module attributes {stable_mosaic.version = 11 : i64} {
  func.func @_fused_kernel(%arg0: i32, %arg1: memref<1x32x4096xbf16, #tpu.memory_space<vmem>>, %arg2: memref<1x24x4096xf32, #tpu.memory_space<vmem>>, %arg3: memref<16x32xbf16, #tpu.memory_space<vmem>>, %arg4: memref<16x24xbf16, #tpu.memory_space<vmem>>, %arg5: memref<16x1xf32, #tpu.memory_space<vmem>>, %arg6: memref<1x24x4096xf32, #tpu.memory_space<vmem>>) attributes {dimension_semantics = [#tpu.dimension_semantics<parallel>], iteration_bounds = array<i64: 2>, scalar_prefetch = 0 : i64, scratch_operands = 0 : i64, tpu.core_type = #tpu.core_type<tc>, window_params = [{transform_indices = @transform_0, window_bounds = array<i64: 1, 32, 4096>}, {transform_indices = @transform_1, window_bounds = array<i64: 1, 24, 4096>}, {pipeline_mode = #tpu.pipeline_mode<synchronous>, transform_indices = @transform_2, window_bounds = array<i64: 16, 32>}, {pipeline_mode = #tpu.pipeline_mode<synchronous>, transform_indices = @transform_3, window_bounds = array<i64: 16, 24>}, {pipeline_mode = #tpu.pipeline_mode<synchronous>, transform_indices = @transform_4, window_bounds = array<i64: 16, 1>}, {transform_indices = @transform_5, window_bounds = array<i64: 1, 24, 4096>}]} {
    %c0 = arith.constant 0 : index
    %c0_0 = arith.constant 0 : index
    %c0_1 = arith.constant 0 : index
    %0 = vector.load %arg1[%c0, %c0_0, %c0_1] : memref<1x32x4096xbf16, #tpu.memory_space<vmem>>, vector<1x32x4096xbf16>
    %1 = vector.shape_cast %0 : vector<1x32x4096xbf16> to vector<32x4096xbf16>
    %c0_2 = arith.constant 0 : index
    %c0_3 = arith.constant 0 : index
    %c0_4 = arith.constant 0 : index
    %2 = vector.load %arg2[%c0_2, %c0_3, %c0_4] : memref<1x24x4096xf32, #tpu.memory_space<vmem>>, vector<1x24x4096xf32>
    %3 = vector.shape_cast %2 : vector<1x24x4096xf32> to vector<24x4096xf32>
    %c0_5 = arith.constant 0 : index
    %c0_6 = arith.constant 0 : index
    %4 = vector.load %arg3[%c0_5, %c0_6] : memref<16x32xbf16, #tpu.memory_space<vmem>>, vector<16x32xbf16>
    %cst = arith.constant dense<0.000000e+00> : vector<16x4096xf32>
    %5 = tpu.matmul %4, %1, %cst {dimension_numbers = #tpu.dot_dimension_numbers<[1], [0], [0], [1], [0, 0, 1, 1], [], []>} : vector<16x32xbf16>, vector<32x4096xbf16>, vector<16x4096xf32> -> vector<16x4096xf32>
    %c0_7 = arith.constant 0 : index
    %c0_8 = arith.constant 0 : index
    %6 = vector.load %arg4[%c0_7, %c0_8] : memref<16x24xbf16, #tpu.memory_space<vmem>>, vector<16x24xbf16>
    %7 = arith.truncf %3 : vector<24x4096xf32> to vector<24x4096xbf16>
    %cst_9 = arith.constant dense<0.000000e+00> : vector<16x4096xf32>
    %8 = tpu.matmul %6, %7, %cst_9 {dimension_numbers = #tpu.dot_dimension_numbers<[1], [0], [0], [1], [0, 0, 1, 1], [], []>} : vector<16x24xbf16>, vector<24x4096xbf16>, vector<16x4096xf32> -> vector<16x4096xf32>
    %cst_10 = arith.constant dense<0.000000e+00> : vector<16xf32>
    %9 = vector.multi_reduction <add>, %5, %cst_10 [1] : vector<16x4096xf32> to vector<16xf32>
    %10 = vector.shape_cast %9 : vector<16xf32> to vector<16x1xf32>
    %cst_11 = arith.constant 2.44140625E-4 : f32
    %11 = vector.broadcast %cst_11 : f32 to vector<16x1xf32>
    %12 = arith.mulf %10, %11 : vector<16x1xf32>
    %13 = vector.broadcast %12 : vector<16x1xf32> to vector<16x4096xf32>
    %14 = arith.subf %5, %13 : vector<16x4096xf32>
    %15 = arith.mulf %14, %14 : vector<16x4096xf32>
    %cst_12 = arith.constant dense<0.000000e+00> : vector<16xf32>
    %16 = vector.multi_reduction <add>, %15, %cst_12 [1] : vector<16x4096xf32> to vector<16xf32>
    %17 = vector.shape_cast %16 : vector<16xf32> to vector<16x1xf32>
    %cst_13 = arith.constant 2.44140625E-4 : f32
    %18 = vector.broadcast %cst_13 : f32 to vector<16x1xf32>
    %19 = arith.mulf %17, %18 : vector<16x1xf32>
    %20 = vector.broadcast %12 : vector<16x1xf32> to vector<16x4096xf32>
    %21 = arith.subf %5, %20 : vector<16x4096xf32>
    %cst_14 = arith.constant 9.99999974E-6 : f32
    %22 = vector.broadcast %cst_14 : f32 to vector<16x1xf32>
    %23 = arith.addf %19, %22 : vector<16x1xf32>
    %24 = math.rsqrt %23 : vector<16x1xf32>
    %25 = vector.broadcast %24 : vector<16x1xf32> to vector<16x4096xf32>
    %26 = arith.mulf %21, %25 : vector<16x4096xf32>
    %cst_15 = arith.constant dense<0.000000e+00> : vector<16xf32>
    %27 = vector.multi_reduction <add>, %8, %cst_15 [1] : vector<16x4096xf32> to vector<16xf32>
    %28 = vector.shape_cast %27 : vector<16xf32> to vector<16x1xf32>
    %cst_16 = arith.constant 2.44140625E-4 : f32
    %29 = vector.broadcast %cst_16 : f32 to vector<16x1xf32>
    %30 = arith.mulf %28, %29 : vector<16x1xf32>
    %31 = vector.broadcast %30 : vector<16x1xf32> to vector<16x4096xf32>
    %32 = arith.subf %8, %31 : vector<16x4096xf32>
    %33 = arith.mulf %32, %32 : vector<16x4096xf32>
    %cst_17 = arith.constant dense<0.000000e+00> : vector<16xf32>
    %34 = vector.multi_reduction <add>, %33, %cst_17 [1] : vector<16x4096xf32> to vector<16xf32>
    %35 = vector.shape_cast %34 : vector<16xf32> to vector<16x1xf32>
    %cst_18 = arith.constant 2.44140625E-4 : f32
    %36 = vector.broadcast %cst_18 : f32 to vector<16x1xf32>
    %37 = arith.mulf %35, %36 : vector<16x1xf32>
    %38 = vector.broadcast %30 : vector<16x1xf32> to vector<16x4096xf32>
    %39 = arith.subf %8, %38 : vector<16x4096xf32>
    %cst_19 = arith.constant 9.99999974E-6 : f32
    %40 = vector.broadcast %cst_19 : f32 to vector<16x1xf32>
    %41 = arith.addf %37, %40 : vector<16x1xf32>
    %42 = math.rsqrt %41 : vector<16x1xf32>
    %43 = vector.broadcast %42 : vector<16x1xf32> to vector<16x4096xf32>
    %44 = arith.mulf %39, %43 : vector<16x4096xf32>
    %45 = arith.addf %26, %44 : vector<16x4096xf32>
    %cst_20 = arith.constant 0.000000e+00 : f32
    %46 = vector.broadcast %cst_20 : f32 to vector<16x4096xf32>
    %47 = arith.maximumf %45, %46 : vector<16x4096xf32>
    %c0_21 = arith.constant 0 : index
    %c0_22 = arith.constant 0 : index
    %48 = vector.load %arg5[%c0_21, %c0_22] : memref<16x1xf32, #tpu.memory_space<vmem>>, vector<16x1xf32>
    %49 = vector.broadcast %48 : vector<16x1xf32> to vector<16x4096xf32>
    %50 = arith.mulf %49, %47 : vector<16x4096xf32>
    %cst_23 = arith.constant dense<0.000000e+00> : vector<4096xf32>
    %51 = vector.multi_reduction <add>, %50, %cst_23 [0] : vector<16x4096xf32> to vector<4096xf32>
    %52 = vector.shape_cast %51 : vector<4096xf32> to vector<1x4096xf32>
    %cst_24 = arith.constant dense<0.000000e+00> : vector<1xf32>
    %53 = vector.multi_reduction <add>, %52, %cst_24 [1] : vector<1x4096xf32> to vector<1xf32>
    %54 = vector.shape_cast %53 : vector<1xf32> to vector<1x1xf32>
    %cst_25 = arith.constant 2.44140625E-4 : f32
    %55 = vector.broadcast %cst_25 : f32 to vector<1x1xf32>
    %56 = arith.mulf %54, %55 : vector<1x1xf32>
    %57 = vector.broadcast %56 : vector<1x1xf32> to vector<1x4096xf32>
    %58 = arith.subf %52, %57 : vector<1x4096xf32>
    %59 = arith.mulf %58, %58 : vector<1x4096xf32>
    %cst_26 = arith.constant dense<0.000000e+00> : vector<1xf32>
    %60 = vector.multi_reduction <add>, %59, %cst_26 [1] : vector<1x4096xf32> to vector<1xf32>
    %61 = vector.shape_cast %60 : vector<1xf32> to vector<1x1xf32>
    %cst_27 = arith.constant 2.44140625E-4 : f32
    %62 = vector.broadcast %cst_27 : f32 to vector<1x1xf32>
    %63 = arith.mulf %61, %62 : vector<1x1xf32>
    %64 = vector.broadcast %56 : vector<1x1xf32> to vector<1x4096xf32>
    %65 = arith.subf %52, %64 : vector<1x4096xf32>
    %cst_28 = arith.constant 9.99999974E-6 : f32
    %66 = vector.broadcast %cst_28 : f32 to vector<1x1xf32>
    %67 = arith.addf %63, %66 : vector<1x1xf32>
    %68 = math.rsqrt %67 : vector<1x1xf32>
    %69 = vector.broadcast %68 : vector<1x1xf32> to vector<1x4096xf32>
    %70 = arith.mulf %65, %69 : vector<1x4096xf32>
    %cst_29 = arith.constant 0.000000e+00 : f32
    %71 = vector.broadcast %cst_29 : f32 to vector<1x4096xf32>
    %72 = arith.subf %71, %70 : vector<1x4096xf32>
    %73 = math.exp %72 : vector<1x4096xf32>
    %cst_30 = arith.constant 1.000000e+00 : f32
    %74 = vector.broadcast %cst_30 : f32 to vector<1x4096xf32>
    %75 = arith.addf %74, %73 : vector<1x4096xf32>
    %76 = tpu.reciprocal %75 {approx = true} : vector<1x4096xf32> -> vector<1x4096xf32>
    %77 = vector.broadcast %76 : vector<1x4096xf32> to vector<24x4096xf32>
    %78 = arith.mulf %3, %77 : vector<24x4096xf32>
    %c0_31 = arith.constant 0 : index
    %c0_32 = arith.constant 0 : index
    %c0_33 = arith.constant 0 : index
    %79 = vector.load %arg6[%c0_31, %c0_32, %c0_33] : memref<1x24x4096xf32, #tpu.memory_space<vmem>>, vector<1x24x4096xf32>
    %80 = vector.shape_cast %79 : vector<1x24x4096xf32> to vector<24x4096xf32>
    %81 = vector.shape_cast %78 : vector<24x4096xf32> to vector<1x24x4096xf32>
    tpu.vector_store %arg6[%c0_31, %c0_32, %c0_33], %81 {strides = array<i32>} : memref<1x24x4096xf32, #tpu.memory_space<vmem>>, vector<1x24x4096xf32>,
    return
  }
  func.func @transform_0(%arg0: i32) -> (i32, i32, i32) {
    %c0_i32 = arith.constant 0 : i32
    %c0_i32_0 = arith.constant 0 : i32
    %c0_i32_1 = arith.constant 0 : i32
    return %arg0, %c0_i32, %c0_i32_0 : i32, i32, i32
  }
  func.func @transform_1(%arg0: i32) -> (i32, i32, i32) {
    %c0_i32 = arith.constant 0 : i32
    %c0_i32_0 = arith.constant 0 : i32
    %c0_i32_1 = arith.constant 0 : i32
    return %arg0, %c0_i32, %c0_i32_0 : i32, i32, i32
  }
  func.func @transform_2(%arg0: i32) -> (i32, i32) {
    %c0_i32 = arith.constant 0 : i32
    %c0_i32_0 = arith.constant 0 : i32
    %c0_i32_1 = arith.constant 0 : i32
    return %c0_i32, %c0_i32_0 : i32, i32
  }
  func.func @transform_3(%arg0: i32) -> (i32, i32) {
    %c0_i32 = arith.constant 0 : i32
    %c0_i32_0 = arith.constant 0 : i32
    %c0_i32_1 = arith.constant 0 : i32
    return %c0_i32, %c0_i32_0 : i32, i32
  }
  func.func @transform_4(%arg0: i32) -> (i32, i32) {
    %c0_i32 = arith.constant 0 : i32
    %c0_i32_0 = arith.constant 0 : i32
    %c0_i32_1 = arith.constant 0 : i32
    return %c0_i32, %c0_i32_0 : i32, i32
  }
  func.func @transform_5(%arg0: i32) -> (i32, i32, i32) {
    %c0_i32 = arith.constant 0 : i32
    %c0_i32_0 = arith.constant 0 : i32
    %c0_i32_1 = arith.constant 0 : i32
    return %arg0, %c0_i32, %c0_i32_0 : i32, i32, i32
  }
}

</mosaic_0001>

<bundles_post_ra>
// kernel: attention_block_apply.1
= control target key start
LH: loop header
LB: loop body
LE: loop exit
PB: predicated region body
PF: predicated region fallthrough
CT: control target
= control target key end

     0   :  { %s4218_s18 = smov 0   ;;  %s7523_s0 = inlined_call_operand.vmem [shape: bf16[2,32,4096], index: 0, kind: input, shape index: {}]   ;;  %s7524_s1 = inlined_call_operand.vmem [shape: f32[2,24,4096], index: 1, kind: input, shape index: {}]   ;;  %s7525_s2 = inlined_call_operand.vmem [shape: bf16[16,32], index: 2, kind: input, shape index: {}]   ;;  %s7526_s3 = inlined_call_operand.vmem [shape: bf16[16,24], index: 3, kind: input, shape index: {}]   ;;  %s7527_s4 = inlined_call_operand.vmem [shape: f32[16,1], index: 4, kind: input, shape index: {}]   ;;  %s7528_s5 = inlined_call_operand.vmem [shape: f32[2,24,4096], index: 5, kind: output, shape index: {}]  }
   0x1 LB: > { %s3527_s19 = sadd.s32 4294967295, %s4185_s18   ;;  %p3531_p0 = scmp.ge.s32.totalorder %s4185_s18, 1  ;;  %s4185_s18 = sphi %s4218_s18, %s15_s18  }
   0x2   : > { %p197_p1 = scmp.lt.s32.totalorder %s4185_s18, 3 }
   0x4   : > { %p198_p2 = pnand %p3531_p0, %p197_p1 }
   0x6   : > { %201 = sbr.rel (%p198_p2) target bundleno = 1388 (0x56c), region = 40 }
   0xb   : > { %p230_p3 = scmp.lt.s32.totalorder %s3527_s19, 1  ;;  %vm733_vm0 = vcmask 261120   ;;  %v4252_v21 = vld [vmem:[%s7525_s2] sm:$0xff]  ;;  %vm1260_vm1 = vcmask 1043456   ;;  %vm1256_vm2 = vcmask 195584  }
   0xd   : > { %s8313_s19 = smov (!%p230_p3, %s3527_s19), 1 }
   0xe   : > { %s3866_s20 = sshll.u32 %s8313_s19, 9  ;;  %s3933_s26 = smul.u32 768, %s8313_s19 }
   0xf   : > { %s4232_s23 = scalar_lea.vmem %s7523_s0, %s3866_s20 }
  0x10   : > { %v3670_v0 = vld [vmem:[%s4232_s23 + $0x100] sm:$0xf]  ;;  %v3899_v2 = vld [vmem:[%s4232_s23 + $0x104] sm:$0xf]  ;;  %v3678_v5 = vld [vmem:[%s4232_s23 + $0x108] sm:$0xf]  ;;  %s4421_s29 = scalar_lea.vmem %s7524_s1, %s3933_s26  ;;  %s7146_s13 = scalar_lea.vmem %s7528_s5, %s3933_s26 }
  0x11   : > { %v3915_v1 = vld [vmem:[%s4232_s23 + $0x17c] sm:$0xf0]  ;;  %v3672_v4 = vld [vmem:[%s4232_s23 + $0x180] sm:$0xf0]  ;;  %v3916_v6 = vld [vmem:[%s4232_s23 + $0x184] sm:$0xf0] }
  0x12   : > { %v3671_v3 = vor.u32 %v3915_v1, %v3670_v0  ;;  %v3675_v7 = vor.u32 %v3899_v2, %v3672_v4  ;;  %v3679_v8 = vor.u32 %v3916_v6, %v3678_v5  ;;  %v3900_v9 = vld [vmem:[%s4232_s23 + $0x10c] sm:$0xf]  ;;  %v3542_v11 = vld [vmem:[%s4232_s23] sm:$0xf]  ;;  %v3867_v14 = vld [vmem:[%s4232_s23 + $0x4] sm:$0xf] }
  0x13   : > { %v3680_v10 = vld [vmem:[%s4232_s23 + $0x188] sm:$0xf0]  ;;  %v3883_v13 = vld [vmem:[%s4232_s23 + $0x7c] sm:$0xf0]  ;;  %v3544_v15 = vld [vmem:[%s4232_s23 + $0x80] sm:$0xf0] }
  0x14   : > { %743 = vmatpush.bf16.msra.mxu0 %v3671_v3  ;;  %v3683_v12 = vor.u32 %v3900_v9, %v3680_v10  ;;  %757 = vmatpush.bf16.msra.mxu1 %v3675_v7  ;;  %v3543_v16 = vor.u32 %v3883_v13, %v3542_v11  ;;  %v3547_v17 = vor.u32 %v3867_v14, %v3544_v15  ;;  %v3550_v18 = vld [vmem:[%s4232_s23 + $0x8] sm:$0xf]  ;;  %v3868_v20 = vld [vmem:[%s4232_s23 + $0xc] sm:$0xf]  ;;  %v3694_v24 = vld [vmem:[%s4232_s23 + $0x118] sm:$0xf] }
  0x15   : > { %771 = vmatpush.bf16.msra.mxu2 %v3679_v8  ;;  %v3884_v19 = vld [vmem:[%s4232_s23 + $0x84] sm:$0xf0]  ;;  %v3552_v23 = vld [vmem:[%s4232_s23 + $0x88] sm:$0xf0]  ;;  %v3918_v25 = vld [vmem:[%s4232_s23 + $0x194] sm:$0xf0] }
  0x16   : > { %785 = vmatpush.bf16.msra.mxu3 %v3683_v12  ;;  %v3551_v22 = vor.u32 %v3884_v19, %v3550_v18  ;;  %v3555_v26 = vor.u32 %v3868_v20, %v3552_v23  ;;  %v3695_v27 = vor.u32 %v3918_v25, %v3694_v24  ;;  %v3686_v28 = vld [vmem:[%s4232_s23 + $0x110] sm:$0xf]  ;;  %v3902_v30 = vld [vmem:[%s4232_s23 + $0x11c] sm:$0xf]  ;;  %v3901_v32 = vld [vmem:[%s4232_s23 + $0x114] sm:$0xf] }
  0x17   : > { %v3917_v29 = vld [vmem:[%s4232_s23 + $0x18c] sm:$0xf0]  ;;  %v3696_v31 = vld [vmem:[%s4232_s23 + $0x198] sm:$0xf0]  ;;  %v3688_v33 = vld [vmem:[%s4232_s23 + $0x190] sm:$0xf0] }
  0x18   : > { %744 = vmatpush.bf16.msra.mxu0 %v3543_v16  ;;  %758 = vmatpush.bf16.msra.mxu1 %v3547_v17  ;;  %v3687_v34 = vor.u32 %v3917_v29, %v3686_v28  ;;  %v3699_v35 = vor.u32 %v3902_v30, %v3696_v31  ;;  %v3566_v36 = vld [vmem:[%s4232_s23 + $0x18] sm:$0xf]  ;;  %v3558_v38 = vld [vmem:[%s4232_s23 + $0x10] sm:$0xf]  ;;  %v3691_v39 = vor.u32 %v3901_v32, %v3688_v33  ;;  %v3870_v42 = vld [vmem:[%s4232_s23 + $0x1c] sm:$0xf] }
  0x19   : > { %772 = vmatpush.bf16.msra.mxu2 %v3551_v22  ;;  %v3886_v37 = vld [vmem:[%s4232_s23 + $0x94] sm:$0xf0]  ;;  %v3885_v41 = vld [vmem:[%s4232_s23 + $0x8c] sm:$0xf0]  ;;  %v3568_v43 = vld [vmem:[%s4232_s23 + $0x98] sm:$0xf0] }
  0x1a   : > { %786 = vmatpush.bf16.msra.mxu3 %v3555_v26  ;;  %v3567_v40 = vor.u32 %v3886_v37, %v3566_v36  ;;  %v3571_v44 = vor.u32 %v3870_v42, %v3568_v43  ;;  %v3869_v45 = vld [vmem:[%s4232_s23 + $0x14] sm:$0xf]  ;;  %v3710_v47 = vld [vmem:[%s4232_s23 + $0x128] sm:$0xf]  ;;  %v3702_v49 = vld [vmem:[%s4232_s23 + $0x120] sm:$0xf]  ;;  %v3559_v51 = vor.u32 %v3885_v41, %v3558_v38 }
  0x1b   : > { %3796 = vmatmul.msk.bf16.vlgmr.msra.gmra.mxu0 %vm733_vm0, %v4252_v21  ;;  %v3560_v46 = vld [vmem:[%s4232_s23 + $0x90] sm:$0xf0]  ;;  %3797 = vmatmul.msk.bf16.vlgmr.msra.gmra.mxu1 %vm733_vm0, %v4252_v21  ;;  %v3920_v48 = vld [vmem:[%s4232_s23 + $0x1a4] sm:$0xf0]  ;;  %v3919_v50 = vld [vmem:[%s4232_s23 + $0x19c] sm:$0xf0] }
  0x1c   : > { %3798 = vmatmul.msk.bf16.vlgmr.msra.gmra.mxu2 %vm733_vm0, %v4252_v21  ;;  %799 = vmatpush.bf16.msrb.mxu0 %v3687_v34  ;;  %v3711_v52 = vor.u32 %v3920_v48, %v3710_v47  ;;  %v3904_v53 = vld [vmem:[%s4232_s23 + $0x12c] sm:$0xf]  ;;  %v3903_v55 = vld [vmem:[%s4232_s23 + $0x124] sm:$0xf]  ;;  %v3563_v56 = vor.u32 %v3869_v45, %v3560_v46  ;;  %v3703_v57 = vor.u32 %v3919_v50, %v3702_v49  ;;  %v3582_v60 = vld [vmem:[%s4232_s23 + $0x28] sm:$0xf] }
  0x1d   : > { %827 = vmatpush.bf16.msrb.mxu2 %v3695_v27  ;;  %3799 = vmatmul.msk.bf16.vlgmr.msra.gmra.mxu3 %vm733_vm0, %v4252_v21  ;;  %v3712_v54 = vld [vmem:[%s4232_s23 + $0x1a8] sm:$0xf0]  ;;  %v3704_v59 = vld [vmem:[%s4232_s23 + $0x1a0] sm:$0xf0]  ;;  %v3888_v61 = vld [vmem:[%s4232_s23 + $0xa4] sm:$0xf0] }
  0x1e   : > { %841 = vmatpush.bf16.msrb.mxu3 %v3699_v35  ;;  %813 = vmatpush.bf16.msrb.mxu1 %v3691_v39  ;;  %v3715_v58 = vor.u32 %v3904_v53, %v3712_v54  ;;  %v3707_v62 = vor.u32 %v3903_v55, %v3704_v59  ;;  %v3583_v63 = vor.u32 %v3888_v61, %v3582_v60  ;;  %v3574_v0 = vld [vmem:[%s4232_s23 + $0x20] sm:$0xf]  ;;  %v3872_v2 = vld [vmem:[%s4232_s23 + $0x2c] sm:$0xf]  ;;  %v3871_v4 = vld [vmem:[%s4232_s23 + $0x24] sm:$0xf] }
  0x1f   : > { %v3887_v1 = vld [vmem:[%s4232_s23 + $0x9c] sm:$0xf0]  ;;  %v3584_v3 = vld [vmem:[%s4232_s23 + $0xa8] sm:$0xf0]  ;;  %v3576_v5 = vld [vmem:[%s4232_s23 + $0xa0] sm:$0xf0] }
  0x20   : > { %800 = vmatpush.bf16.msrb.mxu0 %v3559_v51  ;;  %v3587_v6 = vor.u32 %v3872_v2, %v3584_v3  ;;  %v3575_v7 = vor.u32 %v3887_v1, %v3574_v0  ;;  %v3579_v8 = vor.u32 %v3871_v4, %v3576_v5  ;;  %v3726_v9 = vld [vmem:[%s4232_s23 + $0x138] sm:$0xf]  ;;  %v3718_v11 = vld [vmem:[%s4232_s23 + $0x130] sm:$0xf]  ;;  %v3906_v13 = vld [vmem:[%s4232_s23 + $0x13c] sm:$0xf] }
  0x21   : > { %828 = vmatpush.bf16.msrb.mxu2 %v3567_v40  ;;  %v3922_v10 = vld [vmem:[%s4232_s23 + $0x1b4] sm:$0xf0]  ;;  %v3921_v12 = vld [vmem:[%s4232_s23 + $0x1ac] sm:$0xf0]  ;;  %v3728_v14 = vld [vmem:[%s4232_s23 + $0x1b8] sm:$0xf0] }
  0x22   : > { %842 = vmatpush.bf16.msrb.mxu3 %v3571_v44  ;;  %814 = vmatpush.bf16.msrb.mxu1 %v3563_v56  ;;  %v3905_v15 = vld [vmem:[%s4232_s23 + $0x134] sm:$0xf]  ;;  %v3727_v17 = vor.u32 %v3922_v10, %v3726_v9  ;;  %v3719_v18 = vor.u32 %v3921_v12, %v3718_v11  ;;  %v3731_v19 = vor.u32 %v3906_v13, %v3728_v14  ;;  %v3598_v20 = vld [vmem:[%s4232_s23 + $0x38] sm:$0xf]  ;;  %v3590_v23 = vld [vmem:[%s4232_s23 + $0x30] sm:$0xf] }
  0x23   : > { %v3720_v16 = vld [vmem:[%s4232_s23 + $0x1b0] sm:$0xf0]  ;;  %v3890_v22 = vld [vmem:[%s4232_s23 + $0xb4] sm:$0xf0]  ;;  %v3889_v25 = vld [vmem:[%s4232_s23 + $0xac] sm:$0xf0] }
  0x24   : > { %855 = vmatpush.bf16.msra.mxu0 %v3703_v57  ;;  %v3723_v24 = vor.u32 %v3905_v15, %v3720_v16  ;;  %v3874_v26 = vld [vmem:[%s4232_s23 + $0x3c] sm:$0xf]  ;;  %v3873_v28 = vld [vmem:[%s4232_s23 + $0x34] sm:$0xf]  ;;  %v3599_v30 = vor.u32 %v3890_v22, %v3598_v20  ;;  %v3591_v31 = vor.u32 %v3889_v25, %v3590_v23  ;;  %v3742_v34 = vld [vmem:[%s4232_s23 + $0x148] sm:$0xf] }
  0x25   : > { %883 = vmatpush.bf16.msra.mxu2 %v3711_v52  ;;  %v3600_v27 = vld [vmem:[%s4232_s23 + $0xb8] sm:$0xf0]  ;;  %v3592_v29 = vld [vmem:[%s4232_s23 + $0xb0] sm:$0xf0]  ;;  %v3924_v35 = vld [vmem:[%s4232_s23 + $0x1c4] sm:$0xf0] }
  0x26   : > { %897 = vmatpush.bf16.msra.mxu3 %v3715_v58  ;;  %869 = vmatpush.bf16.msra.mxu1 %v3707_v62  ;;  %v3603_v32 = vor.u32 %v3874_v26, %v3600_v27  ;;  %v3595_v33 = vor.u32 %v3873_v28, %v3592_v29  ;;  %v3734_v36 = vld [vmem:[%s4232_s23 + $0x140] sm:$0xf]  ;;  %v3908_v38 = vld [vmem:[%s4232_s23 + $0x14c] sm:$0xf]  ;;  %v3907_v40 = vld [vmem:[%s4232_s23 + $0x144] sm:$0xf]  ;;  %v3743_v42 = vor.u32 %v3924_v35, %v3742_v34 }
  0x27   : > { %v3923_v37 = vld [vmem:[%s4232_s23 + $0x1bc] sm:$0xf0]  ;;  %v3744_v39 = vld [vmem:[%s4232_s23 + $0x1c8] sm:$0xf0]  ;;  %v3736_v41 = vld [vmem:[%s4232_s23 + $0x1c0] sm:$0xf0] }
  0x28   : > { %856 = vmatpush.bf16.msra.mxu0 %v3575_v7  ;;  %v3735_v43 = vor.u32 %v3923_v37, %v3734_v36  ;;  %v3747_v44 = vor.u32 %v3908_v38, %v3744_v39  ;;  %v3614_v45 = vld [vmem:[%s4232_s23 + $0x48] sm:$0xf]  ;;  %v3606_v47 = vld [vmem:[%s4232_s23 + $0x40] sm:$0xf]  ;;  %v3739_v48 = vor.u32 %v3907_v40, %v3736_v41  ;;  %v3876_v50 = vld [vmem:[%s4232_s23 + $0x4c] sm:$0xf] }
  0x29   : > { %884 = vmatpush.bf16.msra.mxu2 %v3583_v63  ;;  %v3892_v46 = vld [vmem:[%s4232_s23 + $0xc4] sm:$0xf0]  ;;  %v3891_v49 = vld [vmem:[%s4232_s23 + $0xbc] sm:$0xf0]  ;;  %v3616_v51 = vld [vmem:[%s4232_s23 + $0xc8] sm:$0xf0] }
  0x2a   : > { %898 = vmatpush.bf16.msra.mxu3 %v3587_v6  ;;  %870 = vmatpush.bf16.msra.mxu1 %v3579_v8  ;;  %v3875_v52 = vld [vmem:[%s4232_s23 + $0x44] sm:$0xf]  ;;  %v3615_v54 = vor.u32 %v3892_v46, %v3614_v45  ;;  %v3607_v55 = vor.u32 %v3891_v49, %v3606_v47  ;;  %v3619_v56 = vor.u32 %v3876_v50, %v3616_v51  ;;  %v3758_v58 = vld [vmem:[%s4232_s23 + $0x158] sm:$0xf]  ;;  %v3750_v60 = vld [vmem:[%s4232_s23 + $0x150] sm:$0xf] }
  0x2b   : > { %3800 = vmatmul.msk.bf16.vlgmr.msrb.gmra.mxu0 %vm733_vm0, %v4252_v21  ;;  %3801 = vmatmul.msk.bf16.vlgmr.msrb.gmra.mxu1 %vm733_vm0, %v4252_v21  ;;  %v3608_v53 = vld [vmem:[%s4232_s23 + $0xc0] sm:$0xf0]  ;;  %v3926_v59 = vld [vmem:[%s4232_s23 + $0x1d4] sm:$0xf0]  ;;  %v3925_v61 = vld [vmem:[%s4232_s23 + $0x1cc] sm:$0xf0] }
  0x2c   : > { %3802 = vmatmul.msk.bf16.vlgmr.msrb.gmra.mxu2 %vm733_vm0, %v4252_v21  ;;  %911 = vmatpush.bf16.msrb.mxu0 %v3719_v18  ;;  %v3611_v57 = vor.u32 %v3875_v52, %v3608_v53  ;;  %v3910_v62 = vld [vmem:[%s4232_s23 + $0x15c] sm:$0xf]  ;;  %v3909_v0 = vld [vmem:[%s4232_s23 + $0x154] sm:$0xf]  ;;  %v3759_v2 = vor.u32 %v3926_v59, %v3758_v58  ;;  %v3751_v3 = vor.u32 %v3925_v61, %v3750_v60  ;;  %v3630_v5 = vld [vmem:[%s4232_s23 + $0x58] sm:$0xf] }
  0x2d   : > { %3803 = vmatmul.msk.bf16.vlgmr.msrb.gmra.mxu3 %vm733_vm0, %v4252_v21  ;;  %939 = vmatpush.bf16.msrb.mxu2 %v3727_v17  ;;  %v3760_v63 = vld [vmem:[%s4232_s23 + $0x1d8] sm:$0xf0]  ;;  %v3752_v1 = vld [vmem:[%s4232_s23 + $0x1d0] sm:$0xf0]  ;;  %v3894_v6 = vld [vmem:[%s4232_s23 + $0xd4] sm:$0xf0] }
  0x2e   : > { %953 = vmatpush.bf16.msrb.mxu3 %v3731_v19  ;;  %925 = vmatpush.bf16.msrb.mxu1 %v3723_v24  ;;  %v3763_v4 = vor.u32 %v3910_v62, %v3760_v63  ;;  %v3622_v7 = vld [vmem:[%s4232_s23 + $0x50] sm:$0xf]  ;;  %v3755_v8 = vor.u32 %v3909_v0, %v3752_v1  ;;  %v3878_v10 = vld [vmem:[%s4232_s23 + $0x5c] sm:$0xf]  ;;  %v3877_v12 = vld [vmem:[%s4232_s23 + $0x54] sm:$0xf]  ;;  %v3631_v14 = vor.u32 %v3894_v6, %v3630_v5 }
  0x2f   : > { %v3893_v9 = vld [vmem:[%s4232_s23 + $0xcc] sm:$0xf0]  ;;  %v3632_v11 = vld [vmem:[%s4232_s23 + $0xd8] sm:$0xf0]  ;;  %v3624_v13 = vld [vmem:[%s4232_s23 + $0xd0] sm:$0xf0] }
  0x30   : > { %912 = vmatpush.bf16.msrb.mxu0 %v3591_v31  ;;  %v3623_v15 = vor.u32 %v3893_v9, %v3622_v7  ;;  %v3635_v16 = vor.u32 %v3878_v10, %v3632_v11  ;;  %v3627_v17 = vor.u32 %v3877_v12, %v3624_v13  ;;  %v3774_v18 = vld [vmem:[%s4232_s23 + $0x168] sm:$0xf]  ;;  %v3766_v20 = vld [vmem:[%s4232_s23 + $0x160] sm:$0xf]  ;;  %v3912_v23 = vld [vmem:[%s4232_s23 + $0x16c] sm:$0xf] }
  0x31   : > { %940 = vmatpush.bf16.msrb.mxu2 %v3599_v30  ;;  %v3928_v19 = vld [vmem:[%s4232_s23 + $0x1e4] sm:$0xf0]  ;;  %v3927_v22 = vld [vmem:[%s4232_s23 + $0x1dc] sm:$0xf0]  ;;  %v3776_v24 = vld [vmem:[%s4232_s23 + $0x1e8] sm:$0xf0] }
  0x32   : > { %954 = vmatpush.bf16.msrb.mxu3 %v3603_v32  ;;  %926 = vmatpush.bf16.msrb.mxu1 %v3595_v33  ;;  %v3911_v25 = vld [vmem:[%s4232_s23 + $0x164] sm:$0xf]  ;;  %v3775_v27 = vor.u32 %v3928_v19, %v3774_v18  ;;  %v3767_v28 = vor.u32 %v3927_v22, %v3766_v20  ;;  %v3779_v29 = vor.u32 %v3912_v23, %v3776_v24  ;;  %v3646_v30 = vld [vmem:[%s4232_s23 + $0x68] sm:$0xf]  ;;  %v3638_v32 = vld [vmem:[%s4232_s23 + $0x60] sm:$0xf] }
  0x33   : > { %v3768_v26 = vld [vmem:[%s4232_s23 + $0x1e0] sm:$0xf0]  ;;  %v3896_v31 = vld [vmem:[%s4232_s23 + $0xe4] sm:$0xf0]  ;;  %v3895_v34 = vld [vmem:[%s4232_s23 + $0xdc] sm:$0xf0] }
  0x34   : > { %v3771_v33 = vor.u32 %v3911_v25, %v3768_v26  ;;  %v3880_v35 = vld [vmem:[%s4232_s23 + $0x6c] sm:$0xf]  ;;  %v3879_v37 = vld [vmem:[%s4232_s23 + $0x64] sm:$0xf]  ;;  %v3647_v39 = vor.u32 %v3896_v31, %v3646_v30  ;;  %v3639_v40 = vor.u32 %v3895_v34, %v3638_v32  ;;  %v3782_v45 = vld [vmem:[%s4232_s23 + $0x170] sm:$0xf] }
  0x35   : > { %v3648_v36 = vld [vmem:[%s4232_s23 + $0xe8] sm:$0xf0]  ;;  %v3640_v38 = vld [vmem:[%s4232_s23 + $0xe0] sm:$0xf0]  ;;  %v3929_v46 = vld [vmem:[%s4232_s23 + $0x1ec] sm:$0xf0] }
  0x36   : > { %v3651_v41 = vor.u32 %v3880_v35, %v3648_v36  ;;  %v3914_v47 = vld [vmem:[%s4232_s23 + $0x17c] sm:$0xf]  ;;  %v3913_v49 = vld [vmem:[%s4232_s23 + $0x174] sm:$0xf]  ;;  %v3783_v52 = vor.u32 %v3929_v46, %v3782_v45  ;;  %v3897_v58 = vld [vmem:[%s4232_s23 + $0xec] sm:$0xf0] }
  0x37   : > { %v3784_v50 = vld [vmem:[%s4232_s23 + $0x1f0] sm:$0xf0]  ;;  %v3882_v59 = vld [vmem:[%s4232_s23 + $0x7c] sm:$0xf]  ;;  %v375_v6 = vld [vmem:[%s4421_s29 + $0x208] sm:$0xff] }
  0x38   : > { %v3664_v60 = vld [vmem:[%s4232_s23 + $0xf8] sm:$0xf0]  ;;  %v3881_v61 = vld [vmem:[%s4232_s23 + $0x74] sm:$0xf]  ;;  %v1220_v10 = vpack.c.bf16 %v375_v6, %v375_v6  ;;  %v311_v22 = vld [vmem:[%s4421_s29 + $0x8] sm:$0xff] }
  0x39   : > { %v3656_v62 = vld [vmem:[%s4232_s23 + $0xf0] sm:$0xf0]  ;;  %v3667_v1 = vor.u32 %v3882_v59, %v3664_v60  ;;  %v377_v5 = vld [vmem:[%s4421_s29 + $0x218] sm:$0xff]  ;;  %v343_v23 = vld [vmem:[%s4421_s29 + $0x108] sm:$0xff] }
  0x3a   : > { %v1222_v9 = vpack.c.bf16 %v377_v5, %v377_v5  ;;  %v312_v12 = vld [vmem:[%s4421_s29 + $0x10] sm:$0xff]  ;;  %v313_v18 = vld [vmem:[%s4421_s29 + $0x18] sm:$0xff]  ;;  %v1265_v20 = vsel %vm1260_vm1, %v1220_v10, 0  ;;  %v379_v31 = vld [vmem:[%s4421_s29 + $0x228] sm:$0xff] }
  0x3b   : > { %3804 = vmatmul.msk.bf16.vlgmr.msra.gmra.mxu0 %vm733_vm0, %v4252_v21  ;;  %3805 = vmatmul.msk.bf16.vlgmr.msra.gmra.mxu1 %vm733_vm0, %v4252_v21  ;;  %v344_v13 = vld [vmem:[%s4421_s29 + $0x110] sm:$0xff]  ;;  %v345_v19 = vld [vmem:[%s4421_s29 + $0x118] sm:$0xff]  ;;  %v1224_v35 = vpack.c.bf16 %v379_v31, %v379_v31  ;;  %v315_v46 = vld [vmem:[%s4421_s29 + $0x28] sm:$0xff] }
  0x3c   : > { %3806 = vmatmul.msk.bf16.vlgmr.msra.gmra.mxu2 %vm733_vm0, %v4252_v21  ;;  %967 = vmatpush.bf16.msra.mxu0 %v3735_v43  ;;  %v3790_v43 = vld [vmem:[%s4232_s23 + $0x178] sm:$0xf]  ;;  %v1189_v24 = vpack.c.bf16 %v344_v13, %v312_v12  ;;  %v1190_v26 = vpack.c.bf16 %v345_v19, %v313_v18  ;;  %v388_v18 = vld [vmem:[%s4421_s29 + $0x270] sm:$0xff]  ;;  %v386_v19 = vld [vmem:[%s4421_s29 + $0x260] sm:$0xff] }
  0x3d   : > { %3807 = vmatmul.msk.bf16.vlgmr.msra.gmra.mxu3 %vm733_vm0, %v4252_v21  ;;  %995 = vmatpush.bf16.msra.mxu2 %v3743_v42  ;;  %v3643_v42 = vor.u32 %v3879_v37, %v3640_v38  ;;  %v381_v30 = vld [vmem:[%s4421_s29 + $0x238] sm:$0xff]  ;;  %v316_v37 = vld [vmem:[%s4421_s29 + $0x30] sm:$0xff]  ;;  %v1277_v45 = vsel %vm1260_vm1, %v1224_v35, 0 }
  0x3e   : > { %1009 = vmatpush.bf16.msra.mxu3 %v3747_v44  ;;  %981 = vmatpush.bf16.msra.mxu1 %v3739_v48  ;;  %v3930_v44 = vld [vmem:[%s4232_s23 + $0x1f4] sm:$0xf0]  ;;  %v3792_v48 = vld [vmem:[%s4232_s23 + $0x1f8] sm:$0xf0]  ;;  %v1226_v34 = vpack.c.bf16 %v381_v30, %v381_v30  ;;  %v348_v38 = vld [vmem:[%s4421_s29 + $0x130] sm:$0xff] }
  0x3f   : > { %v3791_v51 = vor.u32 %v3930_v44, %v3790_v43  ;;  %v3795_v53 = vor.u32 %v3914_v47, %v3792_v48  ;;  %v317_v43 = vld [vmem:[%s4421_s29 + $0x38] sm:$0xff]  ;;  %v347_v47 = vld [vmem:[%s4421_s29 + $0x128] sm:$0xff]  ;;  %v1193_v48 = vpack.c.bf16 %v348_v38, %v316_v37  ;;  %v354_v37 = vld [vmem:[%s4421_s29 + $0x160] sm:$0xff] }
  0x40   : > { %968 = vmatpush.bf16.msra.mxu0 %v3607_v55  ;;  %v3898_v55 = vld [vmem:[%s4232_s23 + $0xf4] sm:$0xf0] }
  0x41   : > { %996 = vmatpush.bf16.msra.mxu2 %v3615_v54  ;;  %v3662_v54 = vld [vmem:[%s4232_s23 + $0x78] sm:$0xf] }
  0x42   : > { %1010 = vmatpush.bf16.msra.mxu3 %v3619_v56  ;;  %982 = vmatpush.bf16.msra.mxu1 %v3611_v57  ;;  %v3654_v56 = vld [vmem:[%s4232_s23 + $0x70] sm:$0xf]  ;;  %v3787_v57 = vor.u32 %v3913_v49, %v3784_v50  ;;  %v3663_v63 = vor.u32 %v3898_v55, %v3662_v54  ;;  %v349_v44 = vld [vmem:[%s4421_s29 + $0x138] sm:$0xff] }
  0x43   : > { %v3655_v0 = vor.u32 %v3897_v58, %v3654_v56  ;;  %v1194_v50 = vpack.c.bf16 %v349_v44, %v317_v43  ;;  %v385_v54 = vld [vmem:[%s4421_s29 + $0x258] sm:$0xff]  ;;  %v4478_v56 = vld [vmem:[%s7526_s3] sm:$0xff] }
  0x44   : > { %v1230_v58 = vpack.c.bf16 %v385_v54, %v385_v54  ;;  %v321_v5 = vld [vmem:[%s4421_s29 + $0x58] sm:$0xff]  ;;  %v391_v54 = vld [vmem:[%s4421_s29 + $0x288] sm:$0xff] }
  0x45   : > { %v353_v6 = vld [vmem:[%s4421_s29 + $0x158] sm:$0xff] }
  0x46   : > { %v1198_v12 = vpack.c.bf16 %v353_v6, %v321_v5  ;;  %v325_v38 = vld [vmem:[%s4421_s29 + $0x78] sm:$0xff]  ;;  %v326_v5 = vld [vmem:[%s4421_s29 + $0x80] sm:$0xff] }
  0x4b   : > { %3808 = vmatmul.msk.bf16.vlgmr.msrb.gmra.mxu0 %vm733_vm0, %v4252_v21  ;;  %3809 = vmatmul.msk.bf16.vlgmr.msrb.gmra.mxu1 %vm733_vm0, %v4252_v21 }
  0x4c   : > { %3810 = vmatmul.msk.bf16.vlgmr.msrb.gmra.mxu2 %vm733_vm0, %v4252_v21  ;;  %1023 = vmatpush.bf16.msrb.mxu0 %v3751_v3  ;;  %v376_v3 = vld [vmem:[%s4421_s29 + $0x210] sm:$0xff] }
  0x4d   : > { %3811 = vmatmul.msk.bf16.vlgmr.msrb.gmra.mxu3 %vm733_vm0, %v4252_v21  ;;  %1051 = vmatpush.bf16.msrb.mxu2 %v3759_v2  ;;  %v3659_v2 = vor.u32 %v3881_v61, %v3656_v62  ;;  %v1221_v7 = vpack.c.bf16 %v376_v3, %v376_v3  ;;  %v1295_v3 = vsel %vm1260_vm1, %v1230_v58, 0 }
  0x4e   : > { %1065 = vmatpush.bf16.msrb.mxu3 %v3763_v4  ;;  %1037 = vmatpush.bf16.msrb.mxu1 %v3755_v8  ;;  %v374_v4 = vld [vmem:[%s4421_s29 + $0x200] sm:$0xff] }
  0x4f   : > { %v1219_v8 = vpack.c.bf16 %v374_v4, %v374_v4  ;;  %v1268_v11 = vsel %vm1260_vm1, %v1221_v7, 0  ;;  %v350_v4 = vld [vmem:[%s4421_s29 + $0x140] sm:$0xff] }
  0x50   : > { %1024 = vmatpush.bf16.msrb.mxu0 %v3623_v15 }
  0x51   : > { %1052 = vmatpush.bf16.msrb.mxu2 %v3631_v14  ;;  %v310_v14 = vld [vmem:[%s4421_s29] sm:$0xff]  ;;  %v1262_v15 = vsel %vm1260_vm1, %v1219_v8, 0  ;;  %v319_v8 = vld [vmem:[%s4421_s29 + $0x48] sm:$0xff] }
  0x52   : > { %1066 = vmatpush.bf16.msrb.mxu3 %v3635_v16  ;;  %1038 = vmatpush.bf16.msrb.mxu1 %v3627_v17  ;;  %v1271_v16 = vsel %vm1260_vm1, %v1222_v9, 0  ;;  %v342_v17 = vld [vmem:[%s4421_s29 + $0x100] sm:$0xff]  ;;  %v351_v9 = vld [vmem:[%s4421_s29 + $0x148] sm:$0xff] }
  0x53   : > { %v1187_v25 = vpack.c.bf16 %v342_v17, %v310_v14  ;;  %v1196_v14 = vpack.c.bf16 %v351_v9, %v319_v8  ;;  %v358_v8 = vld [vmem:[%s4421_s29 + $0x180] sm:$0xff]  ;;  %v329_v9 = vld [vmem:[%s4421_s29 + $0x98] sm:$0xff] }
  0x5b   : > { %3812 = vmatmul.msk.bf16.vlgmr.msra.gmra.mxu0 %vm733_vm0, %v4252_v21  ;;  %3813 = vmatmul.msk.bf16.vlgmr.msra.gmra.mxu1 %vm733_vm0, %v4252_v21 }
  0x5c   : > { %3814 = vmatmul.msk.bf16.vlgmr.msra.gmra.mxu2 %vm733_vm0, %v4252_v21  ;;  %1079 = vmatpush.bf16.msra.mxu0 %v3767_v28  ;;  %v380_v28 = vld [vmem:[%s4421_s29 + $0x230] sm:$0xff] }
  0x5d   : > { %3815 = vmatmul.msk.bf16.vlgmr.msra.gmra.mxu3 %vm733_vm0, %v4252_v21  ;;  %1107 = vmatpush.bf16.msra.mxu2 %v3775_v27  ;;  %v1188_v27 = vpack.c.bf16 %v343_v23, %v311_v22  ;;  %v1225_v32 = vpack.c.bf16 %v380_v28, %v380_v28  ;;  %v387_v22 = vld [vmem:[%s4421_s29 + $0x268] sm:$0xff]  ;;  %v1233_v23 = vpack.c.bf16 %v388_v18, %v388_v18 }
  0x5e   : > { %1121 = vmatpush.bf16.msra.mxu3 %v3779_v29  ;;  %1093 = vmatpush.bf16.msra.mxu1 %v3771_v33  ;;  %v378_v29 = vld [vmem:[%s4421_s29 + $0x220] sm:$0xff]  ;;  %v359_v18 = vld [vmem:[%s4421_s29 + $0x188] sm:$0xff] }
  0x5f   : > { %v1223_v33 = vpack.c.bf16 %v378_v29, %v378_v29  ;;  %v1280_v36 = vsel %vm1260_vm1, %v1225_v32, 0  ;;  %v1232_v29 = vpack.c.bf16 %v387_v22, %v387_v22  ;;  %v1304_v31 = vsel %vm1260_vm1, %v1233_v23, 0  ;;  %v324_v32 = vld [vmem:[%s4421_s29 + $0x70] sm:$0xff] }
  0x60   : > { %1080 = vmatpush.bf16.msra.mxu0 %v3639_v40 }
  0x61   : > { %1108 = vmatpush.bf16.msra.mxu2 %v3647_v39  ;;  %v314_v39 = vld [vmem:[%s4421_s29 + $0x20] sm:$0xff]  ;;  %v1274_v40 = vsel %vm1260_vm1, %v1223_v33, 0  ;;  %v356_v33 = vld [vmem:[%s4421_s29 + $0x170] sm:$0xff] }
  0x62   : > { %1122 = vmatpush.bf16.msra.mxu3 %v3651_v41  ;;  %1094 = vmatpush.bf16.msra.mxu1 %v3643_v42  ;;  %v1283_v41 = vsel %vm1260_vm1, %v1226_v34, 0  ;;  %v346_v42 = vld [vmem:[%s4421_s29 + $0x120] sm:$0xff]  ;;  %v1201_v43 = vpack.c.bf16 %v356_v33, %v324_v32 }
  0x63   : > { %v1191_v49 = vpack.c.bf16 %v346_v42, %v314_v39  ;;  %v322_v34 = vld [vmem:[%s4421_s29 + $0x60] sm:$0xff]  ;;  %v357_v39 = vld [vmem:[%s4421_s29 + $0x178] sm:$0xff]  ;;  %v355_v42 = vld [vmem:[%s4421_s29 + $0x168] sm:$0xff] }
  0x64   : > { %v1199_v44 = vpack.c.bf16 %v354_v37, %v322_v34  ;;  %v394_v37 = vld [vmem:[%s4421_s29 + $0x2a0] sm:$0xff] }
  0x6b   : > { %3816 = vmatmul.msk.bf16.vlgmr.msrb.gmra.mxu0 %vm733_vm0, %v4252_v21  ;;  %3817 = vmatmul.msk.bf16.vlgmr.msrb.gmra.mxu1 %vm733_vm0, %v4252_v21 }
  0x6c   : > { %3818 = vmatmul.msk.bf16.vlgmr.msrb.gmra.mxu2 %vm733_vm0, %v4252_v21  ;;  %1135 = vmatpush.bf16.msrb.mxu0 %v3783_v52  ;;  %v384_v52 = vld [vmem:[%s4421_s29 + $0x250] sm:$0xff] }
  0x6d   : > { %3819 = vmatmul.msk.bf16.vlgmr.msrb.gmra.mxu3 %vm733_vm0, %v4252_v21  ;;  %1163 = vmatpush.bf16.msrb.mxu2 %v3791_v51  ;;  %v1192_v51 = vpack.c.bf16 %v347_v47, %v315_v46  ;;  %v1229_v55 = vpack.c.bf16 %v384_v52, %v384_v52  ;;  %v390_v52 = vld [vmem:[%s4421_s29 + $0x280] sm:$0xff] }
  0x6e   : > { %1177 = vmatpush.bf16.msrb.mxu3 %v3795_v53  ;;  %1149 = vmatpush.bf16.msrb.mxu1 %v3787_v57  ;;  %v382_v53 = vld [vmem:[%s4421_s29 + $0x240] sm:$0xff] }
  0x6f   : > { %v1227_v57 = vpack.c.bf16 %v382_v53, %v382_v53  ;;  %v1292_v62 = vsel %vm1260_vm1, %v1229_v55, 0  ;;  %v393_v53 = vld [vmem:[%s4421_s29 + $0x298] sm:$0xff] }
  0x70   : > { %1136 = vmatpush.bf16.msrb.mxu0 %v3655_v0  ;;  %v352_v0 = vld [vmem:[%s4421_s29 + $0x150] sm:$0xff]  ;;  %v1238_v58 = vpack.c.bf16 %v393_v53, %v393_v53 }
  0x71   : > { %1164 = vmatpush.bf16.msrb.mxu2 %v3663_v63  ;;  %v320_v63 = vld [vmem:[%s4421_s29 + $0x50] sm:$0xff] }
  0x72   : > { %1178 = vmatpush.bf16.msrb.mxu3 %v3667_v1  ;;  %1150 = vmatpush.bf16.msrb.mxu1 %v3659_v2  ;;  %v318_v1 = vld [vmem:[%s4421_s29 + $0x40] sm:$0xff]  ;;  %v1286_v2 = vsel %vm1260_vm1, %v1227_v57, 0  ;;  %v1197_v10 = vpack.c.bf16 %v352_v0, %v320_v63  ;;  %v1235_v57 = vpack.c.bf16 %v390_v52, %v390_v52  ;;  %v1236_v63 = vpack.c.bf16 %v391_v54, %v391_v54 }
  0x74   : > { %v1310_v6 = vsel %vm1260_vm1, %v1235_v57, 0 }
  0x7b   : > { %3820 = vmatmul.msk.bf16.vlgmr.msra.gmra.mxu0 %vm733_vm0, %v4252_v21  ;;  %3821 = vmatmul.msk.bf16.vlgmr.msra.gmra.mxu1 %vm733_vm0, %v4252_v21 }
  0x7c   : > { %3822 = vmatmul.msk.bf16.vlgmr.msra.gmra.mxu2 %vm733_vm0, %v4252_v21  ;;  %1363 = vmatpush.bf16.msra.mxu0 %v1262_v15 }
  0x7d   : > { %3823 = vmatmul.msk.bf16.vlgmr.msra.gmra.mxu3 %vm733_vm0, %v4252_v21  ;;  %1391 = vmatpush.bf16.msra.mxu2 %v1268_v11  ;;  %v1195_v11 = vpack.c.bf16 %v350_v4, %v318_v1  ;;  %v360_v4 = vld [vmem:[%s4421_s29 + $0x190] sm:$0xff] }
  0x7e   : > { %1405 = vmatpush.bf16.msra.mxu3 %v1271_v16  ;;  %1377 = vmatpush.bf16.msra.mxu1 %v1265_v20  ;;  %v389_v20 = vld [vmem:[%s4421_s29 + $0x278] sm:$0xff] }
  0x80   : > { %1364 = vmatpush.bf16.msra.mxu0 %v1187_v25  ;;  %v1231_v25 = vpack.c.bf16 %v386_v19, %v386_v19 }
  0x81   : > { %1392 = vmatpush.bf16.msra.mxu2 %v1189_v24 }
  0x82   : > { %1406 = vmatpush.bf16.msra.mxu3 %v1190_v26  ;;  %1378 = vmatpush.bf16.msra.mxu1 %v1188_v27  ;;  %v1234_v26 = vpack.c.bf16 %v389_v20, %v389_v20  ;;  %v1298_v35 = vsel %vm1260_vm1, %v1231_v25, 0  ;;  %v1203_v20 = vpack.c.bf16 %v358_v8, %v326_v5  ;;  %v333_v5 = vld [vmem:[%s4421_s29 + $0xb8] sm:$0xff] }
  0x8b   : > { %3824 = vmatmul.msk.bf16.vlgmr.msrb.gmra.mxu0 %vm733_vm0, %v4252_v21  ;;  %3825 = vmatmul.msk.bf16.vlgmr.msrb.gmra.mxu1 %vm733_vm0, %v4252_v21 }
  0x8c   : > { %3826 = vmatmul.msk.bf16.vlgmr.msrb.gmra.mxu2 %vm733_vm0, %v4252_v21  ;;  %1419 = vmatpush.bf16.msrb.mxu0 %v1274_v40  ;;  %v1301_v40 = vsel %vm1260_vm1, %v1232_v29, 0 }
  0x8d   : > { %3827 = vmatmul.msk.bf16.vlgmr.msrb.gmra.mxu3 %vm733_vm0, %v4252_v21  ;;  %1447 = vmatpush.bf16.msrb.mxu2 %v1280_v36  ;;  %v383_v21 = vld [vmem:[%s4421_s29 + $0x248] sm:$0xff]  ;;  %v1307_v36 = vsel %vm1260_vm1, %v1234_v26, 0 }
  0x8e   : > { %1461 = vmatpush.bf16.msrb.mxu3 %v1283_v41  ;;  %1433 = vmatpush.bf16.msrb.mxu1 %v1277_v45  ;;  %v1228_v60 = vpack.c.bf16 %v383_v21, %v383_v21  ;;  %v323_v41 = vld [vmem:[%s4421_s29 + $0x68] sm:$0xff]  ;;  %v1202_v45 = vpack.c.bf16 %v357_v39, %v325_v38  ;;  %v397_v38 = vld [vmem:[%s4421_s29 + $0x2b8] sm:$0xff] }
  0x8f   : > { %v1200_v47 = vpack.c.bf16 %v355_v42, %v323_v41  ;;  %v395_v39 = vld [vmem:[%s4421_s29 + $0x2a8] sm:$0xff] }
  0x90   : > { %1420 = vmatpush.bf16.msrb.mxu0 %v1191_v49  ;;  %v1289_v7 = vsel %vm1260_vm1, %v1228_v60, 0  ;;  %v1240_v53 = vpack.c.bf16 %v395_v39, %v395_v39  ;;  %v398_v39 = vld [vmem:[%s4421_s29 + $0x2c0] sm:$0xff] }
  0x91   : > { %1448 = vmatpush.bf16.msrb.mxu2 %v1193_v48 }
  0x92   : > { %1462 = vmatpush.bf16.msrb.mxu3 %v1194_v50  ;;  %1434 = vmatpush.bf16.msrb.mxu1 %v1192_v51  ;;  %v392_v51 = vld [vmem:[%s4421_s29 + $0x290] sm:$0xff]  ;;  %v1325_v8 = vsel %vm1260_vm1, %v1240_v53, 0 }
  0x93   : > { %v1237_v21 = vpack.c.bf16 %v392_v51, %v392_v51 }
  0x98   : > { %v4480_v59 = vpop.f32.mrf.mxu0  ;;  %v4482_v61 = vpop.f32.mrf.mxu1 }
  0x99   : > { %v1805_v1 = vadd.f32 %v4482_v61, %v4480_v59 }
  0x9b   : > { %3832 = vmatmul.msk.bf16.vlgmr.msra.gmra.mxu0 %vm1256_vm2, %v4478_v56  ;;  %3833 = vmatmul.msk.bf16.vlgmr.msra.gmra.mxu1 %vm1256_vm2, %v4478_v56 }
  0x9c   : > { %3834 = vmatmul.msk.bf16.vlgmr.msra.gmra.mxu2 %vm1256_vm2, %v4478_v56  ;;  %1475 = vmatpush.bf16.msra.mxu0 %v1286_v2  ;;  %v1316_v2 = vsel %vm1260_vm1, %v1237_v21, 0 }
  0x9d   : > { %3835 = vmatmul.msk.bf16.vlgmr.msra.gmra.mxu3 %vm1256_vm2, %v4478_v56  ;;  %1503 = vmatpush.bf16.msra.mxu2 %v1292_v62 }
  0x9e   : > { %1517 = vmatpush.bf16.msra.mxu3 %v1295_v3  ;;  %1489 = vmatpush.bf16.msra.mxu1 %v1289_v7  ;;  %v328_v3 = vld [vmem:[%s4421_s29 + $0x90] sm:$0xff]  ;;  %v1319_v7 = vsel %vm1260_vm1, %v1238_v58, 0 }
  0x9f   : > { %v4504_v13 = vpop.f32.mrf.mxu2  ;;  %v1205_v19 = vpack.c.bf16 %v360_v4, %v328_v3  ;;  %v332_v58 = vld [vmem:[%s4421_s29 + $0xb0] sm:$0xff]  ;;  %v362_v4 = vld [vmem:[%s4421_s29 + $0x1a0] sm:$0xff] }
  0xa0   : > { %v4506_v15 = vpop.f32.mrf.mxu3  ;;  %v4508_v16 = vpop.f32.mrf.mxu0  ;;  %1476 = vmatpush.bf16.msra.mxu0 %v1195_v11  ;;  %v1806_v11 = vadd.f32 %v1805_v1, %v4504_v13  ;;  %v330_v1 = vld [vmem:[%s4421_s29 + $0xa0] sm:$0xff] }
  0xa1   : > { %v4510_v17 = vpop.f32.mrf.mxu1  ;;  %1504 = vmatpush.bf16.msra.mxu2 %v1197_v10  ;;  %v361_v10 = vld [vmem:[%s4421_s29 + $0x198] sm:$0xff] }
  0xa2   : > { %1518 = vmatpush.bf16.msra.mxu3 %v1198_v12  ;;  %1490 = vmatpush.bf16.msra.mxu1 %v1196_v14  ;;  %v1313_v12 = vsel %vm1260_vm1, %v1236_v63, 0  ;;  %v327_v14 = vld [vmem:[%s4421_s29 + $0x88] sm:$0xff]  ;;  %v1206_v22 = vpack.c.bf16 %v361_v10, %v329_v9  ;;  %v1807_v26 = vadd.f32 %v1806_v11, %v4506_v15  ;;  %v1838_v32 = vadd.f32 %v4510_v17, %v4508_v16  ;;  %v364_v63 = vld [vmem:[%s4421_s29 + $0x1b0] sm:$0xff] }
  0xa3   : > { %v1204_v25 = vpack.c.bf16 %v359_v18, %v327_v14  ;;  %v331_v9 = vld [vmem:[%s4421_s29 + $0xa8] sm:$0xff]  ;;  %v1207_v18 = vpack.c.bf16 %v362_v4, %v330_v1 }
  0xa4   : > { %v363_v10 = vld [vmem:[%s4421_s29 + $0x1a8] sm:$0xff] }
  0xa7   : > { %v4516_v24 = vpop.f32.mrf.mxu2 }
  0xa8   : > { %v4518_v27 = vpop.f32.mrf.mxu3  ;;  %v4520_v28 = vpop.f32.mrf.mxu0 }
  0xa9   : > { %v4522_v30 = vpop.f32.mrf.mxu1  ;;  %v1808_v34 = vadd.f32 %v1807_v26, %v4520_v28 }
  0xab   : > { %3836 = vmatmul.msk.bf16.vlgmr.msrb.gmra.mxu0 %vm1256_vm2, %v4478_v56  ;;  %3837 = vmatmul.msk.bf16.vlgmr.msrb.gmra.mxu1 %vm1256_vm2, %v4478_v56 }
  0xac   : > { %3838 = vmatmul.msk.bf16.vlgmr.msrb.gmra.mxu2 %vm1256_vm2, %v4478_v56  ;;  %1531 = vmatpush.bf16.msrb.mxu0 %v1298_v35  ;;  %v1839_v35 = vadd.f32 %v1838_v32, %v4516_v24 }
  0xad   : > { %3839 = vmatmul.msk.bf16.vlgmr.msrb.gmra.mxu3 %vm1256_vm2, %v4478_v56  ;;  %1559 = vmatpush.bf16.msrb.mxu2 %v1304_v31 }
  0xae   : > { %1573 = vmatpush.bf16.msrb.mxu3 %v1307_v36  ;;  %1545 = vmatpush.bf16.msrb.mxu1 %v1301_v40  ;;  %v396_v36 = vld [vmem:[%s4421_s29 + $0x2b0] sm:$0xff]  ;;  %v1809_v40 = vadd.f32 %v1808_v34, %v4522_v30  ;;  %v1840_v42 = vadd.f32 %v1839_v35, %v4518_v27 }
  0xaf   : > { %v4544_v46 = vpop.f32.mrf.mxu2  ;;  %v1241_v41 = vpack.c.bf16 %v396_v36, %v396_v36  ;;  %v400_v36 = vld [vmem:[%s4421_s29 + $0x2d0] sm:$0xff] }
  0xb0   : > { %v4546_v48 = vpop.f32.mrf.mxu3  ;;  %v4548_v49 = vpop.f32.mrf.mxu0  ;;  %1532 = vmatpush.bf16.msrb.mxu0 %v1199_v44  ;;  %v1239_v44 = vpack.c.bf16 %v394_v37, %v394_v37 }
  0xb1   : > { %v4550_v50 = vpop.f32.mrf.mxu1  ;;  %1560 = vmatpush.bf16.msrb.mxu2 %v1201_v43  ;;  %v1841_v54 = vadd.f32 %v1840_v42, %v4548_v49  ;;  %v1328_v57 = vsel %vm1260_vm1, %v1241_v41, 0  ;;  %v399_v41 = vld [vmem:[%s4421_s29 + $0x2c8] sm:$0xff] }
  0xb2   : > { %1574 = vmatpush.bf16.msrb.mxu3 %v1202_v45  ;;  %1546 = vmatpush.bf16.msrb.mxu1 %v1200_v47  ;;  %v1242_v45 = vpack.c.bf16 %v397_v38, %v397_v38  ;;  %v1810_v47 = vadd.f32 %v1809_v40, %v4544_v46  ;;  %v401_v40 = vld [vmem:[%s4421_s29 + $0x2d8] sm:$0xff] }
  0xb3   : > { %v1842_v11 = vadd.f32 %v1841_v54, %v4550_v50  ;;  %v1246_v53 = vpack.c.bf16 %v401_v40, %v401_v40 }
  0xb4   : > { %v1331_v3 = vsel %vm1260_vm1, %v1242_v45, 0 }
  0xb7   : > { %v4556_v55 = vpop.f32.mrf.mxu2 }
  0xb8   : > { %v4558_v60 = vpop.f32.mrf.mxu3  ;;  %v4560_v62 = vpop.f32.mrf.mxu0 }
  0xb9   : > { %v4562_v0 = vpop.f32.mrf.mxu1 }
  0xbb   : > { %3840 = vmatmul.msk.bf16.vlgmr.msra.gmra.mxu0 %vm1256_vm2, %v4478_v56  ;;  %3841 = vmatmul.msk.bf16.vlgmr.msra.gmra.mxu1 %vm1256_vm2, %v4478_v56 }
  0xbc   : > { %3842 = vmatmul.msk.bf16.vlgmr.msra.gmra.mxu2 %vm1256_vm2, %v4478_v56  ;;  %1587 = vmatpush.bf16.msra.mxu0 %v1310_v6  ;;  %v365_v6 = vld [vmem:[%s4421_s29 + $0x1b8] sm:$0xff] }
  0xbd   : > { %3843 = vmatmul.msk.bf16.vlgmr.msra.gmra.mxu3 %vm1256_vm2, %v4478_v56  ;;  %1615 = vmatpush.bf16.msra.mxu2 %v1316_v2  ;;  %v1322_v2 = vsel %vm1260_vm1, %v1239_v44, 0  ;;  %v1245_v44 = vpack.c.bf16 %v400_v36, %v400_v36 }
  0xbe   : > { %1629 = vmatpush.bf16.msra.mxu3 %v1319_v7  ;;  %1601 = vmatpush.bf16.msra.mxu1 %v1313_v12  ;;  %v1811_v7 = vadd.f32 %v1810_v47, %v4546_v48  ;;  %v1209_v12 = vpack.c.bf16 %v364_v63, %v332_v58  ;;  %v1243_v47 = vpack.c.bf16 %v398_v39, %v398_v39 }
  0xbf   : > { %v4587_v23 = vpop.f32.mrf.mxu2  ;;  %v1244_v63 = vpack.c.bf16 %v399_v41, %v399_v41  ;;  %v1340_v4 = vsel %vm1260_vm1, %v1245_v44, 0 }
  0xc0   : > { %v4590_v29 = vpop.f32.mrf.mxu3  ;;  %v4592_v31 = vpop.f32.mrf.mxu0  ;;  %1588 = vmatpush.bf16.msra.mxu0 %v1203_v20  ;;  %v1812_v14 = vadd.f32 %v1811_v7, %v4560_v62  ;;  %v334_v7 = vld [vmem:[%s4421_s29 + $0xc0] sm:$0xff] }
  0xc1   : > { %v4596_v33 = vpop.f32.mrf.mxu1  ;;  %1616 = vmatpush.bf16.msra.mxu2 %v1205_v19  ;;  %v1210_v19 = vpack.c.bf16 %v365_v6, %v333_v5  ;;  %v336_v5 = vld [vmem:[%s4421_s29 + $0xd0] sm:$0xff] }
  0xc2   : > { %1630 = vmatpush.bf16.msra.mxu3 %v1206_v22  ;;  %1602 = vmatpush.bf16.msra.mxu1 %v1204_v25  ;;  %v1208_v22 = vpack.c.bf16 %v363_v10, %v331_v9  ;;  %v1843_v25 = vadd.f32 %v1842_v11, %v4556_v55  ;;  %v1813_v35 = vadd.f32 %v1812_v14, %v4562_v0  ;;  %v368_v6 = vld [vmem:[%s4421_s29 + $0x1d0] sm:$0xff]  ;;  %v1343_v9 = vsel %vm1260_vm1, %v1246_v53, 0  ;;  %v366_v10 = vld [vmem:[%s4421_s29 + $0x1c0] sm:$0xff]  ;;  %v337_v11 = vld [vmem:[%s4421_s29 + $0xd8] sm:$0xff] }
  0xc3   : > { %v1211_v36 = vpack.c.bf16 %v366_v10, %v334_v7 }
  0xc4   : > { %v1844_v37 = vadd.f32 %v1843_v25, %v4558_v60  ;;  %v1814_v38 = vadd.f32 %v1813_v35, %v4587_v23  ;;  %v1213_v25 = vpack.c.bf16 %v368_v6, %v336_v5 }
  0xc6   : > { %v1845_v42 = vadd.f32 %v1844_v37, %v4592_v31  ;;  %v1815_v54 = vadd.f32 %v1814_v38, %v4590_v29 }
  0xc7   : > { %v4606_v43 = vpop.f32.mrf.mxu2 }
  0xc8   : > { %v4609_v51 = vpop.f32.mrf.mxu3  ;;  %v4611_v52 = vpop.f32.mrf.mxu0 }
  0xc9   : > { %7717 = vst [vmem:[#allocation2_spill] sm:$0xff] %v4609_v51  ;;  %v4614_v21 = vpop.f32.mrf.mxu1 }
  0xcb   : > { %3844 = vmatmul.msk.bf16.vlgmr.msrb.gmra.mxu0 %vm1256_vm2, %v4478_v56  ;;  %3845 = vmatmul.msk.bf16.vlgmr.msrb.gmra.mxu1 %vm1256_vm2, %v4478_v56 }
  0xcc   : > { %3846 = vmatmul.msk.bf16.vlgmr.msrb.gmra.mxu2 %vm1256_vm2, %v4478_v56  ;;  %1643 = vmatpush.bf16.msrb.mxu0 %v1322_v2  ;;  %v1846_v2 = vadd.f32 %v1845_v42, %v4596_v33 }
  0xcd   : > { %3847 = vmatmul.msk.bf16.vlgmr.msrb.gmra.mxu3 %vm1256_vm2, %v4478_v56  ;;  %1671 = vmatpush.bf16.msrb.mxu2 %v1328_v57 }
  0xce   : > { %1685 = vmatpush.bf16.msrb.mxu3 %v1331_v3  ;;  %1657 = vmatpush.bf16.msrb.mxu1 %v1325_v8  ;;  %v1816_v3 = vadd.f32 %v1815_v54, %v4611_v52  ;;  %v1334_v8 = vsel %vm1260_vm1, %v1243_v47, 0  ;;  %v1847_v14 = vadd.f32 %v1846_v2, %v4606_v43  ;;  %v404_v54 = vld [vmem:[%s4421_s29 + $0x2f0] sm:$0xff]  ;;  %v402_v2 = vld [vmem:[%s4421_s29 + $0x2e0] sm:$0xff] }
  0xcf   : > { %v4639_v20 = vpop.f32.mrf.mxu2  ;;  %v1249_v7 = vpack.c.bf16 %v404_v54, %v404_v54  ;;  %v373_v54 = vld [vmem:[%s4421_s29 + $0x1f8] sm:$0xff] }
  0xd0   : > { %v4642_v26 = vpop.f32.mrf.mxu3  ;;  %v4644_v32 = vpop.f32.mrf.mxu0  ;;  %1644 = vmatpush.bf16.msrb.mxu0 %v1207_v18  ;;  %v1337_v18 = vsel %vm1260_vm1, %v1244_v63, 0  ;;  %v1817_v35 = vadd.f32 %v1816_v3, %v4614_v21  ;;  %v1848_v40 = vadd.f32 %v1847_v14, %v4609_v51  ;;  %v405_v3 = vld [vmem:[%s4421_s29 + $0x2f8] sm:$0xff] }
  0xd1   : > { %7718 = vst [vmem:[#allocation3_spill] sm:$0xff] %v4644_v32  ;;  %v4646_v34 = vpop.f32.mrf.mxu1  ;;  %1672 = vmatpush.bf16.msrb.mxu2 %v1209_v12  ;;  %v369_v12 = vld [vmem:[%s4421_s29 + $0x1d8] sm:$0xff]  ;;  %v1250_v10 = vpack.c.bf16 %v405_v3, %v405_v3 }
  0xd2   : > { %7719 = vst [vmem:[#allocation4_spill] sm:$0xff] %v4646_v34  ;;  %1686 = vmatpush.bf16.msrb.mxu3 %v1210_v19  ;;  %1658 = vmatpush.bf16.msrb.mxu1 %v1208_v22  ;;  %v335_v19 = vld [vmem:[%s4421_s29 + $0xc8] sm:$0xff]  ;;  %v1214_v37 = vpack.c.bf16 %v369_v12, %v337_v11  ;;  %v1818_v41 = vadd.f32 %v1817_v35, %v4639_v20  ;;  %v340_v35 = vld [vmem:[%s4421_s29 + $0xf0] sm:$0xff] }
  0xd3   : > { %v367_v22 = vld [vmem:[%s4421_s29 + $0x1c8] sm:$0xff]  ;;  %v1849_v53 = vadd.f32 %v1848_v40, %v4644_v32  ;;  %v1355_v40 = vsel %vm1260_vm1, %v1250_v10, 0 }
  0xd4   : > { %v1212_v39 = vpack.c.bf16 %v367_v22, %v335_v19  ;;  %v1819_v63 = vadd.f32 %v1818_v41, %v4642_v26  ;;  %v370_v41 = vld [vmem:[%s4421_s29 + $0x1e0] sm:$0xff] }
  0xd5   : > { %v1850_v5 = vadd.f32 %v1849_v53, %v4646_v34  ;;  %v341_v53 = vld [vmem:[%s4421_s29 + $0xf8] sm:$0xff] }
  0xd6   : > { %v1218_v10 = vpack.c.bf16 %v373_v54, %v341_v53 }
  0xd7   : > { %v4656_v45 = vpop.f32.mrf.mxu2 }
  0xd8   : > { %7720 = vst [vmem:[#allocation5_spill] sm:$0xff] %v4656_v45  ;;  %v4659_v57 = vpop.f32.mrf.mxu3  ;;  %v4661_v58 = vpop.f32.mrf.mxu0  ;;  %v1851_v11 = vadd.f32 %v1850_v5, %v4656_v45  ;;  %v371_v5 = vld [vmem:[%s4421_s29 + $0x1e8] sm:$0xff] }
  0xd9   : > { %7721 = vst [vmem:[#allocation6_spill] sm:$0xff] %v4659_v57  ;;  %v4663_v1 = vpop.f32.mrf.mxu1  ;;  %v1820_v6 = vadd.f32 %v1819_v63, %v4661_v58 }
  0xda   : > { %7722 = vst [vmem:[#allocation7_spill] sm:$0xff] %v4661_v58  ;;  %v1852_v63 = vadd.f32 %v1851_v11, %v4659_v57 }
  0xdb   : > { %7723 = vst [vmem:[#allocation8_spill] sm:$0xff] %v4663_v1  ;;  %3848 = vmatmul.msk.bf16.vlgmr.msra.gmra.mxu0 %vm1256_vm2, %v4478_v56  ;;  %3849 = vmatmul.msk.bf16.vlgmr.msra.gmra.mxu1 %vm1256_vm2, %v4478_v56  ;;  %v1821_v22 = vadd.f32 %v1820_v6, %v4663_v1 }
  0xdc   : > { %3850 = vmatmul.msk.bf16.vlgmr.msra.gmra.mxu2 %vm1256_vm2, %v4478_v56  ;;  %1699 = vmatpush.bf16.msra.mxu0 %v1334_v8 }
  0xdd   : > { %3851 = vmatmul.msk.bf16.vlgmr.msra.gmra.mxu3 %vm1256_vm2, %v4478_v56  ;;  %1727 = vmatpush.bf16.msra.mxu2 %v1340_v4  ;;  %v403_v4 = vld [vmem:[%s4421_s29 + $0x2e8] sm:$0xff] }
  0xde   : > { %1741 = vmatpush.bf16.msra.mxu3 %v1343_v9  ;;  %1713 = vmatpush.bf16.msra.mxu1 %v1337_v18  ;;  %v1247_v9 = vpack.c.bf16 %v402_v2, %v402_v2  ;;  %v1248_v18 = vpack.c.bf16 %v403_v4, %v403_v4  ;;  %v339_v4 = vld [vmem:[%s4421_s29 + $0xe8] sm:$0xff] }
  0xdf   : > { %v4689_v38 = vpop.f32.mrf.mxu2 }
  0xe0   : > { %7724 = vst [vmem:[#allocation9_spill] sm:$0xff] %v4689_v38  ;;  %v4693_v42 = vpop.f32.mrf.mxu3  ;;  %v4695_v44 = vpop.f32.mrf.mxu0  ;;  %1700 = vmatpush.bf16.msra.mxu0 %v1211_v36  ;;  %v372_v36 = vld [vmem:[%s4421_s29 + $0x1f0] sm:$0xff]  ;;  %v1822_v2 = vadd.f32 %v1821_v22, %v4689_v38  ;;  %v1349_v3 = vsel %vm1260_vm1, %v1248_v18, 0  ;;  %v1216_v22 = vpack.c.bf16 %v371_v5, %v339_v4 }
  0xe1   : > { %7725 = vst [vmem:[#allocation10_spill] sm:$0xff] %v4693_v42  ;;  %v4697_v47 = vpop.f32.mrf.mxu1  ;;  %1728 = vmatpush.bf16.msra.mxu2 %v1213_v25  ;;  %v1352_v25 = vsel %vm1260_vm1, %v1249_v7, 0  ;;  %v1217_v6 = vpack.c.bf16 %v372_v36, %v340_v35  ;;  %v1853_v7 = vadd.f32 %v1852_v63, %v4695_v44 }
  0xe2   : > { %7726 = vst [vmem:[#allocation11_spill] sm:$0xff] %v4695_v44  ;;  %1742 = vmatpush.bf16.msra.mxu3 %v1214_v37  ;;  %1714 = vmatpush.bf16.msra.mxu1 %v1212_v39  ;;  %v338_v37 = vld [vmem:[%s4421_s29 + $0xe0] sm:$0xff]  ;;  %v1346_v39 = vsel %vm1260_vm1, %v1247_v9, 0  ;;  %v1823_v57 = vadd.f32 %v1822_v2, %v4693_v42 }
  0xe3   : > { %7727 = vst [vmem:[#allocation12_spill] sm:$0xff] %v4697_v47  ;;  %v1215_v9 = vpack.c.bf16 %v370_v41, %v338_v37 }
  0xe7   : > { %v4707_v8 = vpop.f32.mrf.mxu2 }
  0xe8   : > { %7728 = vst [vmem:[#allocation13_spill] sm:$0xff] %v4707_v8  ;;  %v4710_v12 = vpop.f32.mrf.mxu3  ;;  %v4712_v14 = vpop.f32.mrf.mxu0 }
  0xe9   : > { %7729 = vst [vmem:[#allocation14_spill] sm:$0xff] %v4710_v12  ;;  %v4714_v19 = vpop.f32.mrf.mxu1  ;;  %v1824_v35 = vadd.f32 %v1823_v57, %v4712_v14 }
  0xea   : > { %7730 = vst [vmem:[#allocation15_spill] sm:$0xff] %v4712_v14 }
  0xeb   : > { %7731 = vst [vmem:[#allocation16_spill] sm:$0xff] %v4714_v19  ;;  %3852 = vmatmul.msk.bf16.vlgmr.msrb.gmra.mxu0 %vm1256_vm2, %v4478_v56  ;;  %3853 = vmatmul.msk.bf16.vlgmr.msrb.gmra.mxu1 %vm1256_vm2, %v4478_v56  ;;  %v1825_v37 = vadd.f32 %v1824_v35, %v4714_v19 }
  0xec   : > { %3854 = vmatmul.msk.bf16.vlgmr.msrb.gmra.mxu2 %vm1256_vm2, %v4478_v56  ;;  %1755 = vmatpush.bf16.msrb.mxu0 %v1346_v39 }
  0xed   : > { %3855 = vmatmul.msk.bf16.vlgmr.msrb.gmra.mxu3 %vm1256_vm2, %v4478_v56  ;;  %1783 = vmatpush.bf16.msrb.mxu2 %v1352_v25  ;;  %v1854_v25 = vadd.f32 %v1853_v7, %v4697_v47 }
  0xee   : > { %1797 = vmatpush.bf16.msrb.mxu3 %v1355_v40  ;;  %1769 = vmatpush.bf16.msrb.mxu1 %v1349_v3 }
  0xef   : > { %v4740_v11 = vpop.f32.mrf.mxu2  ;;  %v1855_v36 = vadd.f32 %v1854_v25, %v4707_v8 }
  0xf0   : > { %7732 = vst [vmem:[#allocation17_spill] sm:$0xff] %v4740_v11  ;;  %v4743_v18 = vpop.f32.mrf.mxu3  ;;  %v4745_v45 = vpop.f32.mrf.mxu0  ;;  %1756 = vmatpush.bf16.msrb.mxu0 %v1215_v9  ;;  %v1826_v41 = vadd.f32 %v1825_v37, %v4740_v11 }
  0xf1   : > { %7733 = vst [vmem:[#allocation18_spill] sm:$0xff] %v4743_v18  ;;  %v4747_v38 = vpop.f32.mrf.mxu1  ;;  %1784 = vmatpush.bf16.msrb.mxu2 %v1217_v6  ;;  %v1856_v40 = vadd.f32 %v1855_v36, %v4710_v12 }
  0xf2   : > { %7734 = vst [vmem:[#allocation19_spill] sm:$0xff] %v4745_v45  ;;  %1798 = vmatpush.bf16.msrb.mxu3 %v1218_v10  ;;  %1770 = vmatpush.bf16.msrb.mxu1 %v1216_v22  ;;  %v1827_v2 = vadd.f32 %v1826_v41, %v4743_v18 }
  0xf3   : > { %7735 = vst [vmem:[#allocation20_spill] sm:$0xff] %v4747_v38  ;;  %v1857_v57 = vadd.f32 %v1856_v40, %v4745_v45 }
  0xf5   : > { %v1858_v3 = vadd.f32 %v1857_v57, %v4747_v38 }
  0xf7   : > { %v4753_v39 = vpop.f32.mrf.mxu2 }
  0xf8   : > { %7736 = vst [vmem:[#allocation21_spill] sm:$0xff] %v4753_v39  ;;  %v4757_v53 = vpop.f32.mrf.mxu3  ;;  %v4759_v54 = vpop.f32.mrf.mxu0  ;;  %v1859_v6 = vadd.f32 %v1858_v3, %v4753_v39 }
  0xf9   : > { %7737 = vst [vmem:[#allocation22_spill] sm:$0xff] %v4757_v53  ;;  %v4761_v63 = vpop.f32.mrf.mxu1  ;;  %v1828_v4 = vadd.f32 %v1827_v2, %v4759_v54 }
  0xfa   : > { %7738 = vst [vmem:[#allocation23_spill] sm:$0xff] %v4759_v54  ;;  %v1860_v25 = vadd.f32 %v1859_v6, %v4757_v53 }
  0xfb   : > { %7739 = vst [vmem:[#allocation24_spill] sm:$0xff] %v4761_v63  ;;  %3856 = vmatmul.msk.bf16.vlgmr.msra.gmra.mxu0 %vm1256_vm2, %v4478_v56  ;;  %3857 = vmatmul.msk.bf16.vlgmr.msra.gmra.mxu1 %vm1256_vm2, %v4478_v56  ;;  %v1829_v22 = vadd.f32 %v1828_v4, %v4761_v63 }
  0xfc   : > { %3858 = vmatmul.msk.bf16.vlgmr.msra.gmra.mxu2 %vm1256_vm2, %v4478_v56 }
  0xfd   : > { %3859 = vmatmul.msk.bf16.vlgmr.msra.gmra.mxu3 %vm1256_vm2, %v4478_v56 }
  0xff   : > { %v4775_v5 = vpop.f32.mrf.mxu2 }
 0x100   : > { %7740 = vst [vmem:[#allocation25_spill] sm:$0xff] %v4775_v5  ;;  %v4778_v7 = vpop.f32.mrf.mxu3  ;;  %v4780_v9 = vpop.f32.mrf.mxu0  ;;  %v1830_v35 = vadd.f32 %v1829_v22, %v4775_v5 }
 0x101   : > { %7741 = vst [vmem:[#allocation26_spill] sm:$0xff] %v4778_v7  ;;  %v4782_v10 = vpop.f32.mrf.mxu1  ;;  %v1861_v36 = vadd.f32 %v1860_v25, %v4780_v9 }
 0x102   : > { %7742 = vst [vmem:[#allocation27_spill] sm:$0xff] %v4780_v9  ;;  %v1831_v40 = vadd.f32 %v1830_v35, %v4778_v7 }
 0x103   : > { %7743 = vst [vmem:[#allocation28_spill] sm:$0xff] %v4782_v10  ;;  %v1862_v3 = vadd.f32 %v1861_v36, %v4782_v10 }
 0x107   : > { %v4788_v37 = vpop.f32.mrf.mxu2 }
 0x108   : > { %7744 = vst [vmem:[#allocation29_spill] sm:$0xff] %v4788_v37  ;;  %v4791_v41 = vpop.f32.mrf.mxu3  ;;  %v4793_v57 = vpop.f32.mrf.mxu0  ;;  %v1863_v6 = vadd.f32 %v1862_v3, %v4788_v37 }
 0x109   : > { %7745 = vst [vmem:[#allocation30_spill] sm:$0xff] %v4791_v41  ;;  %v4795_v2 = vpop.f32.mrf.mxu1  ;;  %v1832_v4 = vadd.f32 %v1831_v40, %v4793_v57 }
 0x10a   : > { %7746 = vst [vmem:[#allocation31_spill] sm:$0xff] %v4793_v57  ;;  %v1864_v35 = vadd.f32 %v1863_v6, %v4791_v41 }
 0x10b   : > { %7747 = vst [vmem:[#allocation32_spill] sm:$0xff] %v4795_v2  ;;  %3860 = vmatmul.msk.bf16.vlgmr.msrb.gmra.mxu0 %vm1256_vm2, %v4478_v56  ;;  %3861 = vmatmul.msk.bf16.vlgmr.msrb.gmra.mxu1 %vm1256_vm2, %v4478_v56  ;;  %v1833_v22 = vadd.f32 %v1832_v4, %v4795_v2 }
 0x10c   : > { %3862 = vmatmul.msk.bf16.vlgmr.msrb.gmra.mxu2 %vm1256_vm2, %v4478_v56 }
 0x10d   : > { %3863 = vmatmul.msk.bf16.vlgmr.msrb.gmra.mxu3 %vm1256_vm2, %v4478_v56 }
 0x10f   : > { %v4809_v25 = vpop.f32.mrf.mxu2 }
 0x110   : > { %7748 = vst [vmem:[#allocation33_spill] sm:$0xff] %v4809_v25  ;;  %v1834_v36 = vadd.f32 %v1833_v22, %v4809_v25  ;;  %v4813_v40 = vpop.f32.mrf.mxu3  ;;  %v4815_v3 = vpop.f32.mrf.mxu0 }
 0x111   : > { %7749 = vst [vmem:[#allocation34_spill] sm:$0xff] %v4813_v40  ;;  %v4817_v37 = vpop.f32.mrf.mxu1  ;;  %v1865_v10 = vadd.f32 %v1864_v35, %v4815_v3 }
 0x112   : > { %7750 = vst [vmem:[#allocation35_spill] sm:$0xff] %v4815_v3  ;;  %v1835_v9 = vadd.f32 %v1834_v36, %v4813_v40 }
 0x113   : > { %7751 = vst [vmem:[#allocation36_spill] sm:$0xff] %v4817_v37  ;;  %v1866_v56 = vadd.f32 %v1865_v10, %v4817_v37 }
 0x114   : > { %1836 = vadd.xlane.f32.xlu0 %v1835_v9 }
 0x117   : > { %v4822_v4 = vpop.f32.mrf.mxu2 }
 0x118   : > { %7752 = vst [vmem:[#allocation37_spill] sm:$0xff] %v4822_v4  ;;  %v1867_v2 = vadd.f32 %v1866_v56, %v4822_v4  ;;  %v4825_v6 = vpop.f32.mrf.mxu3  ;;  %v4827_v22 = vpop.f32.mrf.mxu0 }
 0x119   : > { %7753 = vst [vmem:[#allocation38_spill] sm:$0xff] %v4825_v6  ;;  %v4829_v41 = vpop.f32.mrf.mxu1 }
 0x11a   : > { %7754 = vst [vmem:[#allocation39_spill] sm:$0xff] %v4827_v22  ;;  %v1868_v25 = vadd.f32 %v1867_v2, %v4825_v6  ;;  %v2155_v47 = vadd.f32 %v4829_v41, %v4827_v22 }
 0x11b   : > { %7755 = vst [vmem:[#allocation40_spill] sm:$0xff] %v4829_v41 }
 0x11c   : > { %1869 = vadd.xlane.f32.xlu0 %v1868_v25 }
 0x11f   : > { %v4832_v57 = vpop.f32.mrf.mxu2 }
 0x120   : > { %7756 = vst [vmem:[#allocation41_spill] sm:$0xff] %v4832_v57  ;;  %v4834_v35 = vpop.f32.mrf.mxu3  ;;  %v4836_v9 = vpop.f32.mrf.mxu0  ;;  %v2156_v19 = vadd.f32 %v2155_v47, %v4832_v57 }
 0x121   : > { %7757 = vst [vmem:[#allocation42_spill] sm:$0xff] %v4834_v35  ;;  %v4838_v10 = vpop.f32.mrf.mxu1 }
 0x122   : > { %7758 = vst [vmem:[#allocation43_spill] sm:$0xff] %v4836_v9  ;;  %v2188_v14 = vadd.f32 %v4838_v10, %v4836_v9  ;;  %v2157_v34 = vadd.f32 %v2156_v19, %v4834_v35 }
 0x123   : > { %7759 = vst [vmem:[#allocation44_spill] sm:$0xff] %v4838_v10 }
 0x127   : > { %v4840_v36 = vpop.f32.mrf.mxu2 }
 0x128   : > { %v4842_v56 = vpop.f32.mrf.mxu3  ;;  %v4844_v4 = vpop.f32.mrf.mxu0  ;;  %v2189_v1 = vadd.f32 %v2188_v14, %v4840_v36 }
 0x129   : > { %7760 = vst [vmem:[#allocation45_spill] sm:$0xff] %v4844_v4  ;;  %v4846_v37 = vpop.f32.mrf.mxu1  ;;  %v2158_v32 = vadd.f32 %v2157_v34, %v4844_v4 }
 0x12a   : > { %7761 = vst [vmem:[#allocation46_spill] sm:$0xff] %v4846_v37  ;;  %v2190_v41 = vadd.f32 %v2189_v1, %v4842_v56 }
 0x12b   : > { %v2159_v47 = vadd.f32 %v2158_v32, %v4846_v37 }
 0x12f   : > { %v4848_v3 = vpop.f32.mrf.mxu2 }
 0x130   : > { %7762 = vst [vmem:[#allocation47_spill] sm:$0xff] %v4848_v3  ;;  %v4850_v2 = vpop.f32.mrf.mxu3  ;;  %v4852_v25 = vpop.f32.mrf.mxu0  ;;  %v2160_v9 = vadd.f32 %v2159_v47, %v4848_v3 }
 0x131   : > { %7763 = vst [vmem:[#allocation48_spill] sm:$0xff] %v4850_v2  ;;  %v4854_v6 = vpop.f32.mrf.mxu1  ;;  %v2191_v10 = vadd.f32 %v2190_v41, %v4852_v25 }
 0x132   : > { %v2161_v34 = vadd.f32 %v2160_v9, %v4850_v2 }
 0x133   : > { %v2192_v14 = vadd.f32 %v2191_v10, %v4854_v6 }
 0x137   : > { %v4856_v40 = vpop.f32.mrf.mxu2 }
 0x138   : > { %v4858_v53 = vpop.f32.mrf.mxu0  ;;  %v4860_v7 = vpop.f32.mrf.mxu3  ;;  %v2193_v19 = vadd.f32 %v2192_v14, %v4856_v40 }
 0x139   : > { %7764 = vst [vmem:[#allocation49_spill] sm:$0xff] %v4858_v53  ;;  %v4862_v39 = vpop.f32.mrf.mxu1  ;;  %v2162_v32 = vadd.f32 %v2161_v34, %v4858_v53 }
 0x13a   : > { %7765 = vst [vmem:[#allocation50_spill] sm:$0xff] %v4860_v7  ;;  %v2194_v41 = vadd.f32 %v2193_v19, %v4860_v7 }
 0x13b   : > { %7766 = vst [vmem:[#allocation51_spill] sm:$0xff] %v4862_v39  ;;  %v2163_v47 = vadd.f32 %v2162_v32, %v4862_v39 }
 0x13f   : > { %v4864_v5 = vpop.f32.mrf.mxu2 }
 0x140   : > { %7767 = vst [vmem:[#allocation52_spill] sm:$0xff] %v4864_v5  ;;  %v4866_v38 = vpop.f32.mrf.mxu0  ;;  %v4868_v63 = vpop.f32.mrf.mxu3  ;;  %v2164_v9 = vadd.f32 %v2163_v47, %v4864_v5 }
 0x141   : > { %v4870_v45 = vpop.f32.mrf.mxu1  ;;  %v2195_v3 = vadd.f32 %v2194_v41, %v4866_v38 }
 0x142   : > { %7768 = vst [vmem:[#allocation53_spill] sm:$0xff] %v4870_v45  ;;  %v2165_v34 = vadd.f32 %v2164_v9, %v4868_v63 }
 0x143   : > { %v2196_v10 = vadd.f32 %v2195_v3, %v4870_v45 }
 0x147   : > { %v4872_v54 = vpop.f32.mrf.mxu2 }
 0x148   : > { %v4874_v12 = vpop.f32.mrf.mxu0  ;;  %v4876_v18 = vpop.f32.mrf.mxu3  ;;  %v2197_v53 = vadd.f32 %v2196_v10, %v4872_v54 }
 0x149   : > { %7769 = vst [vmem:[#allocation54_spill] sm:$0xff] %v4874_v12  ;;  %v4878_v8 = vpop.f32.mrf.mxu1  ;;  %v2166_v19 = vadd.f32 %v2165_v34, %v4874_v12 }
 0x14a   : > { %7770 = vst [vmem:[#allocation55_spill] sm:$0xff] %v4876_v18  ;;  %v2198_v32 = vadd.f32 %v2197_v53, %v4876_v18 }
 0x14b   : > { %7771 = vst [vmem:[#allocation56_spill] sm:$0xff] %v4878_v8  ;;  %v2167_v47 = vadd.f32 %v2166_v19, %v4878_v8 }
 0x14f   : > { %v4880_v11 = vpop.f32.mrf.mxu2 }
 0x150   : > { %7772 = vst [vmem:[#allocation57_spill] sm:$0xff] %v4880_v11  ;;  %v4885_v44 = vpop.f32.mrf.mxu0  ;;  %v4889_v42 = vpop.f32.mrf.mxu3  ;;  %v2168_v5 = vadd.f32 %v2167_v47, %v4880_v11 }
 0x151   : > { %7773 = vst [vmem:[#allocation58_spill] sm:$0xff] %v4889_v42  ;;  %v4894_v58 = vpop.f32.mrf.mxu1  ;;  %v2199_v3 = vadd.f32 %v2198_v32, %v4885_v44 }
 0x152   : > { %v2169_v10 = vadd.f32 %v2168_v5, %v4889_v42 }
 0x153   : > { %v2200_v9 = vadd.f32 %v2199_v3, %v4894_v58 }
 0x157   : > { %v4896_v51 = vpop.f32.mrf.mxu2 }
 0x158   : > { %v4900_v57 = vpop.f32.mrf.mxu0  ;;  %v4904_v22 = vpop.f32.mrf.mxu3  ;;  %v2201_v53 = vadd.f32 %v2200_v9, %v4896_v51 }
 0x159   : > { %7774 = vst [vmem:[#allocation59_spill] sm:$0xff] %v4900_v57  ;;  %v4909_v4 = vpop.f32.mrf.mxu1  ;;  %v2170_v12 = vadd.f32 %v2169_v10, %v4900_v57 }
 0x15a   : > { %7775 = vst [vmem:[#allocation60_spill] sm:$0xff] %v4909_v4  ;;  %v2202_v19 = vadd.f32 %v2201_v53, %v4904_v22 }
 0x15b   : > { %v2171_v32 = vadd.f32 %v2170_v12, %v4909_v4 }
 0x15f   : > { %v4911_v35 = vpop.f32.mrf.mxu2 }
 0x160   : > { %7776 = vst [vmem:[#allocation61_spill] sm:$0xff] %v4911_v35  ;;  %v4914_v1 = vpop.f32.mrf.mxu0  ;;  %v4919_v37 = vpop.f32.mrf.mxu3  ;;  %v2172_v5 = vadd.f32 %v2171_v32, %v4911_v35 }
 0x161   : > { %7777 = vst [vmem:[#allocation62_spill] sm:$0xff] %v4914_v1  ;;  %v4923_v14 = vpop.f32.mrf.mxu1  ;;  %v2203_v47 = vadd.f32 %v2202_v19, %v4914_v1 }
 0x162   : > { %v2173_v10 = vadd.f32 %v2172_v5, %v4919_v37 }
 0x163   : > { %v2204_v9 = vadd.f32 %v2203_v47, %v4923_v14 }
 0x167   : > { %v4925_v2 = vpop.f32.mrf.mxu2 }
 0x168   : > { %7778 = vst [vmem:[#allocation63_spill] sm:$0xff] %v4925_v2  ;;  %v4930_v7 = vpop.f32.mrf.mxu0  ;;  %v4933_v41 = vpop.f32.mrf.mxu3  ;;  %v2205_v57 = vadd.f32 %v2204_v9, %v4925_v2 }
 0x169   : > { %7779 = vst [vmem:[#allocation64_spill] sm:$0xff] %v4933_v41  ;;  %v4938_v45 = vpop.f32.mrf.mxu1  ;;  %v2174_v12 = vadd.f32 %v2173_v10, %v4930_v7 }
 0x16a   : > { %v2206_v19 = vadd.f32 %v2205_v57, %v4933_v41 }
 0x16b   : > { %v2175_v32 = vadd.f32 %v2174_v12, %v4938_v45 }
 0x16f   : > { %v4940_v39 = vpop.f32.mrf.mxu2 }
 0x170   : > { %7780 = vst [vmem:[#allocation65_spill] sm:$0xff] %v4940_v39  ;;  %v4944_v34 = vpop.f32.mrf.mxu0  ;;  %v4948_v18 = vpop.f32.mrf.mxu3  ;;  %v2176_v5 = vadd.f32 %v2175_v32, %v4940_v39 }
 0x171   : > { %7781 = vst [vmem:[#allocation66_spill] sm:$0xff] %v4948_v18  ;;  %v4953_v11 = vpop.f32.mrf.mxu1  ;;  %v2207_v35 = vadd.f32 %v2206_v19, %v4944_v34 }
 0x172   : > { %7782 = vst [vmem:[#allocation67_spill] sm:$0xff] %v4953_v11  ;;  %v2177_v12 = vadd.f32 %v2176_v5, %v4948_v18 }
 0x173   : > { %v2208_v2 = vadd.f32 %v2207_v35, %v4953_v11 }
 0x177   : > { %v4955_v8 = vpop.f32.mrf.mxu2 }
 0x178   : > { %7783 = vst [vmem:[#allocation68_spill] sm:$0xff] %v4955_v8  ;;  %v4958_v3 = vpop.f32.mrf.mxu0  ;;  %v4963_v42 = vpop.f32.mrf.mxu3 }
 0x179   : > { %7784 = vst [vmem:[#allocation69_spill] sm:$0xff] %v4958_v3  ;;  %v4967_v4 = vpop.f32.mrf.mxu1  ;;  %v2178_v19 = vadd.f32 %v2177_v12, %v4958_v3 }
 0x17a   : > { %7785 = vst [vmem:[#allocation70_spill] sm:$0xff] %v4963_v42 }
 0x17b   : > { %7786 = vst [vmem:[#allocation71_spill] sm:$0xff] %v4967_v4 }
 0x17f   : > { %v4969_v1 = vpop.f32.mrf.mxu2 }
 0x180   : > { %v4976_v9 = vpop.f32.mrf.mxu0  ;;  %v4979_v10 = vpop.f32.mrf.mxu3 }
 0x181   : > { %v4992_v32 = vpop.f32.mrf.mxu1 }
 0x187   : > { %v1837_v53 = vpop.xlane.xlu0 %1836  ;;  %v4994_v39 = vpop.f32.mrf.mxu2 }
 0x188   : > { %v4973_v47 = vmul.f32 0.00024414063, %v1837_v53  ;;  %v2209_v53 = vadd.f32 %v2208_v2, %v4955_v8  ;;  %v2179_v2 = vadd.f32 %v2178_v19, %v4967_v4  ;;  %v5006_v5 = vpop.f32.mrf.mxu0  ;;  %v5010_v18 = vpop.f32.mrf.mxu3 }
 0x18a   : > { %v4983_v57 = vsub.f32 %v4480_v59, %v4973_v47  ;;  %v4987_v41 = vsub.f32 %v4482_v61, %v4973_v47  ;;  %v2210_v11 = vadd.f32 %v2209_v53, %v4963_v42  ;;  %v5003_v61 = vsub.f32 %v4504_v13, %v4973_v47 }
 0x18b   : > { %v2180_v8 = vadd.f32 %v2179_v2, %v4969_v1 }
 0x18c   : > { %7787 = vst [vmem:[#allocation72_spill] sm:$0xff] %v4983_v57  ;;  %v1937_v35 = vmul.f32 %v4983_v57, %v4983_v57  ;;  %v1938_v59 = vmul.f32 %v4987_v41, %v4987_v41  ;;  %v2211_v12 = vadd.f32 %v2210_v11, %v4976_v9  ;;  %v1939_v53 = vmul.f32 %v5003_v61, %v5003_v61 }
 0x18d   : > { %7788 = vst [vmem:[#allocation73_spill] sm:$0xff] %v4987_v41  ;;  %v5014_v41 = vsub.f32 %v4506_v15, %v4973_v47  ;;  %v2181_v4 = vadd.f32 %v2180_v8, %v4979_v10 }
 0x18e   : > { %7789 = vst [vmem:[#allocation74_spill] sm:$0xff] %v5003_v61  ;;  %v2001_v3 = vadd.f32 %v1938_v59, %v1937_v35  ;;  %v2212_v57 = vadd.f32 %v2211_v12, %v4992_v32  ;;  %v5025_v35 = vsub.f32 %v4520_v28, %v4973_v47  ;;  %v5029_v59 = vpop.f32.mrf.mxu1 }
 0x18f   : > { %7790 = vst [vmem:[#allocation75_spill] sm:$0xff] %v5014_v41  ;;  %v1870_v13 = vpop.xlane.xlu0 %1869  ;;  %v1940_v15 = vmul.f32 %v5014_v41, %v5014_v41  ;;  %v5031_v2 = vpop.f32.mrf.mxu2  ;;  %v2182_v12 = vadd.f32 %v2181_v4, %v5006_v5 }
 0x190   : > { %v2002_v19 = vadd.f32 %v2001_v3, %v1939_v53  ;;  %v5020_v42 = vmul.f32 0.00024414063, %v1870_v13  ;;  %v2213_v11 = vadd.f32 %v2212_v57, %v4994_v39  ;;  %7791 = vst [vmem:[#allocation76_spill] sm:$0xff] %v5025_v35  ;;  %v5042_v28 = vpop.f32.mrf.mxu0  ;;  %v5047_v13 = vsub.f32 %v4522_v30, %v4973_v47 }
 0x191   : > { %v1941_v4 = vmul.f32 %v5025_v35, %v5025_v35 }
 0x192   : > { %v2003_v3 = vadd.f32 %v2002_v19, %v1940_v15  ;;  %v5036_v8 = vsub.f32 %v4508_v16, %v5020_v42  ;;  %v5040_v57 = vsub.f32 %v4510_v17, %v5020_v42  ;;  %v2214_v53 = vadd.f32 %v2213_v11, %v5010_v18  ;;  %7794 = vst [vmem:[#allocation79_spill] sm:$0xff] %v5047_v13  ;;  %v5056_v15 = vpop.f32.mrf.mxu3 }
 0x193   : > { %v2183_v19 = vadd.f32 %v2182_v12, %v5029_v59  ;;  %v5054_v16 = vsub.f32 %v4544_v46, %v4973_v47  ;;  %v5062_v30 = vsub.f32 %v4516_v24, %v5020_v42  ;;  %v5070_v46 = vsub.f32 %v4546_v48, %v4973_v47 }
 0x194   : > { %7792 = vst [vmem:[#allocation77_spill] sm:$0xff] %v5036_v8  ;;  %v2004_v17 = vadd.f32 %v2003_v3, %v1941_v4  ;;  %v2215_v41 = vadd.f32 %v2214_v53, %v5042_v28  ;;  %v1969_v35 = vmul.f32 %v5036_v8, %v5036_v8  ;;  %v1970_v12 = vmul.f32 %v5040_v57, %v5040_v57 }
 0x195   : > { %7793 = vst [vmem:[#allocation78_spill] sm:$0xff] %v5040_v57  ;;  %v2184_v11 = vadd.f32 %v2183_v19, %v5031_v2  ;;  %v1942_v3 = vmul.f32 %v5047_v13, %v5047_v13  ;;  %v5076_v53 = vsub.f32 %v4518_v27, %v5020_v42  ;;  %v5080_v24 = vsub.f32 %v4560_v62, %v4973_v47 }
 0x196   : > { %7795 = vst [vmem:[#allocation80_spill] sm:$0xff] %v5054_v16  ;;  %v1943_v4 = vmul.f32 %v5054_v16, %v5054_v16  ;;  %v5086_v19 = vsub.f32 %v4548_v49, %v5020_v42  ;;  %v5088_v57 = vpop.f32.mrf.mxu1  ;;  %v1971_v27 = vmul.f32 %v5062_v30, %v5062_v30  ;;  %v2034_v61 = vadd.f32 %v1970_v12, %v1969_v35 }
 0x197   : > { %7796 = vst [vmem:[#allocation81_spill] sm:$0xff] %v5062_v30  ;;  %v2005_v48 = vadd.f32 %v2004_v17, %v1942_v3  ;;  %v5090_v8 = vpop.f32.mrf.mxu2  ;;  %v2216_v13 = vadd.f32 %v2215_v41, %v5088_v57  ;;  %v2185_v62 = vadd.f32 %v2184_v11, %v5056_v15  ;;  %v5098_v16 = vsub.f32 %v4562_v0, %v4973_v47 }
 0x198   : > { %7797 = vst [vmem:[#allocation82_spill] sm:$0xff] %v5076_v53  ;;  %v1944_v49 = vmul.f32 %v5070_v46, %v5070_v46  ;;  %v5104_v3 = vsub.f32 %v4550_v50, %v5020_v42  ;;  %v1972_v30 = vmul.f32 %v5076_v53, %v5076_v53  ;;  %v2035_v41 = vadd.f32 %v2034_v61, %v1971_v27 }
 0x199   : > { %7798 = vst [vmem:[#allocation83_spill] sm:$0xff] %v5086_v19  ;;  %v2006_v17 = vadd.f32 %v2005_v48, %v1943_v4  ;;  %2186 = vadd.xlane.f32.xlu1 %v2185_v62  ;;  %v2217_v35 = vadd.f32 %v2216_v13, %v5090_v8  ;;  %v5111_v11 = vsub.f32 %v4587_v23, %v4973_v47 }
 0x19a   : > { %7799 = vst [vmem:[#allocation84_spill] sm:$0xff] %v5104_v3  ;;  %v1945_v0 = vmul.f32 %v5080_v24, %v5080_v24  ;;  %v5117_v4 = vsub.f32 %v4556_v55, %v5020_v42  ;;  %v1973_v50 = vmul.f32 %v5086_v19, %v5086_v19  ;;  %v2036_v48 = vadd.f32 %v2035_v41, %v1972_v30  ;;  %v5127_v27 = vpop.f32.mrf.mxu3 }
 0x19b   : > { %v2007_v12 = vadd.f32 %v2006_v17, %v1944_v49  ;;  %v5123_v61 = vsub.f32 %v4590_v29, %v4973_v47  ;;  %v1946_v23 = vmul.f32 %v5098_v16, %v5098_v16  ;;  %v5131_v62 = vsub.f32 %v4558_v60, %v5020_v42 }
 0x19c   : > { %7800 = vst [vmem:[#allocation85_spill] sm:$0xff] %v5117_v4  ;;  %v1974_v55 = vmul.f32 %v5104_v3, %v5104_v3  ;;  %v2218_v49 = vadd.f32 %v2217_v35, %v5127_v27  ;;  %v2037_v30 = vadd.f32 %v2036_v48, %v1973_v50  ;;  %v5138_v29 = vsub.f32 %v4611_v52, %v4973_v47 }
 0x19d   : > { %v2008_v13 = vadd.f32 %v2007_v12, %v1945_v0  ;;  %7801 = vst [vmem:[#allocation86_spill] sm:$0xff] %v5131_v62  ;;  %v1947_v17 = vmul.f32 %v5111_v11, %v5111_v11  ;;  %v5144_v0 = vsub.f32 %v4592_v31, %v5020_v42  ;;  %v1975_v60 = vmul.f32 %v5117_v4, %v5117_v4 }
 0x19e   : > { %v2038_v12 = vadd.f32 %v2037_v30, %v1974_v55  ;;  %v5150_v35 = vsub.f32 %v4614_v21, %v4973_v47  ;;  %v1948_v52 = vmul.f32 %v5123_v61, %v5123_v61  ;;  %v5156_v48 = vsub.f32 %v4596_v33, %v5020_v42 }
 0x19f   : > { %v2009_v41 = vadd.f32 %v2008_v13, %v1946_v23  ;;  %7802 = vst [vmem:[#allocation87_spill] sm:$0xff] %v5144_v0  ;;  %v1976_v31 = vmul.f32 %v5131_v62, %v5131_v62  ;;  %v5162_v13 = vsub.f32 %v4639_v20, %v4973_v47  ;;  %v1949_v21 = vmul.f32 %v5138_v29, %v5138_v29 }
 0x1a0   : > { %7803 = vst [vmem:[#allocation88_spill] sm:$0xff] %v5156_v48  ;;  %v2039_v23 = vadd.f32 %v2038_v12, %v1975_v60  ;;  %v5168_v30 = vsub.f32 %v4606_v43, %v5020_v42  ;;  %v1977_v33 = vmul.f32 %v5144_v0, %v5144_v0  ;;  %v1950_v20 = vmul.f32 %v5150_v35, %v5150_v35  ;;  %v7805_v60 = vld [vmem:[#allocation2_spill] sm:$0xff] }
 0x1a1   : > { %v2010_v50 = vadd.f32 %v2009_v41, %v1947_v17  ;;  %2219 = vadd.xlane.f32.xlu1 %v2218_v49  ;;  %v5174_v49 = vsub.f32 %v4642_v26, %v4973_v47  ;;  %v5180_v12 = vsub.f32 %v7805_v60, %v5020_v42  ;;  %v1978_v43 = vmul.f32 %v5156_v48, %v5156_v48  ;;  %v7810_v60 = vld [vmem:[#allocation8_spill] sm:$0xff] }
 0x1a2   : > { %7804 = vst [vmem:[#allocation89_spill] sm:$0xff] %v5168_v30  ;;  %v2040_v17 = vadd.f32 %v2039_v23, %v1976_v31  ;;  %v1951_v26 = vmul.f32 %v5162_v13, %v5162_v13  ;;  %v7808_v23 = vld [vmem:[#allocation3_spill] sm:$0xff]  ;;  %v5198_v48 = vsub.f32 %v7810_v60, %v4973_v47  ;;  %v7815_v60 = vld [vmem:[#allocation5_spill] sm:$0xff] }
 0x1a3   : > { %v2011_v55 = vadd.f32 %v2010_v50, %v1948_v52  ;;  %7806 = vst [vmem:[#allocation2_spill] sm:$0xff] %v5180_v12  ;;  %v7807_v50 = vld [vmem:[#allocation7_spill] sm:$0xff]  ;;  %v5192_v62 = vsub.f32 %v7808_v23, %v5020_v42  ;;  %v7813_v23 = vld [vmem:[#allocation9_spill] sm:$0xff]  ;;  %v5216_v3 = vsub.f32 %v7815_v60, %v5020_v42 }
 0x1a4   : > { %v2041_v52 = vadd.f32 %v2040_v17, %v1977_v33  ;;  %v5186_v0 = vsub.f32 %v7807_v50, %v4973_v47  ;;  %v1952_v33 = vmul.f32 %v5174_v49, %v5174_v49  ;;  %v7811_v50 = vld [vmem:[#allocation4_spill] sm:$0xff]  ;;  %v7821_v60 = vld [vmem:[#allocation15_spill] sm:$0xff] }
 0x1a5   : > { %v2012_v41 = vadd.f32 %v2011_v55, %v1949_v21  ;;  %7809 = vst [vmem:[#allocation7_spill] sm:$0xff] %v5192_v62  ;;  %v1979_v21 = vmul.f32 %v5168_v30, %v5168_v30  ;;  %v5204_v4 = vsub.f32 %v7811_v50, %v5020_v42  ;;  %v5210_v30 = vsub.f32 %v7813_v23, %v4973_v47  ;;  %v7817_v50 = vld [vmem:[#allocation10_spill] sm:$0xff] }
 0x1a6   : > { %v2042_v55 = vadd.f32 %v2041_v52, %v1978_v43  ;;  %v1953_v43 = vmul.f32 %v5186_v0, %v5186_v0  ;;  %7816 = vst [vmem:[#allocation4_spill] sm:$0xff] %v5216_v3  ;;  %v7819_v23 = vld [vmem:[#allocation6_spill] sm:$0xff] }
 0x1a7   : > { %v2013_v31 = vadd.f32 %v2012_v41, %v1950_v20  ;;  %7812 = vst [vmem:[#allocation3_spill] sm:$0xff] %v5204_v4  ;;  %v1980_v20 = vmul.f32 %v5180_v12, %v5180_v12  ;;  %v5222_v12 = vsub.f32 %v7817_v50, %v4973_v47  ;;  %v5228_v19 = vsub.f32 %v7819_v23, %v5020_v42  ;;  %v7823_v50 = vld [vmem:[#allocation11_spill] sm:$0xff]  ;;  %v7825_v23 = vld [vmem:[#allocation16_spill] sm:$0xff] }
 0x1a8   : > { %v2043_v41 = vadd.f32 %v2042_v55, %v1979_v21  ;;  %7814 = vst [vmem:[#allocation8_spill] sm:$0xff] %v5210_v30  ;;  %v1954_v21 = vmul.f32 %v5198_v48, %v5198_v48  ;;  %v5240_v53 = vsub.f32 %v7823_v50, %v5020_v42  ;;  %v7829_v50 = vld [vmem:[#allocation17_spill] sm:$0xff] }
 0x1a9   : > { %v2014_v17 = vadd.f32 %v2013_v31, %v1951_v26  ;;  %v1981_v26 = vmul.f32 %v5192_v62, %v5192_v62  ;;  %7818 = vst [vmem:[#allocation9_spill] sm:$0xff] %v5222_v12  ;;  %v5234_v62 = vsub.f32 %v7821_v60, %v4973_v47  ;;  %v7827_v60 = vld [vmem:[#allocation12_spill] sm:$0xff] }
 0x1aa   : > { %v2044_v31 = vadd.f32 %v2043_v41, %v1980_v20  ;;  %7820 = vst [vmem:[#allocation5_spill] sm:$0xff] %v5228_v19  ;;  %v1955_v20 = vmul.f32 %v5210_v30, %v5210_v30  ;;  %v5252_v30 = vsub.f32 %v7827_v60, %v5020_v42  ;;  %v7833_v60 = vld [vmem:[#allocation18_spill] sm:$0xff] }
 0x1ab   : > { %v2015_v52 = vadd.f32 %v2014_v17, %v1952_v33  ;;  %v1982_v33 = vmul.f32 %v5204_v4, %v5204_v4  ;;  %7822 = vst [vmem:[#allocation10_spill] sm:$0xff] %v5234_v62  ;;  %v5246_v4 = vsub.f32 %v7825_v23, %v4973_v47  ;;  %v7831_v23 = vld [vmem:[#allocation13_spill] sm:$0xff] }
 0x1ac   : > { %v2045_v17 = vadd.f32 %v2044_v31, %v1981_v26  ;;  %7824 = vst [vmem:[#allocation6_spill] sm:$0xff] %v5240_v53  ;;  %v1956_v26 = vmul.f32 %v5222_v12, %v5222_v12  ;;  %v5264_v12 = vsub.f32 %v7831_v23, %v5020_v42  ;;  %v7837_v23 = vld [vmem:[#allocation23_spill] sm:$0xff] }
 0x1ad   : > { %v2016_v55 = vadd.f32 %v2015_v52, %v1953_v43  ;;  %v1983_v43 = vmul.f32 %v5216_v3, %v5216_v3  ;;  %7826 = vst [vmem:[#allocation15_spill] sm:$0xff] %v5246_v4  ;;  %v5258_v3 = vsub.f32 %v7829_v50, %v4973_v47  ;;  %v7835_v50 = vld [vmem:[#allocation14_spill] sm:$0xff] }
 0x1ae   : > { %v2046_v52 = vadd.f32 %v2045_v17, %v1982_v33  ;;  %7828 = vst [vmem:[#allocation11_spill] sm:$0xff] %v5252_v30  ;;  %v1957_v33 = vmul.f32 %v5234_v62, %v5234_v62  ;;  %v5276_v62 = vsub.f32 %v7835_v50, %v5020_v42  ;;  %v7841_v50 = vld [vmem:[#allocation24_spill] sm:$0xff] }
 0x1af   : > { %v2017_v41 = vadd.f32 %v2016_v55, %v1954_v21  ;;  %v1984_v21 = vmul.f32 %v5228_v19, %v5228_v19  ;;  %7830 = vst [vmem:[#allocation16_spill] sm:$0xff] %v5258_v3  ;;  %v5270_v19 = vsub.f32 %v7833_v60, %v4973_v47  ;;  %v7839_v60 = vld [vmem:[#allocation19_spill] sm:$0xff] }
 0x1b0   : > { %v2047_v55 = vadd.f32 %v2046_v52, %v1983_v43  ;;  %7832 = vst [vmem:[#allocation12_spill] sm:$0xff] %v5264_v12  ;;  %v1958_v43 = vmul.f32 %v5246_v4, %v5246_v4  ;;  %v5288_v4 = vsub.f32 %v7839_v60, %v5020_v42  ;;  %v7845_v60 = vld [vmem:[#allocation25_spill] sm:$0xff] }
 0x1b1   : > { %v2018_v31 = vadd.f32 %v2017_v41, %v1955_v20  ;;  %v1985_v20 = vmul.f32 %v5240_v53, %v5240_v53  ;;  %7834 = vst [vmem:[#allocation17_spill] sm:$0xff] %v5270_v19  ;;  %v5282_v53 = vsub.f32 %v7837_v23, %v4973_v47  ;;  %v7843_v23 = vld [vmem:[#allocation20_spill] sm:$0xff] }
 0x1b2   : > { %v2048_v41 = vadd.f32 %v2047_v55, %v1984_v21  ;;  %7836 = vst [vmem:[#allocation13_spill] sm:$0xff] %v5276_v62  ;;  %v1959_v21 = vmul.f32 %v5258_v3, %v5258_v3  ;;  %v5300_v3 = vsub.f32 %v7843_v23, %v5020_v42  ;;  %v7849_v23 = vld [vmem:[#allocation26_spill] sm:$0xff] }
 0x1b3   : > { %v2019_v17 = vadd.f32 %v2018_v31, %v1956_v26  ;;  %v1986_v26 = vmul.f32 %v5252_v30, %v5252_v30  ;;  %7838 = vst [vmem:[#allocation18_spill] sm:$0xff] %v5282_v53  ;;  %v5294_v30 = vsub.f32 %v7841_v50, %v4973_v47  ;;  %v7847_v50 = vld [vmem:[#allocation21_spill] sm:$0xff] }
 0x1b4   : > { %v2049_v31 = vadd.f32 %v2048_v41, %v1985_v20  ;;  %7840 = vst [vmem:[#allocation14_spill] sm:$0xff] %v5288_v4  ;;  %v1960_v20 = vmul.f32 %v5270_v19, %v5270_v19  ;;  %v5312_v19 = vsub.f32 %v7847_v50, %v5020_v42  ;;  %v7853_v50 = vld [vmem:[#allocation31_spill] sm:$0xff] }
 0x1b5   : > { %v2020_v52 = vadd.f32 %v2019_v17, %v1957_v33  ;;  %v1987_v33 = vmul.f32 %v5264_v12, %v5264_v12  ;;  %7842 = vst [vmem:[#allocation23_spill] sm:$0xff] %v5294_v30  ;;  %v5306_v12 = vsub.f32 %v7845_v60, %v4973_v47  ;;  %v7851_v60 = vld [vmem:[#allocation22_spill] sm:$0xff] }
 0x1b6   : > { %v2050_v17 = vadd.f32 %v2049_v31, %v1986_v26  ;;  %7844 = vst [vmem:[#allocation19_spill] sm:$0xff] %v5300_v3  ;;  %v1961_v26 = vmul.f32 %v5282_v53, %v5282_v53  ;;  %v5324_v53 = vsub.f32 %v7851_v60, %v5020_v42  ;;  %v7857_v60 = vld [vmem:[#allocation32_spill] sm:$0xff] }
 0x1b7   : > { %v2021_v55 = vadd.f32 %v2020_v52, %v1958_v43  ;;  %v1988_v43 = vmul.f32 %v5276_v62, %v5276_v62  ;;  %7846 = vst [vmem:[#allocation24_spill] sm:$0xff] %v5306_v12  ;;  %v5318_v62 = vsub.f32 %v7849_v23, %v4973_v47  ;;  %v7855_v23 = vld [vmem:[#allocation27_spill] sm:$0xff] }
 0x1b8   : > { %v2051_v52 = vadd.f32 %v2050_v17, %v1987_v33  ;;  %7848 = vst [vmem:[#allocation20_spill] sm:$0xff] %v5312_v19  ;;  %v1962_v33 = vmul.f32 %v5294_v30, %v5294_v30  ;;  %v5336_v30 = vsub.f32 %v7855_v23, %v5020_v42  ;;  %v7860_v23 = vld [vmem:[#allocation33_spill] sm:$0xff] }
 0x1b9   : > { %v2022_v41 = vadd.f32 %v2021_v55, %v1959_v21  ;;  %v1989_v21 = vmul.f32 %v5288_v4, %v5288_v4  ;;  %7850 = vst [vmem:[#allocation25_spill] sm:$0xff] %v5318_v62  ;;  %v5330_v4 = vsub.f32 %v7853_v50, %v4973_v47  ;;  %v7858_v50 = vld [vmem:[#allocation28_spill] sm:$0xff] }
 0x1ba   : > { %v2052_v55 = vadd.f32 %v2051_v52, %v1988_v43  ;;  %7852 = vst [vmem:[#allocation21_spill] sm:$0xff] %v5324_v53  ;;  %v1963_v43 = vmul.f32 %v5306_v12, %v5306_v12  ;;  %v5348_v12 = vsub.f32 %v7858_v50, %v5020_v42  ;;  %v7863_v50 = vld [vmem:[#allocation34_spill] sm:$0xff] }
 0x1bb   : > { %v2023_v31 = vadd.f32 %v2022_v41, %v1960_v20  ;;  %v1990_v20 = vmul.f32 %v5300_v3, %v5300_v3  ;;  %7854 = vst [vmem:[#allocation26_spill] sm:$0xff] %v5330_v4  ;;  %v5342_v3 = vsub.f32 %v7857_v60, %v4973_v47  ;;  %v7861_v60 = vld [vmem:[#allocation29_spill] sm:$0xff] }
 0x1bc   : > { %v2053_v41 = vadd.f32 %v2052_v55, %v1989_v21  ;;  %7856 = vst [vmem:[#allocation22_spill] sm:$0xff] %v5336_v30  ;;  %v1964_v21 = vmul.f32 %v5318_v62, %v5318_v62  ;;  %v5360_v62 = vsub.f32 %v7861_v60, %v5020_v42 }
 0x1bd   : > { %v2024_v17 = vadd.f32 %v2023_v31, %v1961_v26  ;;  %v1991_v26 = vmul.f32 %v5312_v19, %v5312_v19  ;;  %7859 = vst [vmem:[#allocation31_spill] sm:$0xff] %v5348_v12  ;;  %v5354_v19 = vsub.f32 %v7860_v23, %v4973_v47  ;;  %v7864_v23 = vld [vmem:[#allocation30_spill] sm:$0xff] }
 0x1be   : > { %v2054_v31 = vadd.f32 %v2053_v41, %v1990_v20  ;;  %v1965_v20 = vmul.f32 %v5330_v4, %v5330_v4  ;;  %7862 = vst [vmem:[#allocation27_spill] sm:$0xff] %v5360_v62  ;;  %v5372_v4 = vsub.f32 %v7864_v23, %v5020_v42 }
 0x1bf   : > { %v2025_v52 = vadd.f32 %v2024_v17, %v1962_v33  ;;  %v1992_v33 = vmul.f32 %v5324_v53, %v5324_v53  ;;  %v5366_v53 = vsub.f32 %v7863_v50, %v4973_v47  ;;  %v1967_v60 = vmul.f32 %v5354_v19, %v5354_v19 }
 0x1c0   : > { %v2055_v17 = vadd.f32 %v2054_v31, %v1991_v26  ;;  %v1966_v26 = vmul.f32 %v5342_v3, %v5342_v3  ;;  %7865 = vst [vmem:[#allocation32_spill] sm:$0xff] %v5372_v4  ;;  %v1995_v50 = vmul.f32 %v5360_v62, %v5360_v62 }
 0x1c1   : > { %v2026_v55 = vadd.f32 %v2025_v52, %v1963_v43  ;;  %v1993_v43 = vmul.f32 %v5336_v30, %v5336_v30  ;;  %v7868_v30 = vld [vmem:[#allocation36_spill] sm:$0xff] }
 0x1c2   : > { %v2056_v52 = vadd.f32 %v2055_v17, %v1992_v33  ;;  %v7866_v17 = vld [vmem:[#allocation35_spill] sm:$0xff] }
 0x1c3   : > { %v2027_v41 = vadd.f32 %v2026_v55, %v1964_v21  ;;  %v1994_v21 = vmul.f32 %v5348_v12, %v5348_v12  ;;  %v5380_v47 = vsub.f32 %v7866_v17, %v5020_v42  ;;  %v5388_v12 = vsub.f32 %v7868_v30, %v5020_v42 }
 0x1c4   : > { %v2057_v55 = vadd.f32 %v2056_v52, %v1993_v43  ;;  %v1996_v43 = vmul.f32 %v5372_v4, %v5372_v4 }
 0x1c5   : > { %v2028_v31 = vadd.f32 %v2027_v41, %v1965_v20  ;;  %7867 = vst [vmem:[#allocation28_spill] sm:$0xff] %v5380_v47  ;;  %v1968_v41 = vmul.f32 %v5366_v53, %v5366_v53  ;;  %v1998_v30 = vmul.f32 %v5388_v12, %v5388_v12 }
 0x1c6   : > { %v2058_v20 = vadd.f32 %v2057_v55, %v1994_v21  ;;  %7869 = vst [vmem:[#allocation33_spill] sm:$0xff] %v5388_v12  ;;  %v1997_v21 = vmul.f32 %v5380_v47, %v5380_v47 }
 0x1c7   : > { %v2029_v33 = vadd.f32 %v2028_v31, %v1966_v26  ;;  %v7870_v31 = vld [vmem:[#allocation37_spill] sm:$0xff] }
 0x1c8   : > { %v2059_v52 = vadd.f32 %v2058_v20, %v1995_v50  ;;  %v5394_v17 = vsub.f32 %v7870_v31, %v5020_v42 }
 0x1c9   : > { %v2030_v23 = vadd.f32 %v2029_v33, %v1967_v60  ;;  %v7872_v60 = vld [vmem:[#allocation38_spill] sm:$0xff] }
 0x1ca   : > { %7871 = vst [vmem:[#allocation29_spill] sm:$0xff] %v5394_v17  ;;  %v2060_v55 = vadd.f32 %v2059_v52, %v1996_v43  ;;  %v5400_v33 = vsub.f32 %v7872_v60, %v5020_v42  ;;  %v1999_v50 = vmul.f32 %v5394_v17, %v5394_v17  ;;  %v7874_v60 = vld [vmem:[#allocation39_spill] sm:$0xff]  ;;  %v7890_v17 = vld [vmem:[#allocation46_spill] sm:$0xff] }
 0x1cb   : > { %v2031_v26 = vadd.f32 %v2030_v23, %v1968_v41 }
 0x1cc   : > { %7873 = vst [vmem:[#allocation34_spill] sm:$0xff] %v5400_v33  ;;  %v2061_v62 = vadd.f32 %v2060_v55, %v1997_v21  ;;  %v2000_v41 = vmul.f32 %v5400_v33, %v5400_v33  ;;  %v7876_v21 = vld [vmem:[#allocation40_spill] sm:$0xff] }
 0x1cd   : > { %2032 = vadd.xlane.f32.xlu2 %v2031_v26 }
 0x1ce   : > { %v2062_v20 = vadd.f32 %v2061_v62, %v1998_v30  ;;  %v7878_v62 = vld [vmem:[#allocation43_spill] sm:$0xff] }
 0x1d0   : > { %v2063_v23 = vadd.f32 %v2062_v20, %v1999_v50  ;;  %v7880_v50 = vld [vmem:[#allocation44_spill] sm:$0xff] }
 0x1d2   : > { %v2064_v31 = vadd.f32 %v2063_v23, %v2000_v41  ;;  %v7882_v41 = vld [vmem:[#allocation41_spill] sm:$0xff] }
 0x1d5   : > { %2065 = vadd.xlane.f32.xlu2 %v2064_v31 }
 0x20c   : > { %v2187_v43 = vpop.xlane.xlu1 %2186 }
 0x20d   : > { %v5408_v26 = vmul.f32 0.00024414063, %v2187_v43 }
 0x20f   : > { %v5414_v12 = vsub.f32 %v7874_v60, %v5408_v26  ;;  %v5418_v55 = vsub.f32 %v7876_v21, %v5408_v26  ;;  %v5430_v23 = vsub.f32 %v7882_v41, %v5408_v26 }
 0x211   : > { %7875 = vst [vmem:[#allocation30_spill] sm:$0xff] %v5414_v12  ;;  %v2287_v31 = vmul.f32 %v5414_v12, %v5414_v12 }
 0x212   : > { %7877 = vst [vmem:[#allocation35_spill] sm:$0xff] %v5418_v55 }
 0x213   : > { %7883 = vst [vmem:[#allocation38_spill] sm:$0xff] %v5430_v23 }
 0x214   : > { %v2220_v52 = vpop.xlane.xlu1 %2219 }
 0x215   : > { %v5410_v42 = vmul.f32 0.00024414063, %v2220_v52  ;;  %v2288_v52 = vmul.f32 %v5418_v55, %v5418_v55  ;;  %v2289_v55 = vmul.f32 %v5430_v23, %v5430_v23 }
 0x217   : > { %v5422_v30 = vsub.f32 %v7878_v62, %v5410_v42  ;;  %v5426_v20 = vsub.f32 %v7880_v50, %v5410_v42  ;;  %v5436_v43 = vsub.f32 %v4840_v36, %v5410_v42  ;;  %v7885_v62 = vld [vmem:[#allocation42_spill] sm:$0xff]  ;;  %v5450_v41 = vsub.f32 %v4842_v56, %v5410_v42  ;;  %v7887_v36 = vld [vmem:[#allocation45_spill] sm:$0xff] }
 0x218   : > { %v5446_v50 = vsub.f32 %v7885_v62, %v5408_v26  ;;  %v5454_v12 = vsub.f32 %v7887_v36, %v5408_v26  ;;  %v2351_v62 = vadd.f32 %v2288_v52, %v2287_v31  ;;  %v5466_v56 = vsub.f32 %v7890_v17, %v5408_v26 }
 0x219   : > { %7879 = vst [vmem:[#allocation36_spill] sm:$0xff] %v5422_v30  ;;  %v2319_v60 = vmul.f32 %v5422_v30, %v5422_v30  ;;  %v2320_v21 = vmul.f32 %v5426_v20, %v5426_v20  ;;  %v5460_v30 = vsub.f32 %v4852_v25, %v5410_v42  ;;  %v5472_v47 = vsub.f32 %v4854_v6, %v5410_v42 }
 0x21a   : > { %7881 = vst [vmem:[#allocation37_spill] sm:$0xff] %v5426_v20  ;;  %v2321_v20 = vmul.f32 %v5436_v43, %v5436_v43  ;;  %v2290_v36 = vmul.f32 %v5446_v50, %v5446_v50  ;;  %v2322_v25 = vmul.f32 %v5450_v41, %v5450_v41  ;;  %v2352_v23 = vadd.f32 %v2351_v62, %v2289_v55 }
 0x21b   : > { %7884 = vst [vmem:[#allocation39_spill] sm:$0xff] %v5436_v43  ;;  %v2384_v33 = vadd.f32 %v2320_v21, %v2319_v60  ;;  %v7892_v43 = vld [vmem:[#allocation47_spill] sm:$0xff]  ;;  %v2291_v17 = vmul.f32 %v5454_v12, %v5454_v12  ;;  %v5484_v52 = vsub.f32 %v4856_v40, %v5410_v42  ;;  %v2323_v6 = vmul.f32 %v5460_v30, %v5460_v30 }
 0x21c   : > { %7886 = vst [vmem:[#allocation40_spill] sm:$0xff] %v5450_v41  ;;  %v5478_v31 = vsub.f32 %v7892_v43, %v5408_v26  ;;  %v2353_v60 = vadd.f32 %v2352_v23, %v2290_v36  ;;  %v7895_v41 = vld [vmem:[#allocation48_spill] sm:$0xff]  ;;  %v2324_v40 = vmul.f32 %v5472_v47, %v5472_v47 }
 0x21d   : > { %7888 = vst [vmem:[#allocation43_spill] sm:$0xff] %v5454_v12  ;;  %v2385_v4 = vadd.f32 %v2384_v33, %v2321_v20  ;;  %v5490_v55 = vsub.f32 %v7895_v41, %v5408_v26  ;;  %v2292_v33 = vmul.f32 %v5466_v56, %v5466_v56  ;;  %v7896_v20 = vld [vmem:[#allocation50_spill] sm:$0xff]  ;;  %v5508_v41 = vsub.f32 %v4866_v38, %v5410_v42 }
 0x21e   : > { %7889 = vst [vmem:[#allocation44_spill] sm:$0xff] %v5460_v30  ;;  %v5496_v43 = vsub.f32 %v7896_v20, %v5410_v42  ;;  %v2354_v62 = vadd.f32 %v2353_v60, %v2291_v17  ;;  %v7898_v30 = vld [vmem:[#allocation49_spill] sm:$0xff]  ;;  %v2325_v36 = vmul.f32 %v5484_v52, %v5484_v52 }
 0x21f   : > { %7891 = vst [vmem:[#allocation41_spill] sm:$0xff] %v5472_v47  ;;  %v2386_v21 = vadd.f32 %v2385_v4, %v2322_v25  ;;  %v5502_v23 = vsub.f32 %v7898_v30, %v5408_v26  ;;  %v2293_v4 = vmul.f32 %v5478_v31, %v5478_v31  ;;  %v7900_v47 = vld [vmem:[#allocation51_spill] sm:$0xff]  ;;  %v2294_v60 = vmul.f32 %v5490_v55, %v5490_v55 }
 0x220   : > { %7893 = vst [vmem:[#allocation42_spill] sm:$0xff] %v5478_v31  ;;  %v2355_v25 = vadd.f32 %v2354_v62, %v2292_v33  ;;  %v5514_v17 = vsub.f32 %v7900_v47, %v5408_v26  ;;  %v2326_v38 = vmul.f32 %v5496_v43, %v5496_v43 }
 0x221   : > { %7894 = vst [vmem:[#allocation45_spill] sm:$0xff] %v5484_v52  ;;  %v2387_v12 = vadd.f32 %v2386_v21, %v2323_v6  ;;  %v7901_v6 = vld [vmem:[#allocation53_spill] sm:$0xff]  ;;  %v7903_v52 = vld [vmem:[#allocation52_spill] sm:$0xff]  ;;  %v2295_v47 = vmul.f32 %v5502_v23, %v5502_v23 }
 0x222   : > { %7897 = vst [vmem:[#allocation46_spill] sm:$0xff] %v5496_v43  ;;  %v5518_v30 = vsub.f32 %v7901_v6, %v5410_v42  ;;  %v2356_v21 = vadd.f32 %v2355_v25, %v2293_v4  ;;  %v5526_v33 = vsub.f32 %v7903_v52, %v5408_v26  ;;  %v5538_v4 = vsub.f32 %v4868_v63, %v5408_v26 }
 0x223   : > { %7899 = vst [vmem:[#allocation47_spill] sm:$0xff] %v5508_v41  ;;  %v2388_v20 = vadd.f32 %v2387_v12, %v2324_v40  ;;  %v5530_v12 = vsub.f32 %v4872_v54, %v5410_v42  ;;  %v2327_v40 = vmul.f32 %v5508_v41, %v5508_v41  ;;  %v2296_v54 = vmul.f32 %v5514_v17, %v5514_v17  ;;  %v7907_v41 = vld [vmem:[#allocation54_spill] sm:$0xff] }
 0x224   : > { %7902 = vst [vmem:[#allocation48_spill] sm:$0xff] %v5518_v30  ;;  %v2357_v62 = vadd.f32 %v2356_v21, %v2294_v60  ;;  %v2328_v25 = vmul.f32 %v5518_v30, %v5518_v30  ;;  %v5550_v60 = vsub.f32 %v7907_v41, %v5408_v26  ;;  %v5554_v63 = vsub.f32 %v4885_v44, %v5410_v42  ;;  %v7910_v30 = vld [vmem:[#allocation56_spill] sm:$0xff] }
 0x225   : > { %v2389_v31 = vadd.f32 %v2388_v20, %v2325_v36  ;;  %7904 = vst [vmem:[#allocation50_spill] sm:$0xff] %v5530_v12  ;;  %v7905_v36 = vld [vmem:[#allocation55_spill] sm:$0xff]  ;;  %v5566_v41 = vsub.f32 %v4894_v58, %v5410_v42  ;;  %v2298_v44 = vmul.f32 %v5538_v4, %v5538_v4 }
 0x226   : > { %v5542_v52 = vsub.f32 %v7905_v36, %v5410_v42  ;;  %v2358_v20 = vadd.f32 %v2357_v62, %v2295_v47  ;;  %7908 = vst [vmem:[#allocation51_spill] sm:$0xff] %v5550_v60  ;;  %v5562_v47 = vsub.f32 %v7910_v30, %v5408_v26  ;;  %v2299_v58 = vmul.f32 %v5550_v60, %v5550_v60 }
 0x227   : > { %v2390_v6 = vadd.f32 %v2389_v31, %v2326_v38  ;;  %7909 = vst [vmem:[#allocation53_spill] sm:$0xff] %v5554_v63  ;;  %v2297_v31 = vmul.f32 %v5526_v33, %v5526_v33  ;;  %v2329_v38 = vmul.f32 %v5530_v12, %v5530_v12  ;;  %v7912_v12 = vld [vmem:[#allocation57_spill] sm:$0xff]  ;;  %v2331_v30 = vmul.f32 %v5554_v63, %v5554_v63 }
 0x228   : > { %7906 = vst [vmem:[#allocation49_spill] sm:$0xff] %v5542_v52  ;;  %v2359_v21 = vadd.f32 %v2358_v20, %v2296_v54  ;;  %v5574_v54 = vsub.f32 %v7912_v12, %v5408_v26  ;;  %v2300_v12 = vmul.f32 %v5562_v47, %v5562_v47 }
 0x229   : > { %v2391_v43 = vadd.f32 %v2390_v6, %v2327_v40  ;;  %7911 = vst [vmem:[#allocation52_spill] sm:$0xff] %v5566_v41  ;;  %v2330_v40 = vmul.f32 %v5542_v52, %v5542_v52  ;;  %v7914_v52 = vld [vmem:[#allocation58_spill] sm:$0xff] }
 0x22a   : > { %v2360_v62 = vadd.f32 %v2359_v21, %v2297_v31  ;;  %v5586_v31 = vsub.f32 %v7914_v52, %v5408_v26  ;;  %v2301_v52 = vmul.f32 %v5574_v54, %v5574_v54 }
 0x22b   : > { %v2392_v36 = vadd.f32 %v2391_v43, %v2328_v25  ;;  %v5578_v43 = vsub.f32 %v4896_v51, %v5410_v42 }
 0x22c   : > { %v2361_v25 = vadd.f32 %v2360_v62, %v2298_v44  ;;  %v5598_v44 = vsub.f32 %v4904_v22, %v5410_v42  ;;  %v2302_v22 = vmul.f32 %v5586_v31, %v5586_v31 }
 0x22d   : > { %v2393_v6 = vadd.f32 %v2392_v36, %v2329_v38  ;;  %7913 = vst [vmem:[#allocation55_spill] sm:$0xff] %v5578_v43  ;;  %v2332_v38 = vmul.f32 %v5566_v41, %v5566_v41  ;;  %v7915_v36 = vld [vmem:[#allocation59_spill] sm:$0xff]  ;;  %v7917_v41 = vld [vmem:[#allocation62_spill] sm:$0xff] }
 0x22e   : > { %v2362_v51 = vadd.f32 %v2361_v25, %v2299_v58  ;;  %v5594_v60 = vsub.f32 %v7915_v36, %v5408_v26  ;;  %7916 = vst [vmem:[#allocation54_spill] sm:$0xff] %v5598_v44  ;;  %v5606_v58 = vsub.f32 %v7917_v41, %v5410_v42  ;;  %v2334_v63 = vmul.f32 %v5598_v44, %v5598_v44 }
 0x22f   : > { %v2394_v20 = vadd.f32 %v2393_v6, %v2330_v40  ;;  %v2333_v40 = vmul.f32 %v5578_v43, %v5578_v43 }
 0x230   : > { %v2363_v62 = vadd.f32 %v2362_v51, %v2300_v12  ;;  %7918 = vst [vmem:[#allocation56_spill] sm:$0xff] %v5606_v58  ;;  %v2303_v12 = vmul.f32 %v5594_v60, %v5594_v60  ;;  %v7920_v51 = vld [vmem:[#allocation61_spill] sm:$0xff] }
 0x231   : > { %v2395_v21 = vadd.f32 %v2394_v20, %v2331_v30  ;;  %v7919_v30 = vld [vmem:[#allocation60_spill] sm:$0xff]  ;;  %v5620_v41 = vsub.f32 %v7920_v51, %v5408_v26 }
 0x232   : > { %v5610_v25 = vsub.f32 %v7919_v30, %v5408_v26  ;;  %v2364_v20 = vadd.f32 %v2363_v62, %v2301_v52  ;;  %v2335_v30 = vmul.f32 %v5606_v58, %v5606_v58 }
 0x233   : > { %v2396_v6 = vadd.f32 %v2395_v21, %v2332_v38  ;;  %v5624_v21 = vsub.f32 %v4923_v14, %v5410_v42  ;;  %v2305_v14 = vmul.f32 %v5620_v41, %v5620_v41 }
 0x234   : > { %v2365_v38 = vadd.f32 %v2364_v20, %v2302_v22  ;;  %v5632_v22 = vsub.f32 %v4919_v37, %v5408_v26  ;;  %v7922_v20 = vld [vmem:[#allocation63_spill] sm:$0xff] }
 0x235   : > { %v2397_v36 = vadd.f32 %v2396_v6, %v2333_v40  ;;  %7921 = vst [vmem:[#allocation57_spill] sm:$0xff] %v5624_v21  ;;  %v2304_v40 = vmul.f32 %v5610_v25, %v5610_v25  ;;  %v5636_v51 = vsub.f32 %v7922_v20, %v5410_v42 }
 0x236   : > { %v2366_v62 = vadd.f32 %v2365_v38, %v2303_v12  ;;  %v5644_v12 = vsub.f32 %v4930_v7, %v5408_v26  ;;  %v7924_v38 = vld [vmem:[#allocation64_spill] sm:$0xff]  ;;  %v5660_v7 = vsub.f32 %v4944_v34, %v5410_v42 }
 0x237   : > { %v2398_v52 = vadd.f32 %v2397_v36, %v2334_v63  ;;  %7923 = vst [vmem:[#allocation58_spill] sm:$0xff] %v5636_v51  ;;  %v2336_v63 = vmul.f32 %v5624_v21, %v5624_v21  ;;  %v5648_v37 = vsub.f32 %v7924_v38, %v5410_v42 }
 0x238   : > { %v2367_v44 = vadd.f32 %v2366_v62, %v2304_v40  ;;  %7927 = vst [vmem:[#allocation60_spill] sm:$0xff] %v5660_v7 }
 0x239   : > { %v2399_v6 = vadd.f32 %v2398_v52, %v2335_v30  ;;  %7925 = vst [vmem:[#allocation59_spill] sm:$0xff] %v5648_v37  ;;  %v2306_v30 = vmul.f32 %v5632_v22, %v5632_v22  ;;  %v2337_v52 = vmul.f32 %v5636_v51, %v5636_v51  ;;  %v2338_v20 = vmul.f32 %v5648_v37, %v5648_v37  ;;  %v7932_v37 = vld [vmem:[#allocation68_spill] sm:$0xff] }
 0x23a   : > { %v2368_v36 = vadd.f32 %v2367_v44, %v2305_v14  ;;  %v5656_v44 = vsub.f32 %v4938_v45, %v5408_v26  ;;  %v7928_v14 = vld [vmem:[#allocation65_spill] sm:$0xff] }
 0x23b   : > { %v2400_v58 = vadd.f32 %v2399_v6, %v2336_v63  ;;  %v2307_v6 = vmul.f32 %v5644_v12, %v5644_v12  ;;  %v5668_v63 = vsub.f32 %v7928_v14, %v5408_v26  ;;  %v5684_v14 = vsub.f32 %v7932_v37, %v5410_v42  ;;  %v7934_v37 = vld [vmem:[#allocation70_spill] sm:$0xff] }
 0x23c   : > { %v2369_v40 = vadd.f32 %v2368_v36, %v2306_v30  ;;  %7926 = vst [vmem:[#allocation62_spill] sm:$0xff] %v5656_v44  ;;  %v2308_v34 = vmul.f32 %v5656_v44, %v5656_v44  ;;  %v2339_v30 = vmul.f32 %v5660_v7, %v5660_v7  ;;  %v5696_v44 = vsub.f32 %v7934_v37, %v5410_v42 }
 0x23d   : > { %v2401_v62 = vadd.f32 %v2400_v58, %v2337_v52  ;;  %7929 = vst [vmem:[#allocation61_spill] sm:$0xff] %v5668_v63  ;;  %v7930_v58 = vld [vmem:[#allocation67_spill] sm:$0xff]  ;;  %v7931_v52 = vld [vmem:[#allocation66_spill] sm:$0xff]  ;;  %v5728_v37 = vsub.f32 %v4979_v10, %v5408_v26 }
 0x23e   : > { %v5672_v36 = vsub.f32 %v7930_v58, %v5410_v42  ;;  %v2370_v45 = vadd.f32 %v2369_v40, %v2307_v6  ;;  %v5680_v51 = vsub.f32 %v7931_v52, %v5408_v26  ;;  %v2309_v58 = vmul.f32 %v5668_v63, %v5668_v63  ;;  %v7933_v52 = vld [vmem:[#allocation69_spill] sm:$0xff] }
 0x23f   : > { %v2402_v38 = vadd.f32 %v2401_v62, %v2338_v20  ;;  %v4187_v20 = vmov 0   ;;  %v5692_v43 = vsub.f32 %v7933_v52, %v5408_v26 }
 0x240   : > { %v2340_v40 = vmul.f32 %v5672_v36, %v5672_v36  ;;  %v2371_v62 = vadd.f32 %v2370_v45, %v2308_v34  ;;  %3944 = vset.pattern.permute.xlu0 %v4187_v20  ;;  %3943 = vset.pattern.permute.xlu2 %v4187_v20  ;;  %v2310_v63 = vmul.f32 %v5680_v51, %v5680_v51 }
 0x241   : > { %v2403_v6 = vadd.f32 %v2402_v38, %v2339_v30  ;;  %v2341_v45 = vmul.f32 %v5684_v14, %v5684_v14  ;;  %v7935_v30 = vld [vmem:[#allocation71_spill] sm:$0xff] }
 0x242   : > { %v2372_v7 = vadd.f32 %v2371_v62, %v2309_v58  ;;  %v5704_v58 = vsub.f32 %v7935_v30, %v5408_v26  ;;  %v2311_v62 = vmul.f32 %v5692_v43, %v5692_v43 }
 0x243   : > { %v2404_v21 = vadd.f32 %v2403_v6, %v2340_v40  ;;  %v5708_v40 = vsub.f32 %v4976_v9, %v5410_v42  ;;  %v2342_v6 = vmul.f32 %v5696_v44, %v5696_v44 }
 0x244   : > { %v2373_v38 = vadd.f32 %v2372_v7, %v2310_v63  ;;  %v5716_v7 = vsub.f32 %v4969_v1, %v5408_v26  ;;  %v2312_v9 = vmul.f32 %v5704_v58, %v5704_v58 }
 0x245   : > { %v2405_v34 = vadd.f32 %v2404_v21, %v2341_v45  ;;  %7936 = vst [vmem:[#allocation63_spill] sm:$0xff] %v5708_v40  ;;  %v5720_v21 = vsub.f32 %v4992_v32, %v5410_v42  ;;  %v2343_v63 = vmul.f32 %v5708_v40, %v5708_v40  ;;  %v5732_v45 = vsub.f32 %v4994_v39, %v5410_v42 }
 0x246   : > { %v2374_v20 = vadd.f32 %v2373_v38, %v2311_v62  ;;  %v5736_v32 = vsub.f32 %v5006_v5, %v5408_v26  ;;  %v2313_v30 = vmul.f32 %v5716_v7, %v5716_v7  ;;  %v5748_v39 = vsub.f32 %v5029_v59, %v5408_v26 }
 0x247   : > { %v2406_v52 = vadd.f32 %v2405_v34, %v2342_v6  ;;  %7937 = vst [vmem:[#allocation64_spill] sm:$0xff] %v5720_v21  ;;  %v5740_v34 = vsub.f32 %v5010_v18, %v5410_v42  ;;  %v2344_v10 = vmul.f32 %v5720_v21, %v5720_v21  ;;  %v5752_v62 = vsub.f32 %v5042_v28, %v5410_v42  ;;  %v7951_v21 = vld [vmem:[#allocation80_spill] sm:$0xff] }
 0x248   : > { %7938 = vst [vmem:[#allocation65_spill] sm:$0xff] %v5732_v45  ;;  %v2375_v1 = vadd.f32 %v2374_v20, %v2312_v9  ;;  %v2314_v5 = vmul.f32 %v5728_v37, %v5728_v37  ;;  %v2345_v18 = vmul.f32 %v5732_v45, %v5732_v45  ;;  %v5763_v59 = vsub.f32 %v5031_v2, %v5408_v26 }
 0x249   : > { %v2407_v38 = vadd.f32 %v2406_v52, %v2343_v63  ;;  %7939 = vst [vmem:[#allocation67_spill] sm:$0xff] %v5740_v34  ;;  %v2633_v52 = vld [vmem:[%s7527_s4] sm:$0xff]  ;;  %v5767_v28 = vsub.f32 %v5088_v57, %v5410_v42  ;;  %v2315_v9 = vmul.f32 %v5736_v32, %v5736_v32  ;;  %v2346_v63 = vmul.f32 %v5740_v34, %v5740_v34 }
 0x24a   : > { %7940 = vst [vmem:[#allocation66_spill] sm:$0xff] %v5752_v62  ;;  %v2376_v6 = vadd.f32 %v2375_v1, %v2313_v30  ;;  %2637 = vperm.xlu2 %3943, %v2633_v52   ;;  %v5775_v30 = vsub.f32 %v5056_v15, %v5408_v26  ;;  %v5779_v2 = vsub.f32 %v5090_v8, %v5410_v42 }
 0x24b   : > { %v2408_v20 = vadd.f32 %v2407_v38, %v2344_v10  ;;  %7941 = vst [vmem:[#allocation68_spill] sm:$0xff] %v5767_v28  ;;  %v2316_v57 = vmul.f32 %v5748_v39, %v5748_v39  ;;  %v2347_v10 = vmul.f32 %v5752_v62, %v5752_v62  ;;  %v2317_v15 = vmul.f32 %v5763_v59, %v5763_v59 }
 0x24c   : > { %v2377_v1 = vadd.f32 %v2376_v6, %v2314_v5  ;;  %7942 = vst [vmem:[#allocation69_spill] sm:$0xff] %v5779_v2  ;;  %v5787_v5 = vsub.f32 %v5127_v27, %v5410_v42  ;;  %v2348_v26 = vmul.f32 %v5767_v28, %v5767_v28  ;;  %v2349_v6 = vmul.f32 %v5779_v2, %v5779_v2 }
 0x24d   : > { %v2409_v38 = vadd.f32 %v2408_v20, %v2345_v18  ;;  %v2318_v20 = vmul.f32 %v5775_v30, %v5775_v30 }
 0x24e   : > { %v2378_v52 = vadd.f32 %v2377_v1, %v2315_v9  ;;  %7943 = vst [vmem:[#allocation70_spill] sm:$0xff] %v5787_v5  ;;  %v2350_v27 = vmul.f32 %v5787_v5, %v5787_v5 }
 0x24f   : > { %v2410_v45 = vadd.f32 %v2409_v38, %v2346_v63 }
 0x250   : > { %v2379_v8 = vadd.f32 %v2378_v52, %v2316_v57  ;;  %v2033_v57 = vpop.xlane.xlu2 %2032 }
 0x251   : > { %v2411_v18 = vadd.f32 %v2410_v45, %v2347_v10  ;;  %v2634_v45 = vld [vmem:[%s7527_s4 + $0x8] sm:$0xff]  ;;  %v2067_v10 = vmul.f32 0.00024414063, %v2033_v57 }
 0x252   : > { %v2380_v9 = vadd.f32 %v2379_v8, %v2317_v15 }
 0x253   : > { %v2412_v63 = vadd.f32 %v2411_v18, %v2348_v26  ;;  %v2069_v52 = vadd.f32 1e-05, %v2067_v10 }
 0x254   : > { %v2381_v42 = vadd.f32 %v2380_v9, %v2318_v20 }
 0x255   : > { %v2413_v1 = vadd.f32 %v2412_v63, %v2349_v6  ;;  %3945 = vrsqrt.f32 %v2069_v52  ;;  %vm2077_vm4 = vweird.f32 %v2069_v52 }
 0x256   : > { %2382 = vadd.xlane.f32.xlu0 %v2381_v42 }
 0x257   : > { %v2414_v38 = vadd.f32 %v2413_v1, %v2350_v27 }
 0x258   : > { %v2066_v2 = vpop.xlane.xlu2 %2065 }
 0x259   : > { %2415 = vadd.xlane.f32.xlu1 %v2414_v38  ;;  %v2068_v15 = vmul.f32 0.00024414063, %v2066_v2 }
 0x25b   : > { %v3946_v26 = vpop.eup %3945  ;;  %v2070_v8 = vadd.f32 1e-05, %v2068_v15 }
 0x25c   : > { %v2072_v18 = vmul.f32 %v3946_v26, %v2069_v52  ;;  %vm2078_vm3 = vweird.f32 %v3946_v26  ;;  %v7946_v52 = vld [vmem:[#allocation74_spill] sm:$0xff] }
 0x25d   : > { %3947 = vrsqrt.f32 %v2070_v8  ;;  %vm2079_vm5 = vmor %vm2077_vm4, %vm2078_vm3  ;;  %vm2087_vm6 = vweird.f32 %v2070_v8 }
 0x25e   : > { %v2073_v20 = vmul.f32 %v3946_v26, %v2072_v18 }
 0x260   : > { %v2074_v42 = vmul.f32 0.5, %v2073_v20 }
 0x263   : > { %v3948_v9 = vpop.eup %3947 }
 0x264   : > { %v2082_v1 = vmul.f32 %v3948_v9, %v2070_v8  ;;  %vm2088_vm7 = vweird.f32 %v3948_v9 }
 0x265   : > { %vm2089_vm8 = vmor %vm2087_vm6, %vm2088_vm7 }
 0x266   : > { %v2083_v57 = vmul.f32 %v3948_v9, %v2082_v1  ;;  %v7945_v1 = vld [vmem:[#allocation73_spill] sm:$0xff] }
 0x26a   : > { %2642 = vperm.xlu0 %3944, %v2634_v45   ;;  %v2075_v45 = vsub.f32 1.5, %v2074_v42 }
 0x26c   : > { %v2076_v2 = vmul.f32 %v3946_v26, %v2075_v45 }
 0x26e   : > { %v2080_v18 = vsel %vm2079_vm5, %v3946_v26, %v2076_v2  ;;  %v7948_v2 = vld [vmem:[#allocation76_spill] sm:$0xff] }
 0x26f   : > { %v5821_v45 = vmul.f32 %v2080_v18, %v7946_v52  ;;  %v5834_v40 = vmul.f32 %v2080_v18, %v7951_v21  ;;  %v5840_v52 = vmul.f32 %v2080_v18, %v5080_v24  ;;  %v5855_v21 = vmul.f32 %v2080_v18, %v5150_v35  ;;  %v7960_v35 = vld [vmem:[#allocation9_spill] sm:$0xff] }
 0x270   : > { %v5860_v24 = vmul.f32 %v2080_v18, %v5162_v13  ;;  %v7964_v13 = vld [vmem:[#allocation15_spill] sm:$0xff] }
 0x2c9   : > { %v2383_v5 = vpop.xlane.xlu0 %2382 }
 0x2ca   : > { %v2417_v6 = vmul.f32 0.00024414063, %v2383_v5  ;;  %v2084_v5 = vmul.f32 0.5, %v2083_v57  ;;  %v7947_v57 = vld [vmem:[#allocation75_spill] sm:$0xff] }
 0x2cb   : > { %v5824_v62 = vmul.f32 %v2080_v18, %v7947_v57  ;;  %v5843_v57 = vmul.f32 %v2080_v18, %v5098_v16  ;;  %7955 = vst [vmem:[#allocation75_spill] sm:$0xff] %v5855_v21  ;;  %v5863_v16 = vmul.f32 %v2080_v18, %v5174_v49  ;;  %v5875_v21 = vmul.f32 %v2080_v18, %v7960_v35  ;;  %v7972_v35 = vld [vmem:[#allocation23_spill] sm:$0xff] }
 0x2cc   : > { %v5802_v63 = vadd.f32 1e-05, %v2417_v6  ;;  %v2416_v27 = vpop.xlane.xlu1 %2415  ;;  %v2085_v20 = vsub.f32 1.5, %v2084_v5  ;;  %v5828_v5 = vmul.f32 %v2080_v18, %v7948_v2  ;;  %v5883_v49 = vmul.f32 %v2080_v18, %v7964_v13  ;;  %v7976_v13 = vld [vmem:[#allocation25_spill] sm:$0xff] }
 0x2cd   : > { %v2418_v38 = vmul.f32 0.00024414063, %v2416_v27  ;;  %v7944_v27 = vld [vmem:[#allocation72_spill] sm:$0xff] }
 0x2ce   : > { %3949 = vrsqrt.f32 %v5802_v63  ;;  %v5813_v28 = vmul.f32 %v2080_v18, %v7944_v27  ;;  %7949 = vst [vmem:[#allocation71_spill] sm:$0xff] %v5828_v5  ;;  %v7950_v27 = vld [vmem:[#allocation79_spill] sm:$0xff]  ;;  %v2086_v2 = vmul.f32 %v3948_v9, %v2085_v20  ;;  %v5849_v5 = vmul.f32 %v2080_v18, %v5123_v61 }
 0x2cf   : > { %v5805_v10 = vadd.f32 1e-05, %v2418_v38  ;;  %v5818_v38 = vmul.f32 %v2080_v18, %v7945_v1  ;;  %v5831_v34 = vmul.f32 %v2080_v18, %v7950_v27  ;;  %v5837_v1 = vmul.f32 %v2080_v18, %v5070_v46 }
 0x2d0   : > { %7953 = vst [vmem:[#allocation73_spill] sm:$0xff] %v5849_v5  ;;  %v5852_v27 = vmul.f32 %v2080_v18, %v5138_v29  ;;  %v5869_v20 = vmul.f32 %v2080_v18, %v5198_v48  ;;  %v7958_v29 = vld [vmem:[#allocation8_spill] sm:$0xff]  ;;  %v7962_v5 = vld [vmem:[#allocation10_spill] sm:$0xff]  ;;  %v7968_v48 = vld [vmem:[#allocation17_spill] sm:$0xff]  ;;  %vm2427_vm10 = vweird.f32 %v5802_v63 }
 0x2d1   : > { %3951 = vrsqrt.f32 %v5805_v10  ;;  %7961 = vst [vmem:[#allocation8_spill] sm:$0xff] %v5875_v21  ;;  %v5895_v21 = vmul.f32 %v2080_v18, %v7972_v35  ;;  %v7983_v35 = vld [vmem:[#allocation77_spill] sm:$0xff]  ;;  %vm2437_vm12 = vweird.f32 %v5805_v10 }
 0x2d2   : > { %7954 = vst [vmem:[#allocation74_spill] sm:$0xff] %v5852_v27  ;;  %v5872_v27 = vmul.f32 %v2080_v18, %v7958_v29  ;;  %v2090_v29 = vsel %vm2089_vm8, %v3948_v9, %v2086_v2  ;;  %v5911_v2 = vmul.f32 %v2080_v18, %v5354_v19  ;;  %v7993_v19 = vld [vmem:[#allocation84_spill] sm:$0xff] }
 0x2d3   : > { %7957 = vst [vmem:[#allocation79_spill] sm:$0xff] %v5869_v20  ;;  %v5889_v20 = vmul.f32 %v2080_v18, %v7968_v48  ;;  %v5908_v48 = vmul.f32 %v2080_v18, %v5342_v3  ;;  %v7991_v3 = vld [vmem:[#allocation83_spill] sm:$0xff] }
 0x2d4   : > { %v5807_v15 = vpop.eup %3949  ;;  %7959 = vst [vmem:[#allocation80_spill] sm:$0xff] %v5872_v27  ;;  %v7970_v27 = vld [vmem:[#allocation18_spill] sm:$0xff] }
 0x2d5   : > { %v2422_v6 = vmul.f32 %v5807_v15, %v5802_v63  ;;  %7965 = vst [vmem:[#allocation10_spill] sm:$0xff] %v5883_v49  ;;  %v5902_v49 = vmul.f32 %v2080_v18, %v7976_v13  ;;  %v7987_v13 = vld [vmem:[#allocation81_spill] sm:$0xff]  ;;  %vm2428_vm9 = vweird.f32 %v5807_v15 }
 0x2d6   : > { %7973 = vst [vmem:[#allocation18_spill] sm:$0xff] %v5895_v21  ;;  %vm2429_vm11 = vmor %vm2427_vm10, %vm2428_vm9  ;;  %v8092_v21 = vld [vmem:[#allocation58_spill] sm:$0xff] }
 0x2d7   : > { %v5815_v42 = vpop.eup %3951  ;;  %v2423_v26 = vmul.f32 %v5807_v15, %v2422_v6  ;;  %v5846_v6 = vmul.f32 %v2080_v18, %v5111_v11  ;;  %v5866_v11 = vmul.f32 %v2080_v18, %v5186_v0  ;;  %v7966_v0 = vld [vmem:[#allocation16_spill] sm:$0xff]  ;;  %7981 = vst [vmem:[#allocation90_spill] sm:$0xff] %v5911_v2  ;;  %v5932_v2 = vmul.f32 %v2090_v29, %v7993_v19  ;;  %v8005_v19 = vld [vmem:[#allocation2_spill] sm:$0xff] }
 0x2d8   : > { %v2432_v46 = vmul.f32 %v5815_v42, %v5805_v10  ;;  %7969 = vst [vmem:[#allocation16_spill] sm:$0xff] %v5889_v20  ;;  %vm2438_vm13 = vweird.f32 %v5815_v42  ;;  %v8096_v20 = vld [vmem:[#allocation64_spill] sm:$0xff] }
 0x2d9   : > { %7952 = vst [vmem:[#allocation72_spill] sm:$0xff] %v5846_v6  ;;  %v2424_v61 = vmul.f32 0.5, %v2423_v26  ;;  %v5878_v6 = vmul.f32 %v2080_v18, %v7962_v5  ;;  %v5886_v26 = vmul.f32 %v2080_v18, %v7966_v0  ;;  %v7974_v5 = vld [vmem:[#allocation24_spill] sm:$0xff]  ;;  %v7978_v0 = vld [vmem:[#allocation26_spill] sm:$0xff]  ;;  %vm2439_vm14 = vmor %vm2437_vm12, %vm2438_vm13 }
 0x2da   : > { %7956 = vst [vmem:[#allocation76_spill] sm:$0xff] %v5866_v11  ;;  %v5892_v11 = vmul.f32 %v2080_v18, %v7970_v27  ;;  %v2433_v8 = vmul.f32 %v5815_v42, %v2432_v46  ;;  %v5914_v27 = vmul.f32 %v2080_v18, %v5366_v53  ;;  %v7985_v46 = vld [vmem:[#allocation78_spill] sm:$0xff]  ;;  %v7995_v53 = vld [vmem:[#allocation85_spill] sm:$0xff] }
 0x2db   : > { %7963 = vst [vmem:[#allocation9_spill] sm:$0xff] %v5878_v6  ;;  %v5898_v6 = vmul.f32 %v2080_v18, %v7974_v5  ;;  %v2425_v9 = vsub.f32 1.5, %v2424_v61  ;;  %v5917_v5 = vmul.f32 %v2090_v29, %v7983_v35  ;;  %v5929_v61 = vmul.f32 %v2090_v29, %v7991_v3  ;;  %v7997_v35 = vld [vmem:[#allocation86_spill] sm:$0xff] }
 0x2dc   : > { %7967 = vst [vmem:[#allocation15_spill] sm:$0xff] %v5886_v26  ;;  %v5905_v26 = vmul.f32 %v2080_v18, %v7978_v0  ;;  %v7989_v0 = vld [vmem:[#allocation82_spill] sm:$0xff]  ;;  %v5935_v18 = vmul.f32 %v2090_v29, %v7995_v53  ;;  %v5952_v53 = vmul.f32 %v2090_v29, %v8005_v19  ;;  %v8019_v19 = vld [vmem:[#allocation12_spill] sm:$0xff] }
 0x2dd   : > { %7971 = vst [vmem:[#allocation17_spill] sm:$0xff] %v5892_v11  ;;  %v2426_v3 = vmul.f32 %v5807_v15, %v2425_v9  ;;  %v8017_v9 = vld [vmem:[#allocation11_spill] sm:$0xff]  ;;  %v8094_v11 = vld [vmem:[#allocation60_spill] sm:$0xff] }
 0x2de   : > { %7975 = vst [vmem:[#allocation23_spill] sm:$0xff] %v5898_v6  ;;  %v5920_v6 = vmul.f32 %v2090_v29, %v7985_v46  ;;  %v7999_v46 = vld [vmem:[#allocation87_spill] sm:$0xff] }
 0x2df   : > { %7977 = vst [vmem:[#allocation24_spill] sm:$0xff] %v5902_v49  ;;  %v5923_v49 = vmul.f32 %v2090_v29, %v7987_v13  ;;  %v2434_v13 = vmul.f32 0.5, %v2433_v8  ;;  %v8011_v8 = vld [vmem:[#allocation4_spill] sm:$0xff]  ;;  %v2430_v63 = vsel %vm2429_vm11, %v5807_v15, %v2426_v3  ;;  %v8045_v3 = vld [vmem:[#allocation34_spill] sm:$0xff] }
 0x2e0   : > { %7979 = vst [vmem:[#allocation25_spill] sm:$0xff] %v5905_v26  ;;  %v5926_v26 = vmul.f32 %v2090_v29, %v7989_v0  ;;  %v8003_v0 = vld [vmem:[#allocation89_spill] sm:$0xff]  ;;  %v6097_v10 = vmul.f32 %v2430_v63, %v5716_v7 }
 0x2e1   : > { %7980 = vst [vmem:[#allocation26_spill] sm:$0xff] %v5908_v48  ;;  %v8087_v48 = vld [vmem:[#allocation52_spill] sm:$0xff] }
 0x2e2   : > { %7982 = vst [vmem:[#allocation91_spill] sm:$0xff] %v5914_v27 }
 0x2e3   : > { %7984 = vst [vmem:[#allocation77_spill] sm:$0xff] %v5917_v5  ;;  %v5938_v5 = vmul.f32 %v2090_v29, %v7997_v35 }
 0x2e4   : > { %7986 = vst [vmem:[#allocation78_spill] sm:$0xff] %v5920_v6  ;;  %v5941_v6 = vmul.f32 %v2090_v29, %v7999_v46 }
 0x2e5   : > { %7988 = vst [vmem:[#allocation81_spill] sm:$0xff] %v5923_v49  ;;  %v8001_v49 = vld [vmem:[#allocation88_spill] sm:$0xff] }
 0x2e6   : > { %7990 = vst [vmem:[#allocation82_spill] sm:$0xff] %v5926_v26  ;;  %v5944_v27 = vmul.f32 %v2090_v29, %v8001_v49  ;;  %v5947_v26 = vmul.f32 %v2090_v29, %v8003_v0  ;;  %v8013_v49 = vld [vmem:[#allocation5_spill] sm:$0xff]  ;;  %v8015_v0 = vld [vmem:[#allocation6_spill] sm:$0xff] }
 0x2e7   : > { %7992 = vst [vmem:[#allocation83_spill] sm:$0xff] %v5929_v61 }
 0x2e8   : > { %7994 = vst [vmem:[#allocation84_spill] sm:$0xff] %v5932_v2  ;;  %v5970_v2 = vmul.f32 %v2090_v29, %v8017_v9  ;;  %v8029_v9 = vld [vmem:[#allocation21_spill] sm:$0xff] }
 0x2e9   : > { %7996 = vst [vmem:[#allocation85_spill] sm:$0xff] %v5935_v18  ;;  %v8007_v18 = vld [vmem:[#allocation7_spill] sm:$0xff] }
 0x2ea   : > { %7998 = vst [vmem:[#allocation86_spill] sm:$0xff] %v5938_v5  ;;  %v5955_v35 = vmul.f32 %v2090_v29, %v8007_v18  ;;  %v8009_v5 = vld [vmem:[#allocation3_spill] sm:$0xff]  ;;  %v5974_v18 = vmul.f32 %v2090_v29, %v8019_v19  ;;  %v8031_v19 = vld [vmem:[#allocation22_spill] sm:$0xff] }
 0x2eb   : > { %8000 = vst [vmem:[#allocation87_spill] sm:$0xff] %v5941_v6  ;;  %v5958_v46 = vmul.f32 %v2090_v29, %v8009_v5  ;;  %v5961_v6 = vmul.f32 %v2090_v29, %v8011_v8 }
 0x2ec   : > { %8002 = vst [vmem:[#allocation88_spill] sm:$0xff] %v5944_v27  ;;  %v5964_v27 = vmul.f32 %v2090_v29, %v8013_v49  ;;  %v2435_v49 = vsub.f32 1.5, %v2434_v13  ;;  %v8037_v13 = vld [vmem:[#allocation32_spill] sm:$0xff] }
 0x2ed   : > { %8004 = vst [vmem:[#allocation89_spill] sm:$0xff] %v5947_v26  ;;  %v5967_v26 = vmul.f32 %v2090_v29, %v8015_v0  ;;  %v8027_v0 = vld [vmem:[#allocation20_spill] sm:$0xff] }
 0x2ee   : > { %8006 = vst [vmem:[#allocation2_spill] sm:$0xff] %v5952_v53  ;;  %v8077_v53 = vld [vmem:[#allocation40_spill] sm:$0xff] }
 0x2ef   : > { %8008 = vst [vmem:[#allocation7_spill] sm:$0xff] %v5955_v35  ;;  %v8021_v35 = vld [vmem:[#allocation13_spill] sm:$0xff] }
 0x2f0   : > { %8010 = vst [vmem:[#allocation3_spill] sm:$0xff] %v5958_v46  ;;  %v5977_v5 = vmul.f32 %v2090_v29, %v8021_v35  ;;  %v8023_v46 = vld [vmem:[#allocation14_spill] sm:$0xff]  ;;  %v8033_v35 = vld [vmem:[#allocation31_spill] sm:$0xff] }
 0x2f1   : > { %8012 = vst [vmem:[#allocation4_spill] sm:$0xff] %v5961_v6  ;;  %v5980_v8 = vmul.f32 %v2090_v29, %v8023_v46  ;;  %v8035_v46 = vld [vmem:[#allocation27_spill] sm:$0xff] }
 0x2f2   : > { %8014 = vst [vmem:[#allocation5_spill] sm:$0xff] %v5964_v27  ;;  %v8025_v27 = vld [vmem:[#allocation19_spill] sm:$0xff] }
 0x2f3   : > { %8016 = vst [vmem:[#allocation6_spill] sm:$0xff] %v5967_v26  ;;  %v5983_v6 = vmul.f32 %v2090_v29, %v8025_v27  ;;  %v5986_v26 = vmul.f32 %v2090_v29, %v8027_v0  ;;  %v6002_v27 = vmul.f32 %v2090_v29, %v8037_v13  ;;  %v8048_v13 = vld [vmem:[#allocation35_spill] sm:$0xff] }
 0x2f4   : > { %8018 = vst [vmem:[#allocation11_spill] sm:$0xff] %v5970_v2  ;;  %v5989_v2 = vmul.f32 %v2090_v29, %v8029_v9 }
 0x2f5   : > { %8020 = vst [vmem:[#allocation12_spill] sm:$0xff] %v5974_v18  ;;  %v5993_v18 = vmul.f32 %v2090_v29, %v8031_v19  ;;  %v6014_v19 = vmul.f32 %v2090_v29, %v8045_v3  ;;  %v8051_v3 = vld [vmem:[#allocation42_spill] sm:$0xff] }
 0x2f6   : > { %8022 = vst [vmem:[#allocation13_spill] sm:$0xff] %v5977_v5  ;;  %v5996_v5 = vmul.f32 %v2090_v29, %v8033_v35  ;;  %v8047_v35 = vld [vmem:[#allocation30_spill] sm:$0xff] }
 0x2f7   : > { %8024 = vst [vmem:[#allocation14_spill] sm:$0xff] %v5980_v8  ;;  %v5999_v8 = vmul.f32 %v2090_v29, %v8035_v46  ;;  %v2436_v46 = vmul.f32 %v5815_v42, %v2435_v49  ;;  %v6035_v49 = vmul.f32 %v2430_v63, %v5490_v55  ;;  %v6056_v55 = vmul.f32 %v2430_v63, %v5574_v54  ;;  %v8057_v54 = vld [vmem:[#allocation62_spill] sm:$0xff] }
 0x2f8   : > { %8026 = vst [vmem:[#allocation19_spill] sm:$0xff] %v5983_v6  ;;  %v8039_v6 = vld [vmem:[#allocation28_spill] sm:$0xff] }
 0x2f9   : > { %8028 = vst [vmem:[#allocation20_spill] sm:$0xff] %v5986_v26  ;;  %v6005_v0 = vmul.f32 %v2090_v29, %v8039_v6  ;;  %v8041_v26 = vld [vmem:[#allocation33_spill] sm:$0xff]  ;;  %v2442_v6 = vmul.f32 %v2430_v63, %v8048_v13  ;;  %v6047_v13 = vmul.f32 %v2430_v63, %v5538_v4  ;;  %v6068_v4 = vmul.f32 %v2430_v63, %v5620_v41 }
 0x2fa   : > { %8030 = vst [vmem:[#allocation21_spill] sm:$0xff] %v5989_v2  ;;  %v6008_v9 = vmul.f32 %v2090_v29, %v8041_v26  ;;  %v8043_v2 = vld [vmem:[#allocation29_spill] sm:$0xff]  ;;  %v6023_v26 = vmul.f32 %v2430_v63, %v5446_v50  ;;  %v6044_v50 = vmul.f32 %v2430_v63, %v5526_v33  ;;  %v6065_v33 = vmul.f32 %v2430_v63, %v5610_v25 }
 0x2fb   : > { %8032 = vst [vmem:[#allocation22_spill] sm:$0xff] %v5993_v18  ;;  %v6011_v15 = vmul.f32 %v2090_v29, %v8043_v2  ;;  %v8050_v2 = vld [vmem:[#allocation43_spill] sm:$0xff]  ;;  %v6029_v29 = vmul.f32 %v2430_v63, %v5466_v56  ;;  %v6087_v41 = vmul.f32 %v2430_v63, %v5680_v51  ;;  %v6106_v51 = vmul.f32 %v2430_v63, %v5748_v39  ;;  %v8075_v39 = vld [vmem:[#allocation37_spill] sm:$0xff] }
 0x2fc   : > { %8034 = vst [vmem:[#allocation31_spill] sm:$0xff] %v5996_v5  ;;  %v2441_v5 = vmul.f32 %v2430_v63, %v8047_v35  ;;  %v6032_v35 = vmul.f32 %v2430_v63, %v8051_v3  ;;  %v8052_v56 = vld [vmem:[#allocation51_spill] sm:$0xff]  ;;  %v6053_v3 = vmul.f32 %v2430_v63, %v5562_v47  ;;  %v6074_v47 = vmul.f32 %v2430_v63, %v5644_v12 }
 0x2fd   : > { %8036 = vst [vmem:[#allocation27_spill] sm:$0xff] %v5999_v8  ;;  %v6094_v12 = vmul.f32 %v2430_v63, %v5704_v58  ;;  %v8070_v58 = vld [vmem:[#allocation36_spill] sm:$0xff]  ;;  %v8076_v18 = vld [vmem:[#allocation39_spill] sm:$0xff] }
 0x2fe   : > { %8038 = vst [vmem:[#allocation32_spill] sm:$0xff] %v6002_v27  ;;  %v6118_v7 = vadd.f32 %v2441_v5, %v5813_v28  ;;  %v8081_v28 = vld [vmem:[#allocation46_spill] sm:$0xff] }
 0x2ff   : > { %8040 = vst [vmem:[#allocation28_spill] sm:$0xff] %v6005_v0  ;;  %v8049_v0 = vld [vmem:[#allocation38_spill] sm:$0xff] }
 0x300   : > { %8042 = vst [vmem:[#allocation33_spill] sm:$0xff] %v6008_v9  ;;  %v2443_v27 = vmul.f32 %v2430_v63, %v8049_v0  ;;  %v6041_v0 = vmul.f32 %v2430_v63, %v5514_v17  ;;  %v6062_v17 = vmul.f32 %v2430_v63, %v5594_v60  ;;  %v6081_v60 = vmul.f32 %v2430_v63, %v8057_v54 }
 0x301   : > { %8044 = vst [vmem:[#allocation29_spill] sm:$0xff] %v6011_v15  ;;  %v6026_v15 = vmul.f32 %v2430_v63, %v8050_v2  ;;  %v6050_v2 = vmul.f32 %v2430_v63, %v8052_v56  ;;  %v6071_v56 = vmul.f32 %v2430_v63, %v5632_v22  ;;  %v2440_v22 = vsel %vm2439_vm14, %v5815_v42, %v2436_v46 }
 0x302   : > { %8046 = vst [vmem:[#allocation34_spill] sm:$0xff] %v6014_v19  ;;  %v6038_v19 = vmul.f32 %v2430_v63, %v5502_v23  ;;  %v6059_v23 = vmul.f32 %v2430_v63, %v5586_v31  ;;  %v8059_v31 = vld [vmem:[#allocation61_spill] sm:$0xff]  ;;  %v6091_v9 = vmul.f32 %v2430_v63, %v5692_v43  ;;  %v6100_v54 = vmul.f32 %v2430_v63, %v5728_v37 }
 0x303   : > { %8053 = vst [vmem:[#allocation30_spill] sm:$0xff] %v6065_v33  ;;  %v6084_v25 = vmul.f32 %v2430_v63, %v8059_v31  ;;  %v6103_v31 = vmul.f32 %v2430_v63, %v5736_v32  ;;  %v6109_v42 = vmul.f32 %v2430_v63, %v5763_v59  ;;  %v6112_v43 = vmul.f32 %v2430_v63, %v5775_v30  ;;  %v8078_v30 = vld [vmem:[#allocation44_spill] sm:$0xff]  ;;  %v8102_v33 = vld [vmem:[#allocation70_spill] sm:$0xff] }
 0x304   : > { %8054 = vst [vmem:[#allocation35_spill] sm:$0xff] %v6068_v4  ;;  %v6115_v46 = vmul.f32 %v2440_v22, %v8070_v58  ;;  %v6121_v37 = vadd.f32 %v2442_v6, %v5818_v38  ;;  %v6124_v32 = vadd.f32 %v2443_v27, %v5821_v45  ;;  %v2474_v8 = vmul.f32 %v2440_v22, %v8075_v39  ;;  %v8083_v6 = vld [vmem:[#allocation48_spill] sm:$0xff]  ;;  %v8084_v45 = vld [vmem:[#allocation50_spill] sm:$0xff]  ;;  %v8101_v4 = vld [vmem:[#allocation69_spill] sm:$0xff] }
 0x305   : > { %8055 = vst [vmem:[#allocation38_spill] sm:$0xff] %v6071_v56  ;;  %v2475_v59 = vmul.f32 %v2440_v22, %v8076_v18  ;;  %v2476_v61 = vmul.f32 %v2440_v22, %v8077_v53  ;;  %v2477_v63 = vmul.f32 %v2440_v22, %v8078_v30  ;;  %v2480_v5 = vmul.f32 %v2440_v22, %v8081_v28  ;;  %v8100_v56 = vld [vmem:[#allocation68_spill] sm:$0xff] }
 0x306   : > { %8056 = vst [vmem:[#allocation43_spill] sm:$0xff] %v6074_v47  ;;  %v2483_v27 = vmul.f32 %v2440_v22, %v8084_v45  ;;  %v2486_v53 = vmul.f32 %v2440_v22, %v8087_v48  ;;  %v2493_v45 = vmul.f32 %v2440_v22, %v8094_v11  ;;  %v2496_v48 = vmul.f32 %v2440_v22, %v5696_v44  ;;  %v8099_v47 = vld [vmem:[#allocation66_spill] sm:$0xff]  ;;  %v8103_v44 = vld [vmem:[#allocation71_spill] sm:$0xff] }
 0x307   : > { %8058 = vst [vmem:[#allocation42_spill] sm:$0xff] %v6081_v60  ;;  %v8098_v60 = vld [vmem:[#allocation67_spill] sm:$0xff]  ;;  %v2503_v11 = vmul.f32 %v2440_v22, %v8101_v4  ;;  %v6175_v4 = vadd.f32 %v6035_v49, %v5837_v1 }
 0x308   : > { %8060 = vst [vmem:[#allocation51_spill] sm:$0xff] %v6084_v25  ;;  %v8097_v25 = vld [vmem:[#allocation65_spill] sm:$0xff]  ;;  %v8109_v49 = vld [vmem:[#allocation75_spill] sm:$0xff] }
 0x309   : > { %8061 = vst [vmem:[#allocation62_spill] sm:$0xff] %v6087_v41  ;;  %v8095_v41 = vld [vmem:[#allocation63_spill] sm:$0xff] }
 0x30a   : > { %8062 = vst [vmem:[#allocation61_spill] sm:$0xff] %v6091_v9  ;;  %v8093_v9 = vld [vmem:[#allocation59_spill] sm:$0xff] }
 0x30b   : > { %8063 = vst [vmem:[#allocation92_spill] sm:$0xff] %v6094_v12  ;;  %v8091_v12 = vld [vmem:[#allocation57_spill] sm:$0xff] }
 0x30c   : > { %8064 = vst [vmem:[#allocation93_spill] sm:$0xff] %v6097_v10  ;;  %v8090_v10 = vld [vmem:[#allocation56_spill] sm:$0xff]  ;;  %v2490_v28 = vmul.f32 %v2440_v22, %v8091_v12  ;;  %v2500_v12 = vmul.f32 %v2440_v22, %v8098_v60  ;;  %v8118_v60 = vld [vmem:[#allocation35_spill] sm:$0xff] }
 0x30d   : > { %8065 = vst [vmem:[#allocation94_spill] sm:$0xff] %v6100_v54  ;;  %v8089_v54 = vld [vmem:[#allocation54_spill] sm:$0xff] }
 0x30e   : > { %8066 = vst [vmem:[#allocation95_spill] sm:$0xff] %v6103_v31  ;;  %v8088_v31 = vld [vmem:[#allocation55_spill] sm:$0xff] }
 0x30f   : > { %8067 = vst [vmem:[#allocation96_spill] sm:$0xff] %v6106_v51  ;;  %v8086_v51 = vld [vmem:[#allocation53_spill] sm:$0xff]  ;;  %v2487_v30 = vmul.f32 %v2440_v22, %v8088_v31  ;;  %v2497_v31 = vmul.f32 %v2440_v22, %v8095_v41  ;;  %v6163_v41 = vadd.f32 %v6026_v15, %v8103_v44  ;;  %v6183_v15 = vadd.f32 %v6041_v0, %v5843_v57  ;;  %v8113_v0 = vld [vmem:[#allocation76_spill] sm:$0xff]  ;;  %v8124_v44 = vld [vmem:[#allocation43_spill] sm:$0xff] }
 0x310   : > { %8068 = vst [vmem:[#allocation97_spill] sm:$0xff] %v6109_v42  ;;  %v2485_v18 = vmul.f32 %v2440_v22, %v8086_v51  ;;  %v2495_v51 = vmul.f32 %v2440_v22, %v5684_v14  ;;  %v6159_v14 = vadd.f32 %v6023_v26, %v5824_v62  ;;  %v6179_v62 = vadd.f32 %v6038_v19, %v5840_v52  ;;  %v8104_v26 = vld [vmem:[#allocation72_spill] sm:$0xff] }
 0x311   : > { %8069 = vst [vmem:[#allocation98_spill] sm:$0xff] %v6112_v43  ;;  %v8079_v43 = vld [vmem:[#allocation41_spill] sm:$0xff]  ;;  %v6199_v52 = vadd.f32 %v6053_v3, %v8109_v49  ;;  %v6203_v57 = vadd.f32 %v6056_v55, %v5860_v24  ;;  %v6207_v19 = vadd.f32 %v6059_v23, %v5863_v16  ;;  %v8126_v23 = vld [vmem:[#allocation10_spill] sm:$0xff] }
 0x312   : > { %8071 = vst [vmem:[#allocation36_spill] sm:$0xff] %v6115_v46  ;;  %v2478_v58 = vmul.f32 %v2440_v22, %v8079_v43  ;;  %v8080_v46 = vld [vmem:[#allocation45_spill] sm:$0xff]  ;;  %v2488_v43 = vmul.f32 %v2440_v22, %v8089_v54  ;;  %v2498_v54 = vmul.f32 %v2440_v22, %v8096_v20  ;;  %v6167_v20 = vadd.f32 %v6029_v29, %v5831_v34 }
 0x313   : > { %8072 = vst [vmem:[#allocation99_spill] sm:$0xff] %v6118_v7  ;;  %v2479_v42 = vmul.f32 %v2440_v22, %v8080_v46  ;;  %v8082_v7 = vld [vmem:[#allocation47_spill] sm:$0xff]  ;;  %v2489_v46 = vmul.f32 %v2440_v22, %v8090_v10  ;;  %v2499_v10 = vmul.f32 %v2440_v22, %v8097_v25  ;;  %v6187_v34 = vadd.f32 %v6044_v50, %v8104_v26  ;;  %v8105_v29 = vld [vmem:[#allocation73_spill] sm:$0xff]  ;;  %v8120_v25 = vld [vmem:[#allocation8_spill] sm:$0xff] }
 0x314   : > { %8073 = vst [vmem:[#allocation100_spill] sm:$0xff] %v6121_v37  ;;  %v2481_v38 = vmul.f32 %v2440_v22, %v8082_v7  ;;  %v2482_v37 = vmul.f32 %v2440_v22, %v8083_v6  ;;  %v2491_v7 = vmul.f32 %v2440_v22, %v8092_v21  ;;  %v2492_v6 = vmul.f32 %v2440_v22, %v8093_v9  ;;  %v8123_v55 = vld [vmem:[#allocation9_spill] sm:$0xff]  ;;  %v8127_v26 = vld [vmem:[#allocation42_spill] sm:$0xff] }
 0x315   : > { %8074 = vst [vmem:[#allocation101_spill] sm:$0xff] %v6124_v32  ;;  %v8085_v32 = vld [vmem:[#allocation49_spill] sm:$0xff]  ;;  %v2501_v21 = vmul.f32 %v2440_v22, %v8099_v47  ;;  %v2502_v9 = vmul.f32 %v2440_v22, %v8100_v56  ;;  %v6171_v47 = vadd.f32 %v6032_v35, %v5834_v40  ;;  %v6191_v40 = vadd.f32 %v6047_v13, %v8105_v29  ;;  %v8107_v35 = vld [vmem:[#allocation74_spill] sm:$0xff]  ;;  %v8115_v13 = vld [vmem:[#allocation79_spill] sm:$0xff] }
 0x316   : > { %v2484_v39 = vmul.f32 %v2440_v22, %v8085_v32  ;;  %v2494_v32 = vmul.f32 %v2440_v22, %v5672_v36  ;;  %v2504_v36 = vmul.f32 %v2440_v22, %v8102_v33  ;;  %v6195_v1 = vadd.f32 %v6050_v2, %v8107_v35  ;;  %8110 = vst [vmem:[#allocation40_spill] sm:$0xff] %v6199_v52  ;;  %v8116_v33 = vld [vmem:[#allocation30_spill] sm:$0xff]  ;;  %v8117_v56 = vld [vmem:[#allocation80_spill] sm:$0xff]  ;;  %v8129_v29 = vld [vmem:[#allocation15_spill] sm:$0xff] }
 0x317   : > { %8106 = vst [vmem:[#allocation37_spill] sm:$0xff] %v6191_v40  ;;  %v6211_v50 = vadd.f32 %v6062_v17, %v8113_v0  ;;  %v6215_v2 = vadd.f32 %v8116_v33, %v8115_v13  ;;  %v6219_v3 = vadd.f32 %v8118_v60, %v8117_v56  ;;  %v8121_v22 = vld [vmem:[#allocation38_spill] sm:$0xff]  ;;  %v6227_v16 = vadd.f32 %v8124_v44, %v8123_v55  ;;  %v8130_v35 = vld [vmem:[#allocation51_spill] sm:$0xff]  ;;  %v8132_v0 = vld [vmem:[#allocation16_spill] sm:$0xff] }
 0x318   : > { %8108 = vst [vmem:[#allocation39_spill] sm:$0xff] %v6195_v1  ;;  %v6223_v24 = vadd.f32 %v8121_v22, %v8120_v25  ;;  %v6231_v17 = vadd.f32 %v8127_v26, %v8126_v23  ;;  %v6235_v49 = vadd.f32 %v8130_v35, %v8129_v29  ;;  %v8133_v13 = vld [vmem:[#allocation62_spill] sm:$0xff]  ;;  %v8135_v56 = vld [vmem:[#allocation17_spill] sm:$0xff]  ;;  %v8141_v44 = vld [vmem:[#allocation23_spill] sm:$0xff] }
 0x319   : > { %8111 = vst [vmem:[#allocation44_spill] sm:$0xff] %v6203_v57  ;;  %v6239_v33 = vadd.f32 %v8133_v13, %v8132_v0  ;;  %v8136_v60 = vld [vmem:[#allocation61_spill] sm:$0xff]  ;;  %v8138_v22 = vld [vmem:[#allocation18_spill] sm:$0xff]  ;;  %v8144_v26 = vld [vmem:[#allocation24_spill] sm:$0xff] }
 0x31a   : > { %8112 = vst [vmem:[#allocation41_spill] sm:$0xff] %v6207_v19  ;;  %v6243_v25 = vadd.f32 %v8136_v60, %v8135_v56  ;;  %v8147_v35 = vld [vmem:[#allocation25_spill] sm:$0xff]  ;;  %v8149_v13 = vld [vmem:[#allocation26_spill] sm:$0xff] }
 0x31b   : > { %8114 = vst [vmem:[#allocation45_spill] sm:$0xff] %v6211_v50  ;;  %v8152_v60 = vld [vmem:[#allocation90_spill] sm:$0xff] }
 0x31c   : > { %8119 = vst [vmem:[#allocation46_spill] sm:$0xff] %v6219_v3 }
 0x31d   : > { %8122 = vst [vmem:[#allocation47_spill] sm:$0xff] %v6223_v24  ;;  %v8139_v24 = vld [vmem:[#allocation92_spill] sm:$0xff] }
 0x31e   : > { %8125 = vst [vmem:[#allocation48_spill] sm:$0xff] %v6227_v16  ;;  %v6247_v55 = vadd.f32 %v8139_v24, %v8138_v22  ;;  %v8142_v16 = vld [vmem:[#allocation93_spill] sm:$0xff]  ;;  %v8155_v22 = vld [vmem:[#allocation91_spill] sm:$0xff] }
 0x31f   : > { %8128 = vst [vmem:[#allocation50_spill] sm:$0xff] %v6231_v17  ;;  %v6251_v23 = vadd.f32 %v8142_v16, %v8141_v44  ;;  %v8145_v17 = vld [vmem:[#allocation94_spill] sm:$0xff]  ;;  %v8158_v44 = vld [vmem:[#allocation77_spill] sm:$0xff] }
 0x320   : > { %8131 = vst [vmem:[#allocation49_spill] sm:$0xff] %v6235_v49  ;;  %v6255_v29 = vadd.f32 %v8145_v17, %v8144_v26  ;;  %v8148_v49 = vld [vmem:[#allocation95_spill] sm:$0xff]  ;;  %v8160_v26 = vld [vmem:[#allocation78_spill] sm:$0xff] }
 0x321   : > { %8134 = vst [vmem:[#allocation53_spill] sm:$0xff] %v6239_v33  ;;  %v6259_v0 = vadd.f32 %v8148_v49, %v8147_v35  ;;  %v8150_v33 = vld [vmem:[#allocation96_spill] sm:$0xff]  ;;  %v8161_v49 = vld [vmem:[#allocation81_spill] sm:$0xff] }
 0x322   : > { %8137 = vst [vmem:[#allocation52_spill] sm:$0xff] %v6243_v25  ;;  %v6263_v56 = vadd.f32 %v8150_v33, %v8149_v13  ;;  %v8153_v25 = vld [vmem:[#allocation97_spill] sm:$0xff]  ;;  %v6281_v35 = vadd.f32 %v2475_v59, %v8161_v49  ;;  %v8162_v33 = vld [vmem:[#allocation82_spill] sm:$0xff]  ;;  %v8168_v59 = vld [vmem:[#allocation88_spill] sm:$0xff] }
 0x323   : > { %8140 = vst [vmem:[#allocation55_spill] sm:$0xff] %v6247_v55  ;;  %v6267_v24 = vadd.f32 %v8153_v25, %v8152_v60  ;;  %v8156_v55 = vld [vmem:[#allocation98_spill] sm:$0xff]  ;;  %v6284_v13 = vadd.f32 %v2476_v61, %v8162_v33  ;;  %v8164_v60 = vld [vmem:[#allocation84_spill] sm:$0xff]  ;;  %v6302_v49 = vadd.f32 %v2482_v37, %v8168_v59  ;;  %v8169_v61 = vld [vmem:[#allocation89_spill] sm:$0xff] }
 0x324   : > { %8143 = vst [vmem:[#allocation54_spill] sm:$0xff] %v6251_v23  ;;  %v6271_v16 = vadd.f32 %v8156_v55, %v8155_v22  ;;  %v8159_v23 = vld [vmem:[#allocation36_spill] sm:$0xff]  ;;  %v8165_v55 = vld [vmem:[#allocation85_spill] sm:$0xff]  ;;  %v6305_v33 = vadd.f32 %v2483_v27, %v8169_v61  ;;  %v8177_v37 = vld [vmem:[#allocation6_spill] sm:$0xff] }
 0x325   : > { %8146 = vst [vmem:[#allocation56_spill] sm:$0xff] %v6255_v29  ;;  %v6275_v17 = vadd.f32 %v8159_v23, %v8158_v44  ;;  %v6278_v29 = vadd.f32 %v2474_v8, %v8160_v26  ;;  %v6293_v22 = vadd.f32 %v2479_v42, %v8165_v55  ;;  %v8166_v23 = vld [vmem:[#allocation86_spill] sm:$0xff]  ;;  %v8167_v8 = vld [vmem:[#allocation87_spill] sm:$0xff]  ;;  %v6323_v59 = vadd.f32 %v2489_v46, %v8177_v37  ;;  %v8185_v46 = vld [vmem:[#allocation21_spill] sm:$0xff] }
 0x326   : > { %8151 = vst [vmem:[#allocation57_spill] sm:$0xff] %v6263_v56  ;;  %v8163_v56 = vld [vmem:[#allocation83_spill] sm:$0xff]  ;;  %v6296_v44 = vadd.f32 %v2480_v5, %v8166_v23  ;;  %v6299_v26 = vadd.f32 %v2481_v38, %v8167_v8  ;;  %v8174_v5 = vld [vmem:[#allocation4_spill] sm:$0xff]  ;;  %v8175_v38 = vld [vmem:[#allocation5_spill] sm:$0xff]  ;;  %v6344_v37 = vadd.f32 %v2496_v48, %v8185_v46 }
 0x327   : > { %8154 = vst [vmem:[#allocation58_spill] sm:$0xff] %v6267_v24  ;;  %v6287_v25 = vadd.f32 %v2477_v63, %v8163_v56  ;;  %v6290_v24 = vadd.f32 %v2478_v58, %v8164_v60  ;;  %v8170_v63 = vld [vmem:[#allocation2_spill] sm:$0xff]  ;;  %v8172_v58 = vld [vmem:[#allocation7_spill] sm:$0xff]  ;;  %v6317_v23 = vadd.f32 %v2487_v30, %v8174_v5  ;;  %v6320_v8 = vadd.f32 %v2488_v43, %v8175_v38  ;;  %v8184_v43 = vld [vmem:[#allocation20_spill] sm:$0xff] }
 0x328   : > { %8157 = vst [vmem:[#allocation59_spill] sm:$0xff] %v6271_v16  ;;  %v6308_v56 = vadd.f32 %v2484_v39, %v8170_v63  ;;  %v6311_v60 = vadd.f32 %v2485_v18, %v8172_v58  ;;  %v8173_v42 = vld [vmem:[#allocation3_spill] sm:$0xff]  ;;  %v8180_v39 = vld [vmem:[#allocation12_spill] sm:$0xff]  ;;  %v8181_v18 = vld [vmem:[#allocation13_spill] sm:$0xff]  ;;  %v6341_v38 = vadd.f32 %v2495_v51, %v8184_v43  ;;  %v6414_v16 = vpop.permute.xlu0 %2642 }
 0x329   : > { %v6314_v55 = vadd.f32 %v2486_v53, %v8173_v42  ;;  %8176 = vst [vmem:[#allocation63_spill] sm:$0xff] %v6320_v8  ;;  %v8179_v27 = vld [vmem:[#allocation11_spill] sm:$0xff]  ;;  %v6329_v63 = vadd.f32 %v2491_v7, %v8180_v39  ;;  %v6332_v58 = vadd.f32 %v2492_v6, %v8181_v18  ;;  %v8182_v53 = vld [vmem:[#allocation14_spill] sm:$0xff]  ;;  %v8194_v51 = vld [vmem:[#allocation33_spill] sm:$0xff] }
 0x32a   : > { %8171 = vst [vmem:[#allocation60_spill] sm:$0xff] %v6308_v56  ;;  %v6326_v61 = vadd.f32 %v2490_v28, %v8179_v27  ;;  %v6335_v42 = vadd.f32 %v2493_v45, %v8182_v53  ;;  %v8183_v30 = vld [vmem:[#allocation19_spill] sm:$0xff]  ;;  %v8186_v28 = vld [vmem:[#allocation22_spill] sm:$0xff]  ;;  %v8192_v45 = vld [vmem:[#allocation32_spill] sm:$0xff]  ;;  %v6362_v43 = vadd.f32 %v2502_v9, %v8194_v51  ;;  %v2605_v9 = vmax.f32 %v6287_v25, 0.0 }
 0x32b   : > { %8178 = vst [vmem:[#allocation64_spill] sm:$0xff] %v6323_v59  ;;  %v6338_v5 = vadd.f32 %v2494_v32, %v8183_v30  ;;  %v6347_v27 = vadd.f32 %v2497_v31, %v8186_v28  ;;  %v8188_v7 = vld [vmem:[#allocation31_spill] sm:$0xff]  ;;  %v6356_v53 = vadd.f32 %v2500_v12, %v8192_v45  ;;  %v8193_v32 = vld [vmem:[#allocation28_spill] sm:$0xff]  ;;  %v8196_v48 = vld [vmem:[#allocation29_spill] sm:$0xff]  ;;  %v2602_v12 = vmax.f32 %v6278_v29, 0.0 }
 0x32c   : > { %v6350_v39 = vadd.f32 %v2498_v54, %v8188_v7  ;;  %v8190_v6 = vld [vmem:[#allocation27_spill] sm:$0xff]  ;;  %v6359_v30 = vadd.f32 %v2501_v21, %v8193_v32  ;;  %8195 = vst [vmem:[#allocation68_spill] sm:$0xff] %v6362_v43  ;;  %v6365_v46 = vadd.f32 %v2503_v11, %v8196_v48  ;;  %v8198_v31 = vld [vmem:[#allocation34_spill] sm:$0xff]  ;;  %v8206_v40 = vld [vmem:[#allocation49_spill] sm:$0xff]  ;;  %v2603_v21 = vmax.f32 %v6281_v35, 0.0  ;;  %v2638_v11 = vpop.permute.xlu2 %2637 }
 0x32d   : > { %8187 = vst [vmem:[#allocation65_spill] sm:$0xff] %v6347_v27  ;;  %v6353_v18 = vadd.f32 %v2499_v10, %v8190_v6  ;;  %v6368_v28 = vadd.f32 %v2504_v36, %v8198_v31  ;;  %v8200_v54 = vld [vmem:[#allocation99_spill] sm:$0xff]  ;;  %v8202_v6 = vld [vmem:[#allocation101_spill] sm:$0xff]  ;;  %v8204_v10 = vld [vmem:[#allocation48_spill] sm:$0xff]  ;;  %v2601_v31 = vmax.f32 %v6275_v17, 0.0  ;;  %v2604_v45 = vmax.f32 %v6284_v13, 0.0 }
 0x32e   : > { %8189 = vst [vmem:[#allocation67_spill] sm:$0xff] %v6350_v39  ;;  %v8201_v39 = vld [vmem:[#allocation100_spill] sm:$0xff]  ;;  %v8205_v7 = vld [vmem:[#allocation50_spill] sm:$0xff]  ;;  %v8207_v1 = vld [vmem:[#allocation53_spill] sm:$0xff]  ;;  %v2678_v56 = vmul.f32 %v6414_v16, %v2602_v12  ;;  %v8216_v25 = vmax.f32 %v8200_v54, 0.0  ;;  %v8219_v48 = vmax.f32 %v6159_v14, 0.0 }
 0x32f   : > { %8191 = vst [vmem:[#allocation66_spill] sm:$0xff] %v6353_v18  ;;  %v8208_v52 = vld [vmem:[#allocation52_spill] sm:$0xff]  ;;  %v8209_v57 = vld [vmem:[#allocation55_spill] sm:$0xff]  ;;  %v8210_v19 = vld [vmem:[#allocation54_spill] sm:$0xff]  ;;  %v2677_v51 = vmul.f32 %v6414_v16, %v2601_v31  ;;  %v8217_v8 = vmax.f32 %v8201_v39, 0.0  ;;  %v8218_v31 = vmax.f32 %v8202_v6, 0.0 }
 0x330   : > { %8197 = vst [vmem:[#allocation69_spill] sm:$0xff] %v6365_v46  ;;  %v8211_v50 = vld [vmem:[#allocation56_spill] sm:$0xff]  ;;  %v8212_v3 = vld [vmem:[#allocation57_spill] sm:$0xff]  ;;  %v8213_v18 = vld [vmem:[#allocation58_spill] sm:$0xff]  ;;  %v2645_v27 = vmul.f32 %v2638_v11, %v8216_v25  ;;  %v2648_v17 = vmul.f32 %v2638_v11, %v8219_v48  ;;  %v8220_v29 = vmax.f32 %v6163_v41, 0.0  ;;  %v8221_v12 = vmax.f32 %v6167_v20, 0.0 }
 0x331   : > { %8199 = vst [vmem:[#allocation70_spill] sm:$0xff] %v6368_v28  ;;  %v2646_v59 = vmul.f32 %v2638_v11, %v8217_v8  ;;  %v2647_v36 = vmul.f32 %v2638_v11, %v8218_v31  ;;  %v8222_v13 = vmax.f32 %v6171_v47, 0.0  ;;  %v8223_v54 = vmax.f32 %v6175_v4, 0.0 }
 0x332   : > { %v2649_v43 = vmul.f32 %v2638_v11, %v8220_v29  ;;  %v2650_v35 = vmul.f32 %v2638_v11, %v8221_v12  ;;  %v2679_v8 = vmul.f32 %v6414_v16, %v2603_v21  ;;  %v2709_v39 = vadd.f32 %v2677_v51, %v2645_v27  ;;  %v8227_v29 = vld [vmem:[#allocation37_spill] sm:$0xff]  ;;  %v8229_v12 = vld [vmem:[#allocation39_spill] sm:$0xff] }
 0x333   : > { %v2651_v28 = vmul.f32 %v2638_v11, %v8222_v13  ;;  %v2652_v25 = vmul.f32 %v2638_v11, %v8223_v54  ;;  %v8224_v6 = vmax.f32 %v6179_v62, 0.0  ;;  %v8225_v14 = vmax.f32 %v6183_v15, 0.0  ;;  %v8231_v62 = vld [vmem:[#allocation40_spill] sm:$0xff] }
 0x334   : > { %v8226_v20 = vmax.f32 %v6187_v34, 0.0  ;;  %v2716_v47 = vadd.f32 %v2678_v56, %v2646_v59  ;;  %v8228_v13 = vmax.f32 %v8227_v29, 0.0  ;;  %v8230_v21 = vmax.f32 %v8229_v12, 0.0  ;;  %v8239_v29 = vld [vmem:[#allocation45_spill] sm:$0xff] }
 0x335   : > { %v8214_v32 = vld [vmem:[#allocation67_spill] sm:$0xff]  ;;  %v6457_v31 = vmul.f32 %v2638_v11, %v8224_v6  ;;  %v6461_v41 = vmul.f32 %v2638_v11, %v8225_v14  ;;  %v8232_v51 = vmax.f32 %v8231_v62, 0.0  ;;  %v2680_v15 = vmul.f32 %v6414_v16, %v2604_v45  ;;  %v8234_v6 = vld [vmem:[#allocation44_spill] sm:$0xff]  ;;  %v8243_v62 = vld [vmem:[#allocation46_spill] sm:$0xff] }
 0x336   : > { %v6465_v48 = vmul.f32 %v2638_v11, %v8226_v20  ;;  %v6469_v4 = vmul.f32 %v2638_v11, %v8228_v13  ;;  %v6473_v27 = vmul.f32 %v2638_v11, %v8230_v21  ;;  %v8235_v14 = vmax.f32 %v8234_v6, 0.0  ;;  %v8237_v20 = vld [vmem:[#allocation41_spill] sm:$0xff] }
 0x337   : > { %v6477_v54 = vmul.f32 %v2638_v11, %v8232_v51  ;;  %v8238_v56 = vmax.f32 %v8237_v20, 0.0  ;;  %v8240_v13 = vmax.f32 %v8239_v29, 0.0  ;;  %v8241_v12 = vmax.f32 %v6215_v2, 0.0 }
 0x338   : > { %v6482_v34 = vmul.f32 %v2638_v11, %v8235_v14  ;;  %v8244_v51 = vmax.f32 %v8243_v62, 0.0  ;;  %v2681_v45 = vmul.f32 %v6414_v16, %v2605_v9  ;;  %v2710_v6 = vrot.slane %v2709_v39, 4 }
 0x339   : > { %8233 = vst [vmem:[#allocation71_spill] sm:$0xff] %v6477_v54  ;;  %v6486_v59 = vmul.f32 %v2638_v11, %v8238_v56  ;;  %v6490_v46 = vmul.f32 %v2638_v11, %v8240_v13  ;;  %v6494_v21 = vmul.f32 %v2638_v11, %v8241_v12  ;;  %v2723_v14 = vadd.f32 %v2679_v8, %v2647_v36 }
 0x33a   : > { %8236 = vst [vmem:[#allocation72_spill] sm:$0xff] %v6482_v34  ;;  %v6498_v54 = vmul.f32 %v2638_v11, %v8244_v51  ;;  %v8245_v34 = vld [vmem:[#allocation47_spill] sm:$0xff]  ;;  %v8247_v29 = vmax.f32 %v8204_v10, 0.0  ;;  %v8248_v2 = vmax.f32 %v8205_v7, 0.0  ;;  %v8249_v62 = vmax.f32 %v8206_v40, 0.0 }
 0x33b   : > { %8242 = vst [vmem:[#allocation73_spill] sm:$0xff] %v6494_v21  ;;  %v8246_v20 = vmax.f32 %v8245_v34, 0.0  ;;  %v2717_v21 = vrot.slane %v2716_v47, 4  ;;  %v8250_v9 = vmax.f32 %v8207_v1, 0.0  ;;  %v8251_v8 = vmax.f32 %v6290_v24, 0.0 }
 0x33c   : > { %v6507_v13 = vmul.f32 %v2638_v11, %v8247_v29  ;;  %v6511_v12 = vmul.f32 %v2638_v11, %v8248_v2  ;;  %v6515_v51 = vmul.f32 %v2638_v11, %v8249_v62  ;;  %v2730_v10 = vadd.f32 %v2680_v15, %v2648_v17 }
 0x33d   : > { %v6503_v56 = vmul.f32 %v2638_v11, %v8246_v20  ;;  %v6519_v36 = vmul.f32 %v2638_v11, %v8250_v9  ;;  %v2682_v34 = vmul.f32 %v6414_v16, %v8251_v8  ;;  %v8252_v20 = vmax.f32 %v8208_v52, 0.0 }
 0x33e   : > { %v8253_v7 = vmax.f32 %v8209_v57, 0.0  ;;  %v8254_v40 = vmax.f32 %v8210_v19, 0.0  ;;  %v8256_v1 = vmax.f32 %v8211_v50, 0.0  ;;  %v8258_v24 = vmax.f32 %v6293_v22, 0.0 }
 0x33f   : > { %v6526_v29 = vmul.f32 %v2638_v11, %v8252_v20  ;;  %v2711_v15 = vadd.f32 %v2710_v6, %v2709_v39  ;;  %v2724_v52 = vrot.slane %v2723_v14, 4  ;;  %v2737_v8 = vadd.f32 %v2681_v45, %v2649_v43 }
 0x340   : > { %v6530_v2 = vmul.f32 %v2638_v11, %v8253_v7  ;;  %v6534_v62 = vmul.f32 %v2638_v11, %v8254_v40  ;;  %v6538_v9 = vmul.f32 %v2638_v11, %v8256_v1  ;;  %v2683_v17 = vmul.f32 %v6414_v16, %v8258_v24 }
 0x341   : > { %v8259_v20 = vmax.f32 %v6259_v0, 0.0  ;;  %v8260_v7 = vmax.f32 %v8212_v3, 0.0  ;;  %v8262_v40 = vmax.f32 %v8213_v18, 0.0  ;;  %v2718_v1 = vadd.f32 %v2717_v21, %v2716_v47 }
 0x342   : > { %8255 = vst [vmem:[#allocation74_spill] sm:$0xff] %v6534_v62  ;;  %v8267_v39 = vmax.f32 %v6296_v44, 0.0  ;;  %v2731_v0 = vrot.slane %v2730_v10, 4  ;;  %v2744_v45 = vadd.f32 %v2682_v34, %v2650_v35  ;;  %v8268_v6 = vmax.f32 %v6299_v26, 0.0 }
 0x343   : > { %8257 = vst [vmem:[#allocation75_spill] sm:$0xff] %v6538_v9  ;;  %v6545_v57 = vmul.f32 %v2638_v11, %v8259_v20  ;;  %v6549_v19 = vmul.f32 %v2638_v11, %v8260_v7  ;;  %v6553_v50 = vmul.f32 %v2638_v11, %v8262_v40  ;;  %v8264_v9 = vld [vmem:[#allocation59_spill] sm:$0xff]  ;;  %v8269_v24 = vmax.f32 %v6302_v49, 0.0 }
 0x344   : > { %v8265_v22 = vmax.f32 %v8264_v9, 0.0  ;;  %v2684_v43 = vmul.f32 %v6414_v16, %v8267_v39  ;;  %v2685_v3 = vmul.f32 %v6414_v16, %v8268_v6  ;;  %v8270_v47 = vmax.f32 %v6305_v33, 0.0 }
 0x345   : > { %8261 = vst [vmem:[#allocation76_spill] sm:$0xff] %v6549_v19  ;;  %v2686_v18 = vmul.f32 %v6414_v16, %v8269_v24  ;;  %v2712_v20 = vrot.slane %v2711_v15, 2  ;;  %v2725_v7 = vadd.f32 %v2724_v52, %v2723_v14  ;;  %v2738_v40 = vrot.slane %v2737_v8, 4  ;;  %v8276_v24 = vld [vmem:[#allocation63_spill] sm:$0xff] }
 0x346   : > { %8263 = vst [vmem:[#allocation79_spill] sm:$0xff] %v6553_v50  ;;  %v6557_v62 = vmul.f32 %v2638_v11, %v8265_v22  ;;  %v2687_v21 = vmul.f32 %v6414_v16, %v8270_v47  ;;  %v8271_v11 = vld [vmem:[#allocation60_spill] sm:$0xff]  ;;  %v2751_v35 = vadd.f32 %v2683_v17, %v2651_v28  ;;  %v8273_v26 = vmax.f32 %v6311_v60, 0.0 }
 0x347   : > { %v8272_v9 = vmax.f32 %v8271_v11, 0.0  ;;  %v8274_v49 = vmax.f32 %v6314_v55, 0.0  ;;  %v8275_v33 = vmax.f32 %v6317_v23, 0.0  ;;  %v2719_v6 = vrot.slane %v2718_v1, 2  ;;  %v8278_v60 = vld [vmem:[#allocation64_spill] sm:$0xff] }
 0x348   : > { %8266 = vst [vmem:[#allocation30_spill] sm:$0xff] %v6557_v62  ;;  %v2689_v34 = vmul.f32 %v6414_v16, %v8273_v26  ;;  %v8277_v47 = vmax.f32 %v8276_v24, 0.0  ;;  %v2732_v14 = vadd.f32 %v2731_v0, %v2730_v10  ;;  %v2745_v28 = vrot.slane %v2744_v45, 4 }
 0x349   : > { %v2688_v44 = vmul.f32 %v6414_v16, %v8272_v9  ;;  %v2690_v22 = vmul.f32 %v6414_v16, %v8274_v49  ;;  %v2691_v39 = vmul.f32 %v6414_v16, %v8275_v33  ;;  %v2758_v17 = vadd.f32 %v2684_v43, %v2652_v25 }
 0x34a   : > { %v6586_v11 = vmul.f32 %v6414_v16, %v8277_v47  ;;  %v8279_v52 = vmax.f32 %v8278_v60, 0.0  ;;  %v8280_v55 = vmax.f32 %v6326_v61, 0.0  ;;  %v8281_v26 = vmax.f32 %v6329_v63, 0.0 }
 0x34b   : > { %v8282_v33 = vmax.f32 %v6332_v58, 0.0  ;;  %v2713_v25 = vadd.f32 %v2712_v20, %v2711_v15  ;;  %v2726_v43 = vrot.slane %v2725_v7, 2  ;;  %v2739_v0 = vadd.f32 %v2738_v40, %v2737_v8 }
 0x34c   : > { %v6591_v9 = vmul.f32 %v6414_v16, %v8279_v52  ;;  %v6596_v23 = vmul.f32 %v6414_v16, %v8280_v55  ;;  %v6601_v49 = vmul.f32 %v6414_v16, %v8281_v26  ;;  %v2752_v24 = vrot.slane %v2751_v35, 4 }
 0x34d   : > { %v6606_v10 = vmul.f32 %v6414_v16, %v8282_v33  ;;  %v8283_v47 = vmax.f32 %v6335_v42, 0.0  ;;  %v8284_v60 = vmax.f32 %v6338_v5, 0.0  ;;  %v2720_v52 = vadd.f32 %v2719_v6, %v2718_v1  ;;  %v8287_v5 = vld [vmem:[#allocation65_spill] sm:$0xff] }
 0x34e   : > { %v2765_v58 = vadd.f32 %v2685_v3, %v6457_v31  ;;  %v8285_v55 = vmax.f32 %v6341_v38, 0.0  ;;  %v2733_v8 = vrot.slane %v2732_v14, 2  ;;  %v2746_v20 = vadd.f32 %v2745_v28, %v2744_v45 }
 0x34f   : > { %v6611_v61 = vmul.f32 %v6414_v16, %v8283_v47  ;;  %v6616_v63 = vmul.f32 %v6414_v16, %v8284_v60  ;;  %v2759_v40 = vrot.slane %v2758_v17, 4  ;;  %v8286_v42 = vmax.f32 %v6344_v37, 0.0  ;;  %v8290_v37 = vld [vmem:[#allocation66_spill] sm:$0xff] }
 0x350   : > { %v6622_v15 = vmul.f32 %v6414_v16, %v8285_v55  ;;  %v8288_v33 = vmax.f32 %v8287_v5, 0.0  ;;  %v8289_v31 = vmax.f32 %v8214_v32, 0.0  ;;  %v2772_v1 = vadd.f32 %v2686_v18, %v6461_v41 }
 0x351   : > { %v6627_v26 = vmul.f32 %v6414_v16, %v8286_v42  ;;  %v2714_v3 = vrot.slane %v2713_v25, 1  ;;  %v2727_v45 = vadd.f32 %v2726_v43, %v2725_v7  ;;  %v2740_v6 = vrot.slane %v2739_v0, 2  ;;  %v8294_v43 = vld [vmem:[#allocation68_spill] sm:$0xff] }
 0x352   : > { %v6632_v47 = vmul.f32 %v6414_v16, %v8288_v33  ;;  %v6637_v38 = vmul.f32 %v6414_v16, %v8289_v31  ;;  %v2753_v28 = vadd.f32 %v2752_v24, %v2751_v35  ;;  %v8291_v60 = vmax.f32 %v8290_v37, 0.0 }
 0x353   : > { %v2721_v42 = vrot.slane %v2720_v52, 1  ;;  %v2766_v5 = vrot.slane %v2765_v58, 4  ;;  %v2779_v33 = vadd.f32 %v2687_v21, %v6465_v48  ;;  %v8292_v32 = vmax.f32 %v6356_v53, 0.0 }
 0x354   : > { %v6643_v55 = vmul.f32 %v6414_v16, %v8291_v60  ;;  %v2734_v62 = vadd.f32 %v2733_v8, %v2732_v14  ;;  %v2747_v41 = vrot.slane %v2746_v20, 2  ;;  %v2760_v18 = vadd.f32 %v2759_v40, %v2758_v17 }
 0x355   : > { %v6649_v31 = vmul.f32 %v6414_v16, %v8292_v32  ;;  %v8293_v7 = vmax.f32 %v6359_v30, 0.0  ;;  %v8295_v24 = vmax.f32 %v8294_v43, 0.0  ;;  %v2773_v60 = vrot.slane %v2772_v1, 4 }
 0x356   : > { %v2786_v48 = vadd.f32 %v2688_v44, %v6469_v4  ;;  %v6662_v53 = vadd.f32 %v2714_v3, %v2713_v25  ;;  %v2728_v21 = vrot.slane %v2727_v45, 1  ;;  %v2741_v32 = vadd.f32 %v2740_v6, %v2739_v0  ;;  %v8300_v4 = vld [vmem:[#allocation70_spill] sm:$0xff]  ;;  %v8302_v3 = vld [vmem:[#allocation71_spill] sm:$0xff] }
 0x357   : > { %v6654_v35 = vmul.f32 %v6414_v16, %v8293_v7  ;;  %v6659_v37 = vmul.f32 %v6414_v16, %v8295_v24  ;;  %v2754_v14 = vrot.slane %v2753_v28, 2  ;;  %v6664_v8 = vadd.f32 %v2721_v42, %v2720_v52  ;;  %v8297_v7 = vld [vmem:[#allocation69_spill] sm:$0xff]  ;;  %v8303_v42 = vld [vmem:[#allocation72_spill] sm:$0xff] }
 0x358   : > { %v2767_v17 = vadd.f32 %v2766_v5, %v2765_v58  ;;  %v2780_v30 = vrot.slane %v2779_v33, 4  ;;  %v2793_v40 = vadd.f32 %v2689_v34, %v6473_v27  ;;  %v8298_v50 = vmax.f32 %v8297_v7, 0.0 }
 0x359   : > { %8296 = vst [vmem:[#allocation80_spill] sm:$0xff] %v6659_v37  ;;  %v2735_v24 = vrot.slane %v2734_v62, 1  ;;  %v2748_v37 = vadd.f32 %v2747_v41, %v2746_v20  ;;  %v2761_v19 = vrot.slane %v2760_v18, 2  ;;  %v8301_v44 = vmax.f32 %v8300_v4, 0.0 }
 0x35a   : > { %v6670_v43 = vmul.f32 %v6414_v16, %v8298_v50  ;;  %v2774_v0 = vadd.f32 %v2773_v60, %v2772_v1  ;;  %v2787_v52 = vrot.slane %v2786_v48, 4  ;;  %v2800_v58 = vadd.f32 %v2690_v22, %v8302_v3 }
 0x35b   : > { %v6675_v25 = vmul.f32 %v6414_v16, %v8301_v44  ;;  %v6678_v6 = vadd.f32 %v2728_v21, %v2727_v45  ;;  %v2742_v27 = vrot.slane %v2741_v32, 1  ;;  %v2755_v34 = vadd.f32 %v2754_v14, %v2753_v28 }
 0x35c   : > { %8299 = vst [vmem:[#allocation35_spill] sm:$0xff] %v6670_v43  ;;  %v2807_v5 = vadd.f32 %v2691_v39, %v8303_v42  ;;  %v2768_v50 = vrot.slane %v2767_v17, 2  ;;  %v2781_v7 = vadd.f32 %v2780_v30, %v2779_v33  ;;  %v2794_v43 = vrot.slane %v2793_v40, 4 }
 0x35d   : > { %v2933_v20 = vadd.f32 %v6664_v8, %v6662_v53  ;;  %v6683_v41 = vadd.f32 %v2735_v24, %v2734_v62  ;;  %v2749_v16 = vrot.slane %v2748_v37, 1  ;;  %v2762_v4 = vadd.f32 %v2761_v19, %v2760_v18 }
 0x35e   : > { %v2814_v1 = vadd.f32 %v6586_v11, %v6486_v59  ;;  %v2775_v22 = vrot.slane %v2774_v0, 2  ;;  %v2788_v45 = vadd.f32 %v2787_v52, %v2786_v48  ;;  %v2801_v60 = vrot.slane %v2800_v58, 4  ;;  %v8304_v48 = vld [vmem:[#allocation73_spill] sm:$0xff] }
 0x35f   : > { %v2934_v28 = vadd.f32 %v2933_v20, %v6678_v6  ;;  %v6688_v21 = vadd.f32 %v2742_v27, %v2741_v32  ;;  %v2756_v39 = vrot.slane %v2755_v34, 1  ;;  %v2808_v33 = vrot.slane %v2807_v5, 4 }
 0x360   : > { %v2821_v14 = vadd.f32 %v6591_v9, %v6490_v46  ;;  %v2769_v30 = vadd.f32 %v2768_v50, %v2767_v17  ;;  %v2782_v62 = vrot.slane %v2781_v7, 2  ;;  %v2795_v24 = vadd.f32 %v2794_v43, %v2793_v40 }
 0x361   : > { %v2935_v19 = vadd.f32 %v2934_v28, %v6683_v41  ;;  %v6693_v18 = vadd.f32 %v2749_v16, %v2748_v37  ;;  %v2763_v59 = vrot.slane %v2762_v4, 1  ;;  %v2815_v11 = vrot.slane %v2814_v1, 4 }
 0x362   : > { %v2828_v44 = vadd.f32 %v6596_v23, %v8304_v48  ;;  %v2776_v52 = vadd.f32 %v2775_v22, %v2774_v0  ;;  %v2789_v32 = vrot.slane %v2788_v45, 2  ;;  %v2802_v3 = vadd.f32 %v2801_v60, %v2800_v58 }
 0x363   : > { %v2936_v27 = vadd.f32 %v2935_v19, %v6688_v21  ;;  %v6698_v42 = vadd.f32 %v2756_v39, %v2755_v34  ;;  %v2809_v46 = vadd.f32 %v2808_v33, %v2807_v5  ;;  %v2822_v9 = vrot.slane %v2821_v14, 4 }
 0x364   : > { %v2835_v17 = vadd.f32 %v6601_v49, %v6498_v54  ;;  %v2770_v40 = vrot.slane %v2769_v30, 1  ;;  %v2783_v37 = vadd.f32 %v2782_v62, %v2781_v7  ;;  %v2796_v43 = vrot.slane %v2795_v24, 2 }
 0x365   : > { %v2937_v50 = vadd.f32 %v2936_v27, %v6693_v18  ;;  %v6703_v20 = vadd.f32 %v2763_v59, %v2762_v4  ;;  %v2816_v23 = vadd.f32 %v2815_v11, %v2814_v1  ;;  %v2829_v0 = vrot.slane %v2828_v44, 4 }
 0x366   : > { %v2842_v58 = vadd.f32 %v6606_v10, %v6503_v56  ;;  %v2777_v16 = vrot.slane %v2776_v52, 1  ;;  %v2790_v34 = vadd.f32 %v2789_v32, %v2788_v45  ;;  %v2803_v22 = vrot.slane %v2802_v3, 2 }
 0x367   : > { %v2938_v5 = vadd.f32 %v2937_v50, %v6698_v42  ;;  %v2810_v60 = vrot.slane %v2809_v46, 2  ;;  %v2823_v28 = vadd.f32 %v2822_v9, %v2821_v14  ;;  %v2836_v54 = vrot.slane %v2835_v17, 4 }
 0x368   : > { %v2849_v49 = vadd.f32 %v6611_v61, %v6507_v13  ;;  %v6710_v7 = vadd.f32 %v2770_v40, %v2769_v30  ;;  %v2784_v4 = vrot.slane %v2783_v37, 1  ;;  %v2797_v39 = vadd.f32 %v2796_v43, %v2795_v24 }
 0x369   : > { %v2939_v1 = vadd.f32 %v2938_v5, %v6703_v20  ;;  %v2817_v33 = vrot.slane %v2816_v23, 2  ;;  %v2830_v62 = vadd.f32 %v2829_v0, %v2828_v44  ;;  %v2843_v56 = vrot.slane %v2842_v58, 4 }
 0x36a   : > { %v2856_v10 = vadd.f32 %v6616_v63, %v6511_v12  ;;  %v6715_v45 = vadd.f32 %v2777_v16, %v2776_v52  ;;  %v2791_v19 = vrot.slane %v2790_v34, 1  ;;  %v2804_v14 = vadd.f32 %v2803_v22, %v2802_v3 }
 0x36b   : > { %v2940_v59 = vadd.f32 %v2939_v1, %v6710_v7  ;;  %v2824_v11 = vrot.slane %v2823_v28, 2  ;;  %v2837_v13 = vadd.f32 %v2836_v54, %v2835_v17  ;;  %v2850_v61 = vrot.slane %v2849_v49, 4 }
 0x36c   : > { %v2863_v30 = vadd.f32 %v6622_v15, %v6515_v51  ;;  %v6720_v24 = vadd.f32 %v2784_v4, %v2783_v37  ;;  %v2798_v48 = vrot.slane %v2797_v39, 1  ;;  %v2811_v44 = vadd.f32 %v2810_v60, %v2809_v46 }
 0x36d   : > { %v2941_v32 = vadd.f32 %v2940_v59, %v6715_v45  ;;  %v2831_v27 = vrot.slane %v2830_v62, 2  ;;  %v2844_v12 = vadd.f32 %v2843_v56, %v2842_v58  ;;  %v2857_v63 = vrot.slane %v2856_v10, 4 }
 0x36e   : > { %v2870_v52 = vadd.f32 %v6627_v26, %v6519_v36  ;;  %v6725_v3 = vadd.f32 %v2791_v19, %v2790_v34  ;;  %v2805_v9 = vrot.slane %v2804_v14, 1  ;;  %v2818_v17 = vadd.f32 %v2817_v33, %v2816_v23 }
 0x36f   : > { %v2942_v40 = vadd.f32 %v2941_v32, %v6720_v24  ;;  %v2825_v43 = vadd.f32 %v2824_v11, %v2823_v28  ;;  %v2838_v51 = vrot.slane %v2837_v13, 2  ;;  %v2851_v15 = vadd.f32 %v2850_v61, %v2849_v49 }
 0x370   : > { %v2864_v37 = vrot.slane %v2863_v30, 4  ;;  %v6728_v50 = vadd.f32 %v2798_v48, %v2797_v39  ;;  %v2812_v46 = vrot.slane %v2811_v44, 1  ;;  %v2877_v0 = vadd.f32 %v6632_v47, %v6526_v29  ;;  %v8305_v47 = vld [vmem:[#allocation74_spill] sm:$0xff] }
 0x371   : > { %v2943_v58 = vadd.f32 %v2942_v40, %v6725_v3  ;;  %v2832_v16 = vadd.f32 %v2831_v27, %v2830_v62  ;;  %v2845_v36 = vrot.slane %v2844_v12, 2  ;;  %v2858_v26 = vadd.f32 %v2857_v63, %v2856_v10  ;;  %v8307_v40 = vld [vmem:[#allocation76_spill] sm:$0xff] }
 0x372   : > { %v2871_v34 = vrot.slane %v2870_v52, 4  ;;  %v6733_v22 = vadd.f32 %v2805_v9, %v2804_v14  ;;  %v2819_v23 = vrot.slane %v2818_v17, 1  ;;  %v2884_v5 = vadd.f32 %v6637_v38, %v6530_v2  ;;  %v8306_v38 = vld [vmem:[#allocation75_spill] sm:$0xff] }
 0x373   : > { %v2944_v60 = vadd.f32 %v2943_v58, %v6728_v50  ;;  %v2826_v28 = vrot.slane %v2825_v43, 1  ;;  %v2839_v54 = vadd.f32 %v2838_v51, %v2837_v13  ;;  %v2852_v49 = vrot.slane %v2851_v15, 2  ;;  %v8309_v58 = vld [vmem:[#allocation79_spill] sm:$0xff] }
 0x374   : > { %v2865_v4 = vadd.f32 %v2864_v37, %v2863_v30  ;;  %v6738_v39 = vadd.f32 %v2812_v46, %v2811_v44  ;;  %v2878_v29 = vrot.slane %v2877_v0, 4  ;;  %v2891_v1 = vadd.f32 %v6643_v55, %v8305_v47 }
 0x375   : > { %v2945_v33 = vadd.f32 %v2944_v60, %v6733_v22  ;;  %v2833_v62 = vrot.slane %v2832_v16, 1  ;;  %v2846_v56 = vadd.f32 %v2845_v36, %v2844_v12  ;;  %v2859_v10 = vrot.slane %v2858_v26, 2 }
 0x376   : > { %v2872_v19 = vadd.f32 %v2871_v34, %v2870_v52  ;;  %v6743_v14 = vadd.f32 %v2819_v23, %v2818_v17  ;;  %v2885_v2 = vrot.slane %v2884_v5, 4  ;;  %v2898_v59 = vadd.f32 %v6649_v31, %v8306_v38 }
 0x377   : > { %v2946_v11 = vadd.f32 %v2945_v33, %v6738_v39  ;;  %v6748_v13 = vadd.f32 %v2826_v28, %v2825_v43  ;;  %v2840_v61 = vrot.slane %v2839_v54, 1  ;;  %v2853_v30 = vadd.f32 %v2852_v49, %v2851_v15  ;;  %v8308_v43 = vld [vmem:[#allocation80_spill] sm:$0xff]  ;;  %v8311_v28 = vld [vmem:[#allocation30_spill] sm:$0xff] }
 0x378   : > { %v2866_v48 = vrot.slane %v2865_v4, 2  ;;  %v2879_v55 = vadd.f32 %v2878_v29, %v2877_v0  ;;  %v2892_v44 = vrot.slane %v2891_v1, 4  ;;  %v2905_v32 = vadd.f32 %v6654_v35, %v6545_v57  ;;  %v8310_v57 = vld [vmem:[#allocation35_spill] sm:$0xff] }
 0x379   : > { %v2947_v27 = vadd.f32 %v2946_v11, %v6743_v14  ;;  %v6753_v12 = vadd.f32 %v2833_v62, %v2832_v16  ;;  %v2847_v63 = vrot.slane %v2846_v56, 1  ;;  %v2860_v52 = vadd.f32 %v2859_v10, %v2858_v26 }
 0x37a   : > { %v2873_v9 = vrot.slane %v2872_v19, 2  ;;  %v2886_v31 = vadd.f32 %v2885_v2, %v2884_v5  ;;  %v2899_v17 = vrot.slane %v2898_v59, 4  ;;  %v2912_v51 = vadd.f32 %v8308_v43, %v8307_v40 }
 0x37b   : > { %v2948_v15 = vadd.f32 %v2947_v27, %v6748_v13  ;;  %v6758_v37 = vadd.f32 %v2840_v61, %v2839_v54  ;;  %v2854_v46 = vrot.slane %v2853_v30, 1  ;;  %v2867_v0 = vadd.f32 %v2866_v48, %v2865_v4 }
 0x37c   : > { %v2919_v35 = vadd.f32 %v8310_v57, %v8309_v58  ;;  %v2880_v36 = vrot.slane %v2879_v55, 2  ;;  %v2893_v16 = vadd.f32 %v2892_v44, %v2891_v1  ;;  %v2906_v34 = vrot.slane %v2905_v32, 4 }
 0x37d   : > { %v2949_v26 = vadd.f32 %v2948_v15, %v6753_v12  ;;  %v6763_v23 = vadd.f32 %v2847_v63, %v2846_v56  ;;  %v2861_v5 = vrot.slane %v2860_v52, 1  ;;  %v2874_v60 = vadd.f32 %v2873_v9, %v2872_v19 }
 0x37e   : > { %v2926_v49 = vadd.f32 %v6675_v25, %v8311_v28  ;;  %v2887_v29 = vrot.slane %v2886_v31, 2  ;;  %v2900_v54 = vadd.f32 %v2899_v17, %v2898_v59  ;;  %v2913_v47 = vrot.slane %v2912_v51, 4 }
 0x37f   : > { %v2950_v4 = vadd.f32 %v2949_v26, %v6758_v37  ;;  %v6768_v33 = vadd.f32 %v2854_v46, %v2853_v30  ;;  %v2868_v62 = vrot.slane %v2867_v0, 1  ;;  %v2920_v10 = vrot.slane %v2919_v35, 4 }
 0x380   : > { %v2881_v1 = vadd.f32 %v2880_v36, %v2879_v55  ;;  %v2894_v2 = vrot.slane %v2893_v16, 2  ;;  %v2907_v38 = vadd.f32 %v2906_v34, %v2905_v32  ;;  %v6771_v11 = vadd.f32 %v2861_v5, %v2860_v52 }
 0x381   : > { %v2951_v56 = vadd.f32 %v2950_v4, %v6763_v23  ;;  %v2875_v19 = vrot.slane %v2874_v60, 1  ;;  %v2927_v61 = vrot.slane %v2926_v49, 4  ;;  %v2888_v48 = vadd.f32 %v2887_v29, %v2886_v31 }
 0x382   : > { %v2901_v25 = vrot.slane %v2900_v54, 2  ;;  %v2914_v44 = vadd.f32 %v2913_v47, %v2912_v51  ;;  %v6774_v27 = vadd.f32 %v2868_v62, %v2867_v0  ;;  %v2921_v30 = vadd.f32 %v2920_v10, %v2919_v35 }
 0x383   : > { %v2952_v59 = vadd.f32 %v2951_v56, %v6768_v33  ;;  %v2882_v63 = vrot.slane %v2881_v1, 1  ;;  %v2895_v9 = vadd.f32 %v2894_v2, %v2893_v16  ;;  %v2908_v17 = vrot.slane %v2907_v38, 2 }
 0x384   : > { %v6777_v32 = vadd.f32 %v2875_v19, %v2874_v60  ;;  %v2928_v40 = vadd.f32 %v2927_v61, %v2926_v49  ;;  %v2889_v52 = vrot.slane %v2888_v48, 1  ;;  %v2902_v43 = vadd.f32 %v2901_v25, %v2900_v54 }
 0x385   : > { %v2953_v55 = vadd.f32 %v2952_v59, %v6771_v11  ;;  %v2915_v15 = vrot.slane %v2914_v44, 2  ;;  %v2922_v46 = vrot.slane %v2921_v30, 2  ;;  %v6780_v51 = vadd.f32 %v2882_v63, %v2881_v1 }
 0x386   : > { %v2896_v58 = vrot.slane %v2895_v9, 1  ;;  %v2909_v0 = vadd.f32 %v2908_v17, %v2907_v38  ;;  %v2929_v35 = vrot.slane %v2928_v40, 2  ;;  %v6783_v36 = vadd.f32 %v2889_v52, %v2888_v48 }
 0x387   : > { %v2954_v31 = vadd.f32 %v2953_v55, %v6774_v27  ;;  %v2903_v16 = vrot.slane %v2902_v43, 1  ;;  %v2916_v34 = vadd.f32 %v2915_v15, %v2914_v44  ;;  %v2923_v28 = vadd.f32 %v2922_v46, %v2921_v30 }
 0x388   : > { %v6786_v5 = vadd.f32 %v2896_v58, %v2895_v9  ;;  %v2910_v60 = vrot.slane %v2909_v0, 1  ;;  %v2930_v47 = vadd.f32 %v2929_v35, %v2928_v40 }
 0x389   : > { %v2955_v57 = vadd.f32 %v2954_v31, %v6777_v32  ;;  %v6789_v29 = vadd.f32 %v2903_v16, %v2902_v43  ;;  %v2917_v54 = vrot.slane %v2916_v34, 1  ;;  %v2924_v10 = vrot.slane %v2923_v28, 1 }
 0x38a   : > { %v6792_v62 = vadd.f32 %v2910_v60, %v2909_v0  ;;  %v2931_v38 = vrot.slane %v2930_v47, 1 }
 0x38b   : > { %v2956_v26 = vadd.f32 %v2955_v57, %v6780_v51  ;;  %v6795_v2 = vadd.f32 %v2917_v54, %v2916_v34  ;;  %v6798_v19 = vadd.f32 %v2924_v10, %v2923_v28 }
 0x38c   : > { %v6801_v48 = vadd.f32 %v2931_v38, %v2930_v47 }
 0x38d   : > { %v2957_v49 = vadd.f32 %v2956_v26, %v6783_v36 }
 0x38f   : > { %v2958_v4 = vadd.f32 %v2957_v49, %v6786_v5 }
 0x391   : > { %v2959_v1 = vadd.f32 %v2958_v4, %v6789_v29 }
 0x393   : > { %v2960_v56 = vadd.f32 %v2959_v1, %v6792_v62 }
 0x395   : > { %v2961_v61 = vadd.f32 %v2960_v56, %v6795_v2 }
 0x397   : > { %v2962_v25 = vadd.f32 %v2961_v61, %v6798_v19 }
 0x399   : > { %v2963_v44 = vadd.f32 %v2962_v25, %v6801_v48 }
 0x39b   : > { %2964 = vadd.xlane.f32.xlu1 %v2963_v44 }
 0x40e   : > { %v2965_v59 = vpop.xlane.xlu1 %2964 }
 0x40f   : > { %v6805_v30 = vmul.f32 0.00024414063, %v2965_v59 }
 0x411   : > { %v6809_v63 = vsub.f32 %v6662_v53, %v6805_v30  ;;  %v6813_v9 = vsub.f32 %v6664_v8, %v6805_v30  ;;  %v6817_v17 = vsub.f32 %v6678_v6, %v6805_v30  ;;  %v6825_v52 = vsub.f32 %v6683_v41, %v6805_v30 }
 0x412   : > { %v6829_v53 = vsub.f32 %v6688_v21, %v6805_v30  ;;  %v6835_v6 = vsub.f32 %v6693_v18, %v6805_v30  ;;  %v6841_v41 = vsub.f32 %v6698_v42, %v6805_v30  ;;  %v6847_v58 = vsub.f32 %v6703_v20, %v6805_v30 }
 0x413   : > { %v2999_v55 = vmul.f32 %v6809_v63, %v6809_v63  ;;  %v3000_v40 = vmul.f32 %v6813_v9, %v6813_v9  ;;  %v3001_v8 = vmul.f32 %v6817_v17, %v6817_v17  ;;  %v3002_v15 = vmul.f32 %v6825_v52, %v6825_v52 }
 0x414   : > { %v3003_v21 = vmul.f32 %v6829_v53, %v6829_v53  ;;  %v3004_v18 = vmul.f32 %v6835_v6, %v6835_v6  ;;  %v6853_v57 = vsub.f32 %v6710_v7, %v6805_v30  ;;  %v3005_v42 = vmul.f32 %v6841_v41, %v6841_v41 }
 0x415   : > { %v3031_v43 = vadd.f32 %v3000_v40, %v2999_v55  ;;  %v6859_v16 = vsub.f32 %v6715_v45, %v6805_v30  ;;  %v3006_v20 = vmul.f32 %v6847_v58, %v6847_v58  ;;  %v6865_v26 = vsub.f32 %v6720_v24, %v6805_v30 }
 0x416   : > { %v3007_v7 = vmul.f32 %v6853_v57, %v6853_v57  ;;  %v6871_v28 = vsub.f32 %v6725_v3, %v6805_v30  ;;  %v6877_v54 = vsub.f32 %v6728_v50, %v6805_v30  ;;  %v6883_v4 = vsub.f32 %v6733_v22, %v6805_v30 }
 0x417   : > { %v3032_v31 = vadd.f32 %v3031_v43, %v3001_v8  ;;  %v3008_v45 = vmul.f32 %v6859_v16, %v6859_v16  ;;  %v3009_v24 = vmul.f32 %v6865_v26, %v6865_v26  ;;  %v6889_v1 = vsub.f32 %v6738_v39, %v6805_v30 }
 0x418   : > { %v3010_v3 = vmul.f32 %v6871_v28, %v6871_v28  ;;  %v3011_v50 = vmul.f32 %v6877_v54, %v6877_v54  ;;  %v6895_v56 = vsub.f32 %v6743_v14, %v6805_v30  ;;  %v3012_v22 = vmul.f32 %v6883_v4, %v6883_v4 }
 0x419   : > { %v3033_v46 = vadd.f32 %v3032_v31, %v3002_v15  ;;  %v6901_v25 = vsub.f32 %v6748_v13, %v6805_v30  ;;  %v3013_v39 = vmul.f32 %v6889_v1, %v6889_v1  ;;  %v6907_v59 = vsub.f32 %v6753_v12, %v6805_v30 }
 0x41a   : > { %v3014_v14 = vmul.f32 %v6895_v56, %v6895_v56  ;;  %v6913_v40 = vsub.f32 %v6758_v37, %v6805_v30  ;;  %v6919_v43 = vsub.f32 %v6763_v23, %v6805_v30  ;;  %v6925_v31 = vsub.f32 %v6768_v33, %v6805_v30 }
 0x41b   : > { %v3034_v0 = vadd.f32 %v3033_v46, %v3003_v21  ;;  %v3015_v13 = vmul.f32 %v6901_v25, %v6901_v25  ;;  %v3016_v12 = vmul.f32 %v6907_v59, %v6907_v59  ;;  %v6931_v46 = vsub.f32 %v6771_v11, %v6805_v30 }
 0x41c   : > { %v3017_v37 = vmul.f32 %v6913_v40, %v6913_v40  ;;  %v3018_v23 = vmul.f32 %v6919_v43, %v6919_v43  ;;  %v3019_v33 = vmul.f32 %v6925_v31, %v6925_v31 }
 0x41d   : > { %v3035_v35 = vadd.f32 %v3034_v0, %v3004_v18  ;;  %v6937_v0 = vsub.f32 %v6774_v27, %v6805_v30  ;;  %v3020_v11 = vmul.f32 %v6931_v46, %v6931_v46 }
 0x41f   : > { %v3036_v34 = vadd.f32 %v3035_v35, %v3005_v42  ;;  %v6943_v35 = vsub.f32 %v6777_v32, %v6805_v30  ;;  %v3021_v27 = vmul.f32 %v6937_v0, %v6937_v0 }
 0x421   : > { %v3037_v60 = vadd.f32 %v3036_v34, %v3006_v20  ;;  %v6949_v34 = vsub.f32 %v6780_v51, %v6805_v30  ;;  %v3022_v32 = vmul.f32 %v6943_v35, %v6943_v35 }
 0x423   : > { %v3038_v49 = vadd.f32 %v3037_v60, %v3007_v7  ;;  %v6955_v60 = vsub.f32 %v6783_v36, %v6805_v30  ;;  %v3023_v51 = vmul.f32 %v6949_v34, %v6949_v34 }
 0x425   : > { %v3039_v47 = vadd.f32 %v3038_v49, %v3008_v45  ;;  %v6961_v49 = vsub.f32 %v6786_v5, %v6805_v30  ;;  %v3024_v36 = vmul.f32 %v6955_v60, %v6955_v60 }
 0x427   : > { %v3040_v10 = vadd.f32 %v3039_v47, %v3009_v24  ;;  %v6967_v47 = vsub.f32 %v6789_v29, %v6805_v30  ;;  %v3025_v5 = vmul.f32 %v6961_v49, %v6961_v49 }
 0x429   : > { %v3041_v38 = vadd.f32 %v3040_v10, %v3010_v3  ;;  %v6973_v10 = vsub.f32 %v6792_v62, %v6805_v30  ;;  %v3026_v29 = vmul.f32 %v6967_v47, %v6967_v47 }
 0x42b   : > { %v3042_v61 = vadd.f32 %v3041_v38, %v3011_v50  ;;  %v6979_v38 = vsub.f32 %v6795_v2, %v6805_v30  ;;  %v3027_v62 = vmul.f32 %v6973_v10, %v6973_v10 }
 0x42d   : > { %v3043_v44 = vadd.f32 %v3042_v61, %v3012_v22  ;;  %v6985_v61 = vsub.f32 %v6798_v19, %v6805_v30  ;;  %v3028_v2 = vmul.f32 %v6979_v38, %v6979_v38 }
 0x42f   : > { %v3044_v55 = vadd.f32 %v3043_v44, %v3013_v39  ;;  %v6991_v44 = vsub.f32 %v6801_v48, %v6805_v30 }
 0x431   : > { %v3045_v8 = vadd.f32 %v3044_v55, %v3014_v14  ;;  %v3029_v55 = vmul.f32 %v6985_v61, %v6985_v61  ;;  %v3030_v19 = vmul.f32 %v6991_v44, %v6991_v44 }
 0x433   : > { %v3046_v15 = vadd.f32 %v3045_v8, %v3015_v13 }
 0x435   : > { %v3047_v21 = vadd.f32 %v3046_v15, %v3016_v12 }
 0x437   : > { %v3048_v18 = vadd.f32 %v3047_v21, %v3017_v37 }
 0x439   : > { %v3049_v42 = vadd.f32 %v3048_v18, %v3018_v23 }
 0x43b   : > { %v3050_v20 = vadd.f32 %v3049_v42, %v3019_v33 }
 0x43d   : > { %v3051_v7 = vadd.f32 %v3050_v20, %v3020_v11 }
 0x43f   : > { %v3052_v45 = vadd.f32 %v3051_v7, %v3021_v27 }
 0x441   : > { %v3053_v24 = vadd.f32 %v3052_v45, %v3022_v32 }
 0x443   : > { %v3054_v3 = vadd.f32 %v3053_v24, %v3023_v51 }
 0x445   : > { %v3055_v50 = vadd.f32 %v3054_v3, %v3024_v36 }
 0x447   : > { %v3056_v22 = vadd.f32 %v3055_v50, %v3025_v5 }
 0x449   : > { %v3057_v39 = vadd.f32 %v3056_v22, %v3026_v29 }
 0x44b   : > { %v3058_v14 = vadd.f32 %v3057_v39, %v3027_v62 }
 0x44d   : > { %v3059_v13 = vadd.f32 %v3058_v14, %v3028_v2 }
 0x44f   : > { %v3060_v8 = vadd.f32 %v3059_v13, %v3029_v55 }
 0x451   : > { %v3061_v12 = vadd.f32 %v3060_v8, %v3030_v19 }
 0x453   : > { %3062 = vadd.xlane.f32.xlu1 %v3061_v12 }
 0x4c6   : > { %v3063_v15 = vpop.xlane.xlu1 %3062 }
 0x4c7   : > { %v3064_v37 = vmul.f32 0.00024414063, %v3063_v15 }
 0x4c9   : > { %v3065_v21 = vadd.f32 1e-05, %v3064_v37 }
 0x4cb   : > { %3953 = vrsqrt.f32 %v3065_v21  ;;  %vm3072_vm0 = vweird.f32 %v3065_v21 }
 0x4d1   : > { %v3954_v48 = vpop.eup %3953 }
 0x4d2   : > { %v3067_v30 = vmul.f32 %v3954_v48, %v3065_v21  ;;  %vm3073_vm15 = vweird.f32 %v3954_v48 }
 0x4d3   : > { %vm3074_vm1 = vmor %vm3072_vm0, %vm3073_vm15 }
 0x4d4   : > { %v3068_v23 = vmul.f32 %v3954_v48, %v3067_v30 }
 0x4d6   : > { %v3069_v18 = vmul.f32 0.5, %v3068_v23 }
 0x4d8   : > { %v3070_v33 = vsub.f32 1.5, %v3069_v18 }
 0x4da   : > { %v3071_v42 = vmul.f32 %v3954_v48, %v3070_v33 }
 0x4dc   : > { %v6999_v11 = vsel %vm3074_vm1, %v3954_v48, %v3071_v42 }
 0x4dd   : > { %v3076_v20 = vmul.f32 %v6999_v11, %v6809_v63  ;;  %v3077_v27 = vmul.f32 %v6999_v11, %v6813_v9  ;;  %v3078_v7 = vmul.f32 %v6999_v11, %v6817_v17  ;;  %v3079_v32 = vmul.f32 %v6999_v11, %v6825_v52 }
 0x4de   : > { %v3080_v45 = vmul.f32 %v6999_v11, %v6829_v53  ;;  %v3081_v51 = vmul.f32 %v6999_v11, %v6835_v6  ;;  %v3082_v24 = vmul.f32 %v6999_v11, %v6841_v41  ;;  %v3083_v9 = vmul.f32 %v6999_v11, %v6847_v58 }
 0x4df   : > { %v3108_v36 = vsub.f32 0.0, %v3076_v20  ;;  %v3109_v63 = vsub.f32 0.0, %v3077_v27  ;;  %v3110_v3 = vsub.f32 0.0, %v3078_v7  ;;  %v3111_v5 = vsub.f32 0.0, %v3079_v32 }
 0x4e0   : > { %v3084_v17 = vmul.f32 %v6999_v11, %v6853_v57  ;;  %v3112_v52 = vsub.f32 0.0, %v3080_v45  ;;  %v3085_v53 = vmul.f32 %v6999_v11, %v6859_v16  ;;  %v3113_v50 = vsub.f32 0.0, %v3081_v51 }
 0x4e1   : > { %v3114_v29 = vsub.f32 0.0, %v3082_v24  ;;  %v3086_v6 = vmul.f32 %v6999_v11, %v6865_v26  ;;  %v3140_v41 = vmul.f32 1.442695, %v3108_v36  ;;  %v3142_v22 = vmul.f32 1.442695, %v3109_v63 }
 0x4e2   : > { %v3144_v62 = vmul.f32 1.442695, %v3110_v3  ;;  %v3087_v39 = vmul.f32 %v6999_v11, %v6871_v28  ;;  %v3115_v58 = vsub.f32 0.0, %v3083_v9  ;;  %v3146_v2 = vmul.f32 1.442695, %v3111_v5 }
 0x4e3   : > { %v3088_v57 = vmul.f32 %v6999_v11, %v6877_v54  ;;  %v3116_v14 = vsub.f32 0.0, %v3084_v17  ;;  %3955 = vpow2.f32 %v3140_v41  ;;  %v3148_v55 = vmul.f32 1.442695, %v3112_v52 }
 0x4e4   : > { %v3089_v16 = vmul.f32 %v6999_v11, %v6883_v4  ;;  %v3117_v13 = vsub.f32 0.0, %v3085_v53  ;;  %3957 = vpow2.f32 %v3142_v22  ;;  %v3150_v26 = vmul.f32 1.442695, %v3113_v50 }
 0x4e5   : > { %v3090_v19 = vmul.f32 %v6999_v11, %v6889_v1  ;;  %v3118_v8 = vsub.f32 0.0, %v3086_v6  ;;  %3959 = vpow2.f32 %v3144_v62  ;;  %v3152_v28 = vmul.f32 1.442695, %v3114_v29 }
 0x4e6   : > { %v3091_v12 = vmul.f32 %v6999_v11, %v6895_v56  ;;  %v3119_v15 = vsub.f32 0.0, %v3087_v39  ;;  %3961 = vpow2.f32 %v3146_v2  ;;  %v3154_v54 = vmul.f32 1.442695, %v3115_v58 }
 0x4e7   : > { %v3092_v37 = vmul.f32 %v6999_v11, %v6901_v25  ;;  %v3120_v21 = vsub.f32 0.0, %v3088_v57  ;;  %3963 = vpow2.f32 %v3148_v55  ;;  %v3156_v4 = vmul.f32 1.442695, %v3116_v14 }
 0x4e8   : > { %v3093_v48 = vmul.f32 %v6999_v11, %v6907_v59  ;;  %v3121_v30 = vsub.f32 0.0, %v3089_v16  ;;  %3965 = vpow2.f32 %v3150_v26  ;;  %v3158_v1 = vmul.f32 1.442695, %v3117_v13 }
 0x4e9   : > { %v7037_v23 = vpop.eup %3955  ;;  %v3094_v56 = vmul.f32 %v6999_v11, %v6913_v40  ;;  %v3122_v18 = vsub.f32 0.0, %v3090_v19  ;;  %3967 = vpow2.f32 %v3152_v28  ;;  %v3160_v33 = vmul.f32 1.442695, %v3118_v8 }
 0x4ea   : > { %v7041_v42 = vpop.eup %3957  ;;  %v3095_v25 = vmul.f32 %v6999_v11, %v6919_v43  ;;  %v3123_v20 = vsub.f32 0.0, %v3091_v12  ;;  %3969 = vpow2.f32 %v3154_v54  ;;  %v3162_v27 = vmul.f32 1.442695, %v3119_v15 }
 0x4eb   : > { %v7045_v59 = vpop.eup %3959  ;;  %v3096_v7 = vmul.f32 %v6999_v11, %v6925_v31  ;;  %v3124_v32 = vsub.f32 0.0, %v3092_v37  ;;  %3971 = vpow2.f32 %v3156_v4  ;;  %v3164_v45 = vmul.f32 1.442695, %v3120_v21 }
 0x4ec   : > { %v7049_v40 = vpop.eup %3961  ;;  %v3097_v51 = vmul.f32 %v6999_v11, %v6931_v46  ;;  %v3125_v24 = vsub.f32 0.0, %v3093_v48  ;;  %3973 = vpow2.f32 %v3158_v1  ;;  %v3166_v36 = vmul.f32 1.442695, %v3121_v30 }
 0x4ed   : > { %v7053_v43 = vpop.eup %3963  ;;  %v3098_v63 = vmul.f32 %v6999_v11, %v6937_v0  ;;  %v3126_v3 = vsub.f32 0.0, %v3094_v56  ;;  %3975 = vpow2.f32 %v3160_v33  ;;  %v3168_v9 = vmul.f32 1.442695, %v3122_v18 }
 0x4ee   : > { %v7057_v31 = vpop.eup %3965  ;;  %v3099_v5 = vmul.f32 %v6999_v11, %v6943_v35  ;;  %v3127_v17 = vsub.f32 0.0, %v3095_v25  ;;  %3977 = vpow2.f32 %v3162_v27  ;;  %v3170_v52 = vmul.f32 1.442695, %v3123_v20 }
 0x4ef   : > { %v7061_v46 = vpop.eup %3967  ;;  %v3100_v53 = vmul.f32 %v6999_v11, %v6949_v34  ;;  %v3128_v50 = vsub.f32 0.0, %v3096_v7  ;;  %3979 = vpow2.f32 %v3164_v45  ;;  %v3172_v29 = vmul.f32 1.442695, %v3124_v32 }
 0x4f0   : > { %v7065_v0 = vpop.eup %3969  ;;  %v3101_v6 = vmul.f32 %v6999_v11, %v6955_v60  ;;  %v3129_v41 = vsub.f32 0.0, %v3097_v51  ;;  %3981 = vpow2.f32 %v3166_v36  ;;  %v3174_v22 = vmul.f32 1.442695, %v3125_v24 }
 0x4f1   : > { %v7069_v35 = vpop.eup %3971  ;;  %v3102_v62 = vmul.f32 %v6999_v11, %v6961_v49  ;;  %v3130_v39 = vsub.f32 0.0, %v3098_v63  ;;  %3983 = vpow2.f32 %v3168_v9  ;;  %v3176_v58 = vmul.f32 1.442695, %v3126_v3 }
 0x4f2   : > { %v7073_v34 = vpop.eup %3973  ;;  %v3103_v2 = vmul.f32 %v6999_v11, %v6967_v47  ;;  %v3131_v57 = vsub.f32 0.0, %v3099_v5  ;;  %3985 = vpow2.f32 %v3170_v52  ;;  %v3178_v14 = vmul.f32 1.442695, %v3127_v17 }
 0x4f3   : > { %v7077_v60 = vpop.eup %3975  ;;  %v3104_v55 = vmul.f32 %v6999_v11, %v6973_v10  ;;  %v3132_v16 = vsub.f32 0.0, %v3100_v53  ;;  %3987 = vpow2.f32 %v3172_v29  ;;  %v3180_v13 = vmul.f32 1.442695, %v3128_v50 }
 0x4f4   : > { %v7081_v49 = vpop.eup %3977  ;;  %v3105_v26 = vmul.f32 %v6999_v11, %v6979_v38  ;;  %v3133_v19 = vsub.f32 0.0, %v3101_v6  ;;  %3989 = vpow2.f32 %v3174_v22  ;;  %v3182_v8 = vmul.f32 1.442695, %v3129_v41 }
 0x4f5   : > { %v7085_v47 = vpop.eup %3979  ;;  %v3106_v28 = vmul.f32 %v6999_v11, %v6985_v61  ;;  %v3134_v12 = vsub.f32 0.0, %v3102_v62  ;;  %3991 = vpow2.f32 %v3176_v58  ;;  %v3184_v15 = vmul.f32 1.442695, %v3130_v39 }
 0x4f6   : > { %v7089_v10 = vpop.eup %3981  ;;  %v3107_v54 = vmul.f32 %v6999_v11, %v6991_v44  ;;  %v3135_v37 = vsub.f32 0.0, %v3103_v2  ;;  %3993 = vpow2.f32 %v3178_v14  ;;  %v3186_v21 = vmul.f32 1.442695, %v3131_v57 }
 0x4f7   : > { %v7093_v38 = vpop.eup %3983  ;;  %v3136_v4 = vsub.f32 0.0, %v3104_v55  ;;  %3995 = vpow2.f32 %v3180_v13  ;;  %v3188_v48 = vmul.f32 1.442695, %v3132_v16  ;;  %v3137_v1 = vsub.f32 0.0, %v3105_v26  ;;  %v4084_v55 = vld [vmem:[%s4421_s29 + $0x8] sm:$0xff] }
 0x4f8   : > { %v7095_v30 = vpop.eup %3985  ;;  %3997 = vpow2.f32 %v3182_v8  ;;  %v3190_v61 = vmul.f32 1.442695, %v3133_v19  ;;  %v3138_v18 = vsub.f32 0.0, %v3106_v28  ;;  %v3192_v33 = vmul.f32 1.442695, %v3134_v12 }
 0x4f9   : > { %v7097_v56 = vpop.eup %3987  ;;  %3999 = vpow2.f32 %v3184_v15  ;;  %v3139_v44 = vsub.f32 0.0, %v3107_v54  ;;  %v3194_v11 = vmul.f32 1.442695, %v3135_v37  ;;  %v3196_v27 = vmul.f32 1.442695, %v3136_v4 }
 0x4fa   : > { %v7099_v25 = vpop.eup %3989  ;;  %4001 = vpow2.f32 %v3186_v21  ;;  %v3198_v32 = vmul.f32 1.442695, %v3137_v1  ;;  %v3200_v51 = vmul.f32 1.442695, %v3138_v18  ;;  %v3204_v3 = vadd.f32 1.0, %v7037_v23  ;;  %v4089_v1 = vld [vmem:[%s4421_s29 + $0x30] sm:$0xff] }
 0x4fb   : > { %v7101_v20 = vpop.eup %3991  ;;  %4003 = vpow2.f32 %v3188_v48  ;;  %v3202_v36 = vmul.f32 1.442695, %v3139_v44  ;;  %v3205_v5 = vadd.f32 1.0, %v7041_v42  ;;  %v3206_v52 = vadd.f32 1.0, %v7045_v59 }
 0x4fc   : > { %v7103_v7 = vpop.eup %3993  ;;  %4005 = vpow2.f32 %v3190_v61  ;;  %v3207_v50 = vadd.f32 1.0, %v7049_v40  ;;  %v3208_v6 = vadd.f32 1.0, %v7053_v43  ;;  %v3209_v42 = vadd.f32 1.0, %v7057_v31 }
 0x4fd   : > { %v7105_v45 = vpop.eup %3995  ;;  %4007 = vpow2.f32 %v3192_v33  ;;  %v3210_v59 = vadd.f32 1.0, %v7061_v46  ;;  %v3211_v40 = vadd.f32 1.0, %v7065_v0  ;;  %v3212_v43 = vadd.f32 1.0, %v7069_v35  ;;  %v4090_v33 = vld [vmem:[%s4421_s29 + $0x38] sm:$0xff] }
 0x4fe   : > { %v7107_v24 = vpop.eup %3997  ;;  %4009 = vpow2.f32 %v3194_v11  ;;  %v3213_v31 = vadd.f32 1.0, %v7073_v34  ;;  %v3214_v46 = vadd.f32 1.0, %v7077_v60  ;;  %v3215_v35 = vadd.f32 1.0, %v7081_v49  ;;  %v4083_v34 = vld [vmem:[%s4421_s29] sm:$0xff]  ;;  %v4085_v49 = vld [vmem:[%s4421_s29 + $0x10] sm:$0xff] }
 0x4ff   : > { %v7109_v63 = vpop.eup %3999  ;;  %4011 = vpow2.f32 %v3196_v27  ;;  %v3216_v14 = vadd.f32 1.0, %v7085_v47  ;;  %v3217_v13 = vadd.f32 1.0, %v7089_v10  ;;  %v3218_v8 = vadd.f32 1.0, %v7093_v38  ;;  %v4086_v47 = vld [vmem:[%s4421_s29 + $0x18] sm:$0xff]  ;;  %v4087_v10 = vld [vmem:[%s4421_s29 + $0x20] sm:$0xff]  ;;  %v4088_v38 = vld [vmem:[%s4421_s29 + $0x28] sm:$0xff] }
 0x500   : > { %v7112_v9 = vpop.eup %4001  ;;  %4013 = vpow2.f32 %v3198_v32  ;;  %v3219_v15 = vadd.f32 1.0, %v7095_v30  ;;  %v3220_v21 = vadd.f32 1.0, %v7097_v56  ;;  %v3221_v30 = vadd.f32 1.0, %v7099_v25  ;;  %v4091_v27 = vld [vmem:[%s4421_s29 + $0x40] sm:$0xff] }
 0x501   : > { %v7115_v17 = vpop.eup %4003  ;;  %4015 = vpow2.f32 %v3200_v51  ;;  %v3222_v56 = vadd.f32 1.0, %v7101_v20  ;;  %v3223_v25 = vadd.f32 1.0, %v7103_v7  ;;  %v3224_v20 = vadd.f32 1.0, %v7105_v45 }
 0x502   : > { %v7118_v53 = vpop.eup %4005  ;;  %4017 = vpow2.f32 %v3202_v36  ;;  %v4092_v36 = vld [vmem:[%s4421_s29 + $0x48] sm:$0xff]  ;;  %v3225_v7 = vadd.f32 1.0, %v7107_v24  ;;  %v3226_v45 = vadd.f32 1.0, %v7109_v63  ;;  %v3227_v24 = vadd.f32 1.0, %v7112_v9 }
 0x503   : > { %v7121_v29 = vpop.eup %4007  ;;  %4019 = vrcp.f32 %v3204_v3  ;;  %v3228_v63 = vadd.f32 1.0, %v7115_v17  ;;  %v3229_v9 = vadd.f32 1.0, %v7118_v53 }
 0x504   : > { %v7124_v23 = vpop.eup %4009  ;;  %4021 = vrcp.f32 %v3205_v5  ;;  %v3230_v17 = vadd.f32 1.0, %v7121_v29 }
 0x505   : > { %v7127_v41 = vpop.eup %4011  ;;  %4023 = vrcp.f32 %v3206_v52  ;;  %v4093_v52 = vld [vmem:[%s4421_s29 + $0x50] sm:$0xff]  ;;  %v3231_v53 = vadd.f32 1.0, %v7124_v23 }
 0x506   : > { %v7130_v22 = vpop.eup %4013  ;;  %4025 = vrcp.f32 %v3207_v50  ;;  %v3232_v29 = vadd.f32 1.0, %v7127_v41 }
 0x507   : > { %v7133_v62 = vpop.eup %4015  ;;  %4027 = vrcp.f32 %v3208_v6  ;;  %v3233_v23 = vadd.f32 1.0, %v7130_v22 }
 0x508   : > { %v7136_v39 = vpop.eup %4017  ;;  %4029 = vrcp.f32 %v3209_v42  ;;  %v4094_v42 = vld [vmem:[%s4421_s29 + $0x58] sm:$0xff]  ;;  %v3234_v41 = vadd.f32 1.0, %v7133_v62  ;;  %v4104_v62 = vld [vmem:[%s4421_s29 + $0xa8] sm:$0xff] }
 0x509   : > { %v7139_v58 = vpop.eup %4019  ;;  %4031 = vrcp.f32 %v3210_v59 }
 0x50a   : > { %v7149_v0 = vpop.eup %4021  ;;  %4033 = vrcp.f32 %v3211_v40  ;;  %v3268_v2 = vmul.f32 %v4083_v34, %v7139_v58 }
 0x50b   : > { %v7154_v57 = vpop.eup %4023  ;;  %4035 = vrcp.f32 %v3212_v43  ;;  %v3269_v60 = vmul.f32 %v4084_v55, %v7149_v0  ;;  %v4095_v43 = vld [vmem:[%s4421_s29 + $0x60] sm:$0xff] }
 0x50c   : > { %v7159_v16 = vpop.eup %4025  ;;  %4037 = vrcp.f32 %v3213_v31  ;;  %v3270_v26 = vmul.f32 %v4085_v49, %v7154_v57  ;;  %3364 = vst [vmem:[%s7146_s13] sm:$0xff] %v3268_v2 }
 0x50d   : > { %v7165_v19 = vpop.eup %4027  ;;  %4039 = vrcp.f32 %v3214_v46  ;;  %v3271_v28 = vmul.f32 %v4086_v47, %v7159_v16  ;;  %3365 = vst [vmem:[%s7146_s13 + $0x8] sm:$0xff] %v3269_v60 }
 0x50e   : > { %v7171_v12 = vpop.eup %4029  ;;  %4041 = vrcp.f32 %v3215_v35  ;;  %v3272_v54 = vmul.f32 %v4087_v10, %v7165_v19  ;;  %3366 = vst [vmem:[%s7146_s13 + $0x10] sm:$0xff] %v3270_v26  ;;  %v4096_v35 = vld [vmem:[%s4421_s29 + $0x68] sm:$0xff] }
 0x50f   : > { %v7177_v37 = vpop.eup %4031  ;;  %4043 = vrcp.f32 %v3216_v14  ;;  %v3273_v4 = vmul.f32 %v4088_v38, %v7171_v12  ;;  %3367 = vst [vmem:[%s7146_s13 + $0x18] sm:$0xff] %v3271_v28  ;;  %v4097_v14 = vld [vmem:[%s4421_s29 + $0x70] sm:$0xff] }
 0x510   : > { %v7183_v48 = vpop.eup %4033  ;;  %4045 = vrcp.f32 %v3217_v13  ;;  %v3274_v61 = vmul.f32 %v4089_v1, %v7177_v37  ;;  %3368 = vst [vmem:[%s7146_s13 + $0x20] sm:$0xff] %v3272_v54  ;;  %v4098_v13 = vld [vmem:[%s4421_s29 + $0x78] sm:$0xff] }
 0x511   : > { %v7189_v18 = vpop.eup %4035  ;;  %4047 = vrcp.f32 %v3218_v8  ;;  %v3275_v44 = vmul.f32 %v4090_v33, %v7183_v48  ;;  %3369 = vst [vmem:[%s7146_s13 + $0x28] sm:$0xff] %v3273_v4  ;;  %v4099_v8 = vld [vmem:[%s4421_s29 + $0x80] sm:$0xff] }
 0x512   : > { %v7195_v11 = vpop.eup %4037  ;;  %4049 = vrcp.f32 %v3219_v15  ;;  %v3276_v32 = vmul.f32 %v4091_v27, %v7189_v18  ;;  %3370 = vst [vmem:[%s7146_s13 + $0x30] sm:$0xff] %v3274_v61  ;;  %v4100_v15 = vld [vmem:[%s4421_s29 + $0x88] sm:$0xff]  ;;  %v3235_v61 = vadd.f32 1.0, %v7136_v39  ;;  %v4105_v39 = vld [vmem:[%s4421_s29 + $0xb0] sm:$0xff] }
 0x513   : > { %v7201_v51 = vpop.eup %4039  ;;  %4051 = vrcp.f32 %v3220_v21  ;;  %v3277_v3 = vmul.f32 %v4092_v36, %v7195_v11  ;;  %3371 = vst [vmem:[%s7146_s13 + $0x38] sm:$0xff] %v3275_v44  ;;  %v4101_v21 = vld [vmem:[%s4421_s29 + $0x90] sm:$0xff]  ;;  %v4106_v36 = vld [vmem:[%s4421_s29 + $0xb8] sm:$0xff] }
 0x514   : > { %v7207_v5 = vpop.eup %4041  ;;  %4053 = vrcp.f32 %v3221_v30  ;;  %v3278_v50 = vmul.f32 %v4093_v52, %v7201_v51  ;;  %3372 = vst [vmem:[%s7146_s13 + $0x40] sm:$0xff] %v3276_v32  ;;  %v4102_v30 = vld [vmem:[%s4421_s29 + $0x98] sm:$0xff]  ;;  %v4107_v52 = vld [vmem:[%s4421_s29 + $0xc0] sm:$0xff] }
 0x515   : > { %v7213_v6 = vpop.eup %4043  ;;  %4055 = vrcp.f32 %v3222_v56  ;;  %v3279_v59 = vmul.f32 %v4094_v42, %v7207_v5  ;;  %3373 = vst [vmem:[%s7146_s13 + $0x48] sm:$0xff] %v3277_v3  ;;  %v4103_v56 = vld [vmem:[%s4421_s29 + $0xa0] sm:$0xff]  ;;  %v4108_v42 = vld [vmem:[%s4421_s29 + $0xc8] sm:$0xff] }
 0x516   : > { %v7219_v40 = vpop.eup %4045  ;;  %4057 = vrcp.f32 %v3223_v25  ;;  %v3280_v31 = vmul.f32 %v4095_v43, %v7213_v6  ;;  %3374 = vst [vmem:[%s7146_s13 + $0x50] sm:$0xff] %v3278_v50  ;;  %v4109_v43 = vld [vmem:[%s4421_s29 + $0xd0] sm:$0xff] }
 0x517   : > { %v7225_v46 = vpop.eup %4047  ;;  %4059 = vrcp.f32 %v3224_v20  ;;  %v3281_v34 = vmul.f32 %v4096_v35, %v7219_v40  ;;  %3375 = vst [vmem:[%s7146_s13 + $0x58] sm:$0xff] %v3279_v59  ;;  %v4110_v35 = vld [vmem:[%s4421_s29 + $0xd8] sm:$0xff] }
 0x518   : > { %v7231_v2 = vpop.eup %4049  ;;  %4061 = vrcp.f32 %v3225_v7  ;;  %v3282_v55 = vmul.f32 %v4097_v14, %v7225_v46  ;;  %3376 = vst [vmem:[%s7146_s13 + $0x60] sm:$0xff] %v3280_v31  ;;  %v4111_v14 = vld [vmem:[%s4421_s29 + $0xe0] sm:$0xff] }
 0x519   : > { %v7237_v60 = vpop.eup %4051  ;;  %4063 = vrcp.f32 %v3226_v45  ;;  %v3283_v49 = vmul.f32 %v4098_v13, %v7231_v2  ;;  %3377 = vst [vmem:[%s7146_s13 + $0x68] sm:$0xff] %v3281_v34  ;;  %v4112_v13 = vld [vmem:[%s4421_s29 + $0xe8] sm:$0xff] }
 0x51a   : > { %v7243_v26 = vpop.eup %4053  ;;  %4065 = vrcp.f32 %v3227_v24  ;;  %v3284_v47 = vmul.f32 %v4099_v8, %v7237_v60  ;;  %3378 = vst [vmem:[%s7146_s13 + $0x70] sm:$0xff] %v3282_v55  ;;  %v4113_v8 = vld [vmem:[%s4421_s29 + $0xf0] sm:$0xff] }
 0x51b   : > { %v7249_v28 = vpop.eup %4055  ;;  %4067 = vrcp.f32 %v3228_v63  ;;  %v3285_v10 = vmul.f32 %v4100_v15, %v7243_v26  ;;  %3379 = vst [vmem:[%s7146_s13 + $0x78] sm:$0xff] %v3283_v49 }
 0x51c   : > { %v7255_v54 = vpop.eup %4057  ;;  %4069 = vrcp.f32 %v3229_v9  ;;  %v3286_v38 = vmul.f32 %v4101_v21, %v7249_v28  ;;  %3380 = vst [vmem:[%s7146_s13 + $0x80] sm:$0xff] %v3284_v47  ;;  %v4116_v21 = vld [vmem:[%s4421_s29 + $0x108] sm:$0xff] }
 0x51d   : > { %v7261_v4 = vpop.eup %4059  ;;  %4071 = vrcp.f32 %v3230_v17  ;;  %v3287_v1 = vmul.f32 %v4102_v30, %v7255_v54  ;;  %3381 = vst [vmem:[%s7146_s13 + $0x88] sm:$0xff] %v3285_v10  ;;  %v4115_v10 = vld [vmem:[%s4421_s29 + $0xf8] sm:$0xff] }
 0x51e   : > { %v7267_v22 = vpop.eup %4061  ;;  %4073 = vrcp.f32 %v3231_v53  ;;  %v3288_v33 = vmul.f32 %v4103_v56, %v7261_v4  ;;  %3382 = vst [vmem:[%s7146_s13 + $0x90] sm:$0xff] %v3286_v38  ;;  %v3301_v38 = vmul.f32 %v4116_v21, %v7149_v0  ;;  %v4119_v56 = vld [vmem:[%s4421_s29 + $0x120] sm:$0xff]  ;;  %v4132_v21 = vld [vmem:[%s4421_s29 + $0x188] sm:$0xff] }
 0x51f   : > { %v7273_v44 = vpop.eup %4063  ;;  %4075 = vrcp.f32 %v3232_v29  ;;  %v3289_v25 = vmul.f32 %v4104_v62, %v7267_v22  ;;  %3383 = vst [vmem:[%s7146_s13 + $0x98] sm:$0xff] %v3287_v1  ;;  %v4114_v29 = vld [vmem:[%s4421_s29 + $0x100] sm:$0xff]  ;;  %v4118_v1 = vld [vmem:[%s4421_s29 + $0x118] sm:$0xff]  ;;  %v4120_v62 = vld [vmem:[%s4421_s29 + $0x128] sm:$0xff] }
 0x520   : > { %v7278_v27 = vpop.eup %4065  ;;  %4077 = vrcp.f32 %v3233_v23  ;;  %v3290_v32 = vmul.f32 %v4105_v39, %v7273_v44  ;;  %3384 = vst [vmem:[%s7146_s13 + $0xa0] sm:$0xff] %v3288_v33  ;;  %v3300_v15 = vmul.f32 %v4114_v29, %v7139_v58  ;;  %v3304_v33 = vmul.f32 %v4119_v56, %v7165_v19  ;;  %v4121_v39 = vld [vmem:[%s4421_s29 + $0x130] sm:$0xff]  ;;  %v4130_v29 = vld [vmem:[%s4421_s29 + $0x178] sm:$0xff]  ;;  %v4135_v56 = vld [vmem:[%s4421_s29 + $0x1a0] sm:$0xff] }
 0x521   : > { %v7283_v20 = vpop.eup %4067  ;;  %4079 = vrcp.f32 %v3234_v41  ;;  %v3291_v3 = vmul.f32 %v4106_v36, %v7278_v27  ;;  %3385 = vst [vmem:[%s7146_s13 + $0xa8] sm:$0xff] %v3289_v25  ;;  %v4117_v41 = vld [vmem:[%s4421_s29 + $0x110] sm:$0xff]  ;;  %v3305_v25 = vmul.f32 %v4120_v62, %v7171_v12  ;;  %v4122_v36 = vld [vmem:[%s4421_s29 + $0x138] sm:$0xff]  ;;  %v4136_v62 = vld [vmem:[%s4421_s29 + $0x1a8] sm:$0xff] }
 0x522   : > { %v7288_v7 = vpop.eup %4069  ;;  %4081 = vrcp.f32 %v3235_v61  ;;  %v3292_v50 = vmul.f32 %v4107_v52, %v7283_v20  ;;  %3386 = vst [vmem:[%s7146_s13 + $0xb0] sm:$0xff] %v3290_v32  ;;  %v3302_v30 = vmul.f32 %v4117_v41, %v7154_v57  ;;  %v3303_v61 = vmul.f32 %v4118_v1, %v7159_v16  ;;  %v4123_v52 = vld [vmem:[%s4421_s29 + $0x140] sm:$0xff]  ;;  %v4133_v41 = vld [vmem:[%s4421_s29 + $0x190] sm:$0xff]  ;;  %v4134_v1 = vld [vmem:[%s4421_s29 + $0x198] sm:$0xff] }
 0x523   : > { %v7293_v45 = vpop.eup %4071  ;;  %v3293_v59 = vmul.f32 %v4108_v42, %v7288_v7  ;;  %3387 = vst [vmem:[%s7146_s13 + $0xb8] sm:$0xff] %v3291_v3  ;;  %v3306_v32 = vmul.f32 %v4121_v39, %v7177_v37  ;;  %v3307_v3 = vmul.f32 %v4122_v36, %v7183_v48  ;;  %v4124_v42 = vld [vmem:[%s4421_s29 + $0x148] sm:$0xff]  ;;  %v4137_v39 = vld [vmem:[%s4421_s29 + $0x1b0] sm:$0xff]  ;;  %v4138_v36 = vld [vmem:[%s4421_s29 + $0x1b8] sm:$0xff] }
 0x524   : > { %v7298_v24 = vpop.eup %4073  ;;  %v3294_v31 = vmul.f32 %v4109_v43, %v7293_v45  ;;  %3388 = vst [vmem:[%s7146_s13 + $0xc0] sm:$0xff] %v3292_v50  ;;  %v3308_v50 = vmul.f32 %v4123_v52, %v7189_v18  ;;  %v4125_v43 = vld [vmem:[%s4421_s29 + $0x150] sm:$0xff]  ;;  %v4139_v52 = vld [vmem:[%s4421_s29 + $0x1c0] sm:$0xff] }
 0x525   : > { %v7303_v63 = vpop.eup %4075  ;;  %v3295_v34 = vmul.f32 %v4110_v35, %v7298_v24  ;;  %3389 = vst [vmem:[%s7146_s13 + $0xc8] sm:$0xff] %v3293_v59  ;;  %v3309_v59 = vmul.f32 %v4124_v42, %v7195_v11  ;;  %v4126_v35 = vld [vmem:[%s4421_s29 + $0x158] sm:$0xff]  ;;  %v4140_v42 = vld [vmem:[%s4421_s29 + $0x1c8] sm:$0xff] }
 0x526   : > { %v7308_v9 = vpop.eup %4077  ;;  %v3296_v55 = vmul.f32 %v4111_v14, %v7303_v63  ;;  %3390 = vst [vmem:[%s7146_s13 + $0xd0] sm:$0xff] %v3294_v31  ;;  %v3310_v31 = vmul.f32 %v4125_v43, %v7201_v51  ;;  %v4127_v14 = vld [vmem:[%s4421_s29 + $0x160] sm:$0xff]  ;;  %v4141_v43 = vld [vmem:[%s4421_s29 + $0x1d0] sm:$0xff] }
 0x527   : > { %v7313_v17 = vpop.eup %4079  ;;  %v3297_v49 = vmul.f32 %v4112_v13, %v7308_v9  ;;  %3391 = vst [vmem:[%s7146_s13 + $0xd8] sm:$0xff] %v3295_v34  ;;  %v3311_v34 = vmul.f32 %v4126_v35, %v7207_v5  ;;  %v4128_v13 = vld [vmem:[%s4421_s29 + $0x168] sm:$0xff]  ;;  %v4142_v35 = vld [vmem:[%s4421_s29 + $0x1d8] sm:$0xff] }
 0x528   : > { %v7318_v53 = vpop.eup %4081  ;;  %v3298_v47 = vmul.f32 %v4113_v8, %v7313_v17  ;;  %3392 = vst [vmem:[%s7146_s13 + $0xe0] sm:$0xff] %v3296_v55  ;;  %v3312_v55 = vmul.f32 %v4127_v14, %v7213_v6  ;;  %v4129_v8 = vld [vmem:[%s4421_s29 + $0x170] sm:$0xff]  ;;  %v4143_v14 = vld [vmem:[%s4421_s29 + $0x1e0] sm:$0xff] }
 0x529   : > { %v3299_v23 = vmul.f32 %v4115_v10, %v7318_v53  ;;  %3393 = vst [vmem:[%s7146_s13 + $0xe8] sm:$0xff] %v3297_v49  ;;  %v3313_v49 = vmul.f32 %v4128_v13, %v7219_v40  ;;  %v4131_v10 = vld [vmem:[%s4421_s29 + $0x180] sm:$0xff]  ;;  %v4144_v13 = vld [vmem:[%s4421_s29 + $0x1e8] sm:$0xff] }
 0x52a   : > { %3394 = vst [vmem:[%s7146_s13 + $0xf0] sm:$0xff] %v3298_v47  ;;  %v3314_v47 = vmul.f32 %v4129_v8, %v7225_v46  ;;  %v4145_v8 = vld [vmem:[%s4421_s29 + $0x1f0] sm:$0xff] }
 0x52b   : > { %3395 = vst [vmem:[%s7146_s13 + $0xf8] sm:$0xff] %v3299_v23  ;;  %v3316_v23 = vmul.f32 %v4131_v10, %v7237_v60  ;;  %v4147_v10 = vld [vmem:[%s4421_s29 + $0x200] sm:$0xff] }
 0x52c   : > { %3396 = vst [vmem:[%s7146_s13 + $0x100] sm:$0xff] %v3300_v15  ;;  %v3315_v15 = vmul.f32 %v4130_v29, %v7231_v2  ;;  %v4146_v29 = vld [vmem:[%s4421_s29 + $0x1f8] sm:$0xff] }
 0x52d   : > { %3397 = vst [vmem:[%s7146_s13 + $0x108] sm:$0xff] %v3301_v38  ;;  %v3317_v38 = vmul.f32 %v4132_v21, %v7243_v26  ;;  %v4148_v21 = vld [vmem:[%s4421_s29 + $0x208] sm:$0xff] }
 0x52e   : > { %3398 = vst [vmem:[%s7146_s13 + $0x110] sm:$0xff] %v3302_v30  ;;  %v3318_v30 = vmul.f32 %v4133_v41, %v7249_v28  ;;  %v4149_v41 = vld [vmem:[%s4421_s29 + $0x210] sm:$0xff] }
 0x52f   : > { %3399 = vst [vmem:[%s7146_s13 + $0x118] sm:$0xff] %v3303_v61  ;;  %v3319_v61 = vmul.f32 %v4134_v1, %v7255_v54  ;;  %v4150_v1 = vld [vmem:[%s4421_s29 + $0x218] sm:$0xff] }
 0x530   : > { %3400 = vst [vmem:[%s7146_s13 + $0x120] sm:$0xff] %v3304_v33  ;;  %v3320_v33 = vmul.f32 %v4135_v56, %v7261_v4 }
 0x531   : > { %3401 = vst [vmem:[%s7146_s13 + $0x128] sm:$0xff] %v3305_v25  ;;  %v3321_v25 = vmul.f32 %v4136_v62, %v7267_v22 }
 0x532   : > { %3402 = vst [vmem:[%s7146_s13 + $0x130] sm:$0xff] %v3306_v32  ;;  %v3322_v32 = vmul.f32 %v4137_v39, %v7273_v44 }
 0x533   : > { %3403 = vst [vmem:[%s7146_s13 + $0x138] sm:$0xff] %v3307_v3  ;;  %v3323_v3 = vmul.f32 %v4138_v36, %v7278_v27 }
 0x534   : > { %3404 = vst [vmem:[%s7146_s13 + $0x140] sm:$0xff] %v3308_v50  ;;  %v3324_v50 = vmul.f32 %v4139_v52, %v7283_v20 }
 0x535   : > { %3405 = vst [vmem:[%s7146_s13 + $0x148] sm:$0xff] %v3309_v59  ;;  %v3325_v59 = vmul.f32 %v4140_v42, %v7288_v7 }
 0x536   : > { %3406 = vst [vmem:[%s7146_s13 + $0x150] sm:$0xff] %v3310_v31  ;;  %v3326_v31 = vmul.f32 %v4141_v43, %v7293_v45 }
 0x537   : > { %3407 = vst [vmem:[%s7146_s13 + $0x158] sm:$0xff] %v3311_v34  ;;  %v3327_v34 = vmul.f32 %v4142_v35, %v7298_v24 }
 0x538   : > { %3408 = vst [vmem:[%s7146_s13 + $0x160] sm:$0xff] %v3312_v55  ;;  %v3328_v55 = vmul.f32 %v4143_v14, %v7303_v63 }
 0x539   : > { %3409 = vst [vmem:[%s7146_s13 + $0x168] sm:$0xff] %v3313_v49  ;;  %v3329_v49 = vmul.f32 %v4144_v13, %v7308_v9 }
 0x53a   : > { %3410 = vst [vmem:[%s7146_s13 + $0x170] sm:$0xff] %v3314_v47  ;;  %v3330_v47 = vmul.f32 %v4145_v8, %v7313_v17 }
 0x53b   : > { %3411 = vst [vmem:[%s7146_s13 + $0x178] sm:$0xff] %v3315_v15  ;;  %v3331_v15 = vmul.f32 %v4146_v29, %v7318_v53 }
 0x53c   : > { %3412 = vst [vmem:[%s7146_s13 + $0x180] sm:$0xff] %v3316_v23  ;;  %v3332_v23 = vmul.f32 %v4147_v10, %v7139_v58  ;;  %v4151_v58 = vld [vmem:[%s4421_s29 + $0x220] sm:$0xff] }
 0x53d   : > { %3413 = vst [vmem:[%s7146_s13 + $0x188] sm:$0xff] %v3317_v38  ;;  %v3333_v38 = vmul.f32 %v4148_v21, %v7149_v0  ;;  %v3336_v56 = vmul.f32 %v4151_v58, %v7165_v19  ;;  %v4152_v0 = vld [vmem:[%s4421_s29 + $0x228] sm:$0xff]  ;;  %v4155_v19 = vld [vmem:[%s4421_s29 + $0x240] sm:$0xff]  ;;  %v4177_v21 = vld [vmem:[%s4421_s29 + $0x2f0] sm:$0xff] }
 0x53e   : > { %3414 = vst [vmem:[%s7146_s13 + $0x190] sm:$0xff] %v3318_v30  ;;  %v3334_v30 = vmul.f32 %v4149_v41, %v7154_v57  ;;  %v4153_v57 = vld [vmem:[%s4421_s29 + $0x230] sm:$0xff]  ;;  %v3340_v39 = vmul.f32 %v4155_v19, %v7189_v18  ;;  %v4159_v18 = vld [vmem:[%s4421_s29 + $0x260] sm:$0xff] }
 0x53f   : > { %3415 = vst [vmem:[%s7146_s13 + $0x198] sm:$0xff] %v3319_v61  ;;  %v3335_v61 = vmul.f32 %v4150_v1, %v7159_v16  ;;  %v3338_v62 = vmul.f32 %v4153_v57, %v7177_v37  ;;  %v4154_v16 = vld [vmem:[%s4421_s29 + $0x238] sm:$0xff]  ;;  %v4157_v37 = vld [vmem:[%s4421_s29 + $0x250] sm:$0xff]  ;;  %v3344_v52 = vmul.f32 %v4159_v18, %v7213_v6  ;;  %v4163_v6 = vld [vmem:[%s4421_s29 + $0x280] sm:$0xff] }
 0x540   : > { %3416 = vst [vmem:[%s7146_s13 + $0x1a0] sm:$0xff] %v3320_v33  ;;  %v3337_v33 = vmul.f32 %v4152_v0, %v7171_v12  ;;  %v4156_v12 = vld [vmem:[%s4421_s29 + $0x248] sm:$0xff]  ;;  %v3342_v36 = vmul.f32 %v4157_v37, %v7201_v51  ;;  %v4161_v51 = vld [vmem:[%s4421_s29 + $0x270] sm:$0xff]  ;;  %v3348_v43 = vmul.f32 %v4163_v6, %v7237_v60  ;;  %v4167_v60 = vld [vmem:[%s4421_s29 + $0x2a0] sm:$0xff] }
 0x541   : > { %3417 = vst [vmem:[%s7146_s13 + $0x1a8] sm:$0xff] %v3321_v25  ;;  %v3339_v25 = vmul.f32 %v4154_v16, %v7183_v48  ;;  %v4158_v48 = vld [vmem:[%s4421_s29 + $0x258] sm:$0xff]  ;;  %v3346_v42 = vmul.f32 %v4161_v51, %v7225_v46  ;;  %v4165_v46 = vld [vmem:[%s4421_s29 + $0x290] sm:$0xff]  ;;  %v3352_v14 = vmul.f32 %v4167_v60, %v7261_v4  ;;  %v4171_v4 = vld [vmem:[%s4421_s29 + $0x2c0] sm:$0xff] }
 0x542   : > { %3418 = vst [vmem:[%s7146_s13 + $0x1b0] sm:$0xff] %v3322_v32  ;;  %v3341_v32 = vmul.f32 %v4156_v12, %v7195_v11  ;;  %v4160_v11 = vld [vmem:[%s4421_s29 + $0x268] sm:$0xff]  ;;  %v3350_v35 = vmul.f32 %v4165_v46, %v7249_v28  ;;  %v4169_v28 = vld [vmem:[%s4421_s29 + $0x2b0] sm:$0xff]  ;;  %v3356_v8 = vmul.f32 %v4171_v4, %v7283_v20  ;;  %v4175_v20 = vld [vmem:[%s4421_s29 + $0x2e0] sm:$0xff] }
 0x543   : > { %3419 = vst [vmem:[%s7146_s13 + $0x1b8] sm:$0xff] %v3323_v3  ;;  %v3343_v3 = vmul.f32 %v4158_v48, %v7207_v5  ;;  %v4162_v5 = vld [vmem:[%s4421_s29 + $0x278] sm:$0xff]  ;;  %v3354_v13 = vmul.f32 %v4169_v28, %v7273_v44  ;;  %v4173_v44 = vld [vmem:[%s4421_s29 + $0x2d0] sm:$0xff]  ;;  %v3360_v10 = vmul.f32 %v4175_v20, %v7303_v63 }
 0x544   : > { %3420 = vst [vmem:[%s7146_s13 + $0x1c0] sm:$0xff] %v3324_v50  ;;  %v3345_v50 = vmul.f32 %v4160_v11, %v7219_v40  ;;  %v4164_v40 = vld [vmem:[%s4421_s29 + $0x288] sm:$0xff]  ;;  %v3358_v29 = vmul.f32 %v4173_v44, %v7293_v45  ;;  %v3362_v45 = vmul.f32 %v4177_v21, %v7313_v17 }
 0x545   : > { %3421 = vst [vmem:[%s7146_s13 + $0x1c8] sm:$0xff] %v3325_v59  ;;  %v3347_v59 = vmul.f32 %v4162_v5, %v7231_v2  ;;  %v4166_v2 = vld [vmem:[%s4421_s29 + $0x298] sm:$0xff] }
 0x546   : > { %3422 = vst [vmem:[%s7146_s13 + $0x1d0] sm:$0xff] %v3326_v31  ;;  %v3349_v31 = vmul.f32 %v4164_v40, %v7243_v26  ;;  %v4168_v26 = vld [vmem:[%s4421_s29 + $0x2a8] sm:$0xff] }
 0x547   : > { %3423 = vst [vmem:[%s7146_s13 + $0x1d8] sm:$0xff] %v3327_v34  ;;  %v3351_v34 = vmul.f32 %v4166_v2, %v7255_v54  ;;  %v4170_v54 = vld [vmem:[%s4421_s29 + $0x2b8] sm:$0xff] }
 0x548   : > { %3424 = vst [vmem:[%s7146_s13 + $0x1e0] sm:$0xff] %v3328_v55  ;;  %v3353_v55 = vmul.f32 %v4168_v26, %v7267_v22  ;;  %v4172_v22 = vld [vmem:[%s4421_s29 + $0x2c8] sm:$0xff] }
 0x549   : > { %3425 = vst [vmem:[%s7146_s13 + $0x1e8] sm:$0xff] %v3329_v49  ;;  %v3355_v49 = vmul.f32 %v4170_v54, %v7278_v27  ;;  %v4174_v27 = vld [vmem:[%s4421_s29 + $0x2d8] sm:$0xff] }
 0x54a   : > { %3426 = vst [vmem:[%s7146_s13 + $0x1f0] sm:$0xff] %v3330_v47  ;;  %v3357_v47 = vmul.f32 %v4172_v22, %v7288_v7  ;;  %v4176_v7 = vld [vmem:[%s4421_s29 + $0x2e8] sm:$0xff] }
 0x54b   : > { %3427 = vst [vmem:[%s7146_s13 + $0x1f8] sm:$0xff] %v3331_v15  ;;  %v3359_v15 = vmul.f32 %v4174_v27, %v7298_v24 }
 0x54c   : > { %3428 = vst [vmem:[%s7146_s13 + $0x200] sm:$0xff] %v3332_v23  ;;  %v3361_v23 = vmul.f32 %v4176_v7, %v7308_v9 }
 0x54d   : > { %3429 = vst [vmem:[%s7146_s13 + $0x208] sm:$0xff] %v3333_v38  ;;  %v4178_v38 = vld [vmem:[%s4421_s29 + $0x2f8] sm:$0xff] }
 0x54e   : > { %3430 = vst [vmem:[%s7146_s13 + $0x210] sm:$0xff] %v3334_v30  ;;  %v3363_v41 = vmul.f32 %v4178_v38, %v7318_v53 }
 0x54f   : > { %3431 = vst [vmem:[%s7146_s13 + $0x218] sm:$0xff] %v3335_v61 }
 0x550   : > { %3432 = vst [vmem:[%s7146_s13 + $0x220] sm:$0xff] %v3336_v56 }
 0x551   : > { %3433 = vst [vmem:[%s7146_s13 + $0x228] sm:$0xff] %v3337_v33 }
 0x552   : > { %3434 = vst [vmem:[%s7146_s13 + $0x230] sm:$0xff] %v3338_v62 }
 0x553   : > { %3435 = vst [vmem:[%s7146_s13 + $0x238] sm:$0xff] %v3339_v25 }
 0x554   : > { %3436 = vst [vmem:[%s7146_s13 + $0x240] sm:$0xff] %v3340_v39 }
 0x555   : > { %3437 = vst [vmem:[%s7146_s13 + $0x248] sm:$0xff] %v3341_v32 }
 0x556   : > { %3438 = vst [vmem:[%s7146_s13 + $0x250] sm:$0xff] %v3342_v36 }
 0x557   : > { %3439 = vst [vmem:[%s7146_s13 + $0x258] sm:$0xff] %v3343_v3 }
 0x558   : > { %3440 = vst [vmem:[%s7146_s13 + $0x260] sm:$0xff] %v3344_v52 }
 0x559   : > { %3441 = vst [vmem:[%s7146_s13 + $0x268] sm:$0xff] %v3345_v50 }
 0x55a   : > { %3442 = vst [vmem:[%s7146_s13 + $0x270] sm:$0xff] %v3346_v42 }
 0x55b   : > { %3443 = vst [vmem:[%s7146_s13 + $0x278] sm:$0xff] %v3347_v59 }
 0x55c   : > { %3444 = vst [vmem:[%s7146_s13 + $0x280] sm:$0xff] %v3348_v43 }
 0x55d   : > { %3445 = vst [vmem:[%s7146_s13 + $0x288] sm:$0xff] %v3349_v31 }
 0x55e   : > { %3446 = vst [vmem:[%s7146_s13 + $0x290] sm:$0xff] %v3350_v35 }
 0x55f   : > { %3447 = vst [vmem:[%s7146_s13 + $0x298] sm:$0xff] %v3351_v34 }
 0x560   : > { %3448 = vst [vmem:[%s7146_s13 + $0x2a0] sm:$0xff] %v3352_v14 }
 0x561   : > { %3449 = vst [vmem:[%s7146_s13 + $0x2a8] sm:$0xff] %v3353_v55 }
 0x562   : > { %3450 = vst [vmem:[%s7146_s13 + $0x2b0] sm:$0xff] %v3354_v13 }
 0x563   : > { %3451 = vst [vmem:[%s7146_s13 + $0x2b8] sm:$0xff] %v3355_v49 }
 0x564   : > { %3452 = vst [vmem:[%s7146_s13 + $0x2c0] sm:$0xff] %v3356_v8 }
 0x565   : > { %3453 = vst [vmem:[%s7146_s13 + $0x2c8] sm:$0xff] %v3357_v47 }
 0x566   : > { %3454 = vst [vmem:[%s7146_s13 + $0x2d0] sm:$0xff] %v3358_v29 }
 0x567   : > { %3455 = vst [vmem:[%s7146_s13 + $0x2d8] sm:$0xff] %v3359_v15 }
 0x568   : > { %3456 = vst [vmem:[%s7146_s13 + $0x2e0] sm:$0xff] %v3360_v10 }
 0x569   : > { %3457 = vst [vmem:[%s7146_s13 + $0x2e8] sm:$0xff] %v3361_v23 }
 0x56a   : > { %3458 = vst [vmem:[%s7146_s13 + $0x2f0] sm:$0xff] %v3362_v45 }
 0x56b   : > { %3459 = vst [vmem:[%s7146_s13 + $0x2f8] sm:$0xff] %v3363_v41 }
 0x56c PF: > { %s15_s18 = sadd.s32 1, %s4185_s18  }
 0x56d   : > { %p12_p4 = scmp.ge.s32.totalorder %s15_s18, 4  }
 0x56f   :  { %14 = sbr.rel (!%p12_p4) target bundleno = 1 (0x1), region = 73 }

</bundles_post_ra>
